<compile_context>
chip_gen: v6e
topology: v6e:2x2x1
jax: 0.10.0
libtpu: 0.0.40
codegen_flags: <defaults>
</compile_context>

<pallas_src>
import functools

import jax
import jax.numpy as jnp
from jax.experimental import pallas as pl
from jax.experimental.pallas import tpu as pltpu

# ----------------------------------------------------------------------------
# Static model configuration (matches the nn.Module).
# ----------------------------------------------------------------------------
PT_FEATURE_SIZE = 25
SM_FEATURE_SIZE = 64
EMBED = 128
SEQ_KERNELS = (4, 8, 12)
PKT_KERNELS = (4, 6, 8)
CONV_CHANNELS = (128, 32, 64, 96)

# f32 slab row layout
F_SEQ_SHIFT = 0      # rows 0..2  : seq conv shifts (conv bias + folded BN)
F_PKT_SHIFT = 3      # rows 3..5  : pkt conv shifts
F_CB1 = 6            # row  6     : classifier Linear(192,128) bias
F_CB2 = 7            # row  7     : classifier Linear(128,64) bias (lanes :64)
F_W3 = 8             # row  8     : classifier Linear(64,1) weight row (lanes :64)
F_CB3 = 9            # row  9     : classifier Linear(64,1) bias (lane 0)
F_ALPHA = 10         # rows 10..18: PReLU alphas (lane-broadcast): seq0..2, pkt0..2, cls0..2
F_ROWS = 24


def _round8(x):
    return (x + 7) // 8 * 8


def _build_offsets():
    """Row offsets of every matmul weight inside the single bf16 slab."""
    off, r = {}, 0

    def put(name, rows):
        nonlocal r
        off[name] = r
        r += _round8(rows)

    put("seq_emb", PT_FEATURE_SIZE)
    put("smi_emb", SM_FEATURE_SIZE)
    for name, kernels in (("seq", SEQ_KERNELS), ("pkt", PKT_KERNELS)):
        for i, k in enumerate(kernels):
            put(f"{name}_conv{i}", k * CONV_CHANNELS[i])
    put("cls1", 256)   # (192,128) padded to 256 rows (seq feats at 0..95, pkt at 128..223)
    put("cls2", 128)
    return off, r


W_OFFSETS, W_ROWS = _build_offsets()


def _branch_geometry(length, kernels):
    """Valid conv output lengths + row paddings (multiples of 8) per layer.

    Padding is computed backwards so every in-kernel im2col slice
    h[base + j : base + j + P_i] stays inside the previous layer's padded block.
    """
    louts, l = [], length
    for k in kernels:
        l = l - k + 1
        louts.append(l)
    P = [0] * len(kernels)
    P[-1] = _round8(louts[-1])
    for i in range(len(kernels) - 2, -1, -1):
        P[i] = _round8(max(louts[i], P[i + 1] + kernels[i + 1] - 1))
    P0 = _round8(max(length, P[0] + kernels[0] - 1))
    return P0, tuple(P), tuple(louts)


def _prelu(y, a_row):
    # PyTorch PReLU with a single learnable scalar (num_parameters=1);
    # a_row is that scalar broadcast across lanes.
    return jnp.where(y > 0, y, a_row * y)


# ----------------------------------------------------------------------------
# Kernel: both conv branches + concat + classifier in one invocation.
# ----------------------------------------------------------------------------
def _dta_kernel(seq_ref, pkt_ref, w_ref, f_ref, o_ref, *,
                S, seq_geom, pkt_geom):
    f32, bf16 = jnp.float32, jnp.bfloat16

    def branch(x_ref, emb_off, conv_offs, kernels, geom, shift_row0, alpha_row0):
        p0, p_out_list, l_outs = geom
        feat = x_ref.shape[1]
        # Embedding: nn.Linear(F, 128, bias=False) over all resident samples at once.
        x = x_ref[...].astype(bf16)                                   # (S*p0, F)
        w_emb = w_ref[emb_off:emb_off + feat, :]                      # (F, 128) bf16
        h = jnp.dot(x, w_emb, preferred_element_type=f32).astype(bf16)  # (S*p0, 128)

        p_prev, c_in = p0, EMBED
        for li, k in enumerate(kernels):
            c_out = CONV_CHANNELS[li + 1]
            p_out = p_out_list[li]
            # last layer keeps the full 128 lanes (zero-padded cols) so the
            # pooled features are already 128-wide for the padded classifier.
            n_cols = 128 if li == len(kernels) - 1 else c_out
            w_off = conv_offs[li]
            # im2col in bf16, rows padded to a multiple of 8, all resident
            # samples stacked along M -> a single MXU push per layer.
            pieces = []
            for b in range(S):
                base = b * p_prev
                pieces.append(jnp.concatenate(
                    [h[base + j: base + j + p_out, :] for j in range(k)], axis=1))
            hcat = jnp.concatenate(pieces, axis=0)                    # (S*p_out, k*c_in) bf16
            w_l = w_ref[w_off:w_off + k * c_in, :n_cols]              # (k*c_in, n_cols) bf16
            y = jnp.dot(hcat, w_l, preferred_element_type=f32)        # (S*p_out, n_cols) f32
            y = y + f_ref[shift_row0 + li: shift_row0 + li + 1, :n_cols]   # conv bias + BN (folded)
            y = _prelu(y, f_ref[alpha_row0 + li: alpha_row0 + li + 1, :n_cols])
            h = y.astype(bf16)                                        # cast once, post-PReLU
            p_prev, c_in = p_out, c_out

        # AdaptiveMaxPool1d(1) + Squeeze: mask padded rows, max per sample.
        rows_i = jax.lax.broadcasted_iota(jnp.int32, (p_prev, 1), 0)
        valid = rows_i < l_outs[-1]
        feats = []
        for b in range(S):
            blk = h[b * p_prev:(b + 1) * p_prev, :].astype(f32)
            blk = jnp.where(valid, blk, -jnp.inf)
            feats.append(jnp.max(blk, axis=0, keepdims=True))
        return jnp.concatenate(feats, axis=0)                         # (S, 128); lanes 96.. == 0

    seq_feat = branch(seq_ref, W_OFFSETS["seq_emb"],
                      tuple(W_OFFSETS[f"seq_conv{i}"] for i in range(len(SEQ_KERNELS))),
                      SEQ_KERNELS, seq_geom, F_SEQ_SHIFT, F_ALPHA + 0)
    pkt_feat = branch(pkt_ref, W_OFFSETS["smi_emb"],
                      tuple(W_OFFSETS[f"pkt_conv{i}"] for i in range(len(PKT_KERNELS))),
                      PKT_KERNELS, pkt_geom, F_PKT_SHIFT, F_ALPHA + 3)

    # torch.cat(dim=1); cat_dropout / classifier dropouts are identity (eval).
    cat = jnp.concatenate([seq_feat, pkt_feat], axis=1).astype(jnp.bfloat16)   # (S, 256)
    o1, o2 = W_OFFSETS["cls1"], W_OFFSETS["cls2"]

    h = jnp.dot(cat, w_ref[o1:o1 + 256, :],
                preferred_element_type=jnp.float32) + f_ref[F_CB1:F_CB1 + 1, :]     # Linear(192,128)
    h = _prelu(h, f_ref[F_ALPHA + 6:F_ALPHA + 7, :])
    h = jnp.dot(h.astype(jnp.bfloat16), w_ref[o2:o2 + 128, :],
                preferred_element_type=jnp.float32) + f_ref[F_CB2:F_CB2 + 1, :]     # Linear(128,64)
    h = _prelu(h, f_ref[F_ALPHA + 7:F_ALPHA + 8, :])
    # Linear(64,1) as lane-mul + reduce (avoids an Nx1 matmul); pad lanes are 0.
    h = jnp.sum(h * f_ref[F_W3:F_W3 + 1, :], axis=1, keepdims=True) \
        + f_ref[F_CB3:F_CB3 + 1, :1]
    h = _prelu(h, f_ref[F_ALPHA + 8:F_ALPHA + 9, :1])                               # final PReLU (per spec)
    o_ref[...] = h.reshape(o_ref.shape)


# ----------------------------------------------------------------------------
# Parameters: deterministic, matching the nn.Module shapes, packed into the
# two slabs.  Conv weights are stored im2col-reshaped (k*c_in, c_out) with the
# eval-mode BatchNorm scale folded in; conv bias + BN shift are folded into the
# per-layer shift rows.
# ----------------------------------------------------------------------------
def init_params(key):
    keys = iter(jax.random.split(key, 64))

    def rnd(shape, scale=0.1):
        return scale * jax.random.normal(next(keys), shape, jnp.float32)

    w = jnp.zeros((W_ROWS, 128), jnp.float32)
    f = jnp.zeros((F_ROWS, 128), jnp.float32)

    # Embeddings: nn.Linear(F, 128, bias=False), stored as W^T = (F, 128).
    w = w.at[W_OFFSETS["seq_emb"]:W_OFFSETS["seq_emb"] + PT_FEATURE_SIZE].set(
        rnd((PT_FEATURE_SIZE, 128)))
    w = w.at[W_OFFSETS["smi_emb"]:W_OFFSETS["smi_emb"] + SM_FEATURE_SIZE].set(
        rnd((SM_FEATURE_SIZE, 128)))

    # Conv stacks with eval-mode BatchNorm folded in.
    for name, kernels in (("seq", SEQ_KERNELS), ("pkt", PKT_KERNELS)):
        shift_row0 = F_SEQ_SHIFT if name == "seq" else F_PKT_SHIFT
        for li, k in enumerate(kernels):
            cin, cout = CONV_CHANNELS[li], CONV_CHANNELS[li + 1]
            wt = rnd((k, cin, cout))          # tap-major; torch Conv1d is (cout,cin,k) -> transpose(2,1,0)
            b = rnd((cout,))
            gamma = 1.0 + rnd((cout,))
            beta = rnd((cout,))
            mean = rnd((cout,))
            var = jax.random.uniform(next(keys), (cout,), jnp.float32,
                                     minval=0.5, maxval=1.5)
            scale = gamma * jax.lax.rsqrt(var + 1e-5)                 # BN eval scale
            w_fold = (wt * scale[None, None, :]).reshape(k * cin, cout)
            shift = b * scale + (beta - mean * scale)                 # bias + BN shift
            off = W_OFFSETS[f"{name}_conv{li}"]
            w = w.at[off:off + k * cin, :cout].set(w_fold)
            f = f.at[shift_row0 + li, :cout].set(shift)

    # Classifier.
    w1 = rnd((192, 128)); b1 = rnd((128,))                            # Linear(192,128)
    w2 = rnd((128, 64)); b2 = rnd((64,))                              # Linear(128,64)
    w3 = rnd((64,)); b3 = rnd((1,))                                   # Linear(64,1)
    o1 = W_OFFSETS["cls1"]
    w = w.at[o1:o1 + 96].set(w1[:96])             # seq features -> cat lanes 0..95
    w = w.at[o1 + 128:o1 + 224].set(w1[96:])      # pkt features -> cat lanes 128..223
    o2 = W_OFFSETS["cls2"]
    w = w.at[o2:o2 + 128, :64].set(w2)
    f = f.at[F_CB1].set(b1)
    f = f.at[F_CB2, :64].set(b2)
    f = f.at[F_W3, :64].set(w3)
    f = f.at[F_CB3, 0].set(b3[0])
    # 9 scalar PReLUs (torch init 0.25), lane-broadcast rows.
    f = f.at[F_ALPHA:F_ALPHA + 9].set(jnp.full((9, 128), 0.25, jnp.float32))

    return {"wslab": w.astype(jnp.bfloat16), "fslab": f}


# ----------------------------------------------------------------------------
# Wrapper.
# ----------------------------------------------------------------------------
@functools.partial(jax.jit, static_argnames=("samples_per_step",))
def dta_forward(seq, pkt, params, samples_per_step=None):
    B, L_seq, F_seq = seq.shape
    _, L_pkt, F_pkt = pkt.shape
    # Default: the whole batch in ONE grid step (best for single-TC v5e/v6e).
    # On v7x, pass samples_per_step=ceil(B/2) to spread across the two TCs.
    S = B if samples_per_step is None else samples_per_step
    assert B % S == 0
    num_steps = B // S

    seq_P0, seq_P, seq_louts = _branch_geometry(L_seq, SEQ_KERNELS)
    pkt_P0, pkt_P, pkt_louts = _branch_geometry(L_pkt, PKT_KERNELS)
    assert seq_louts[-1] >= 1 and pkt_louts[-1] >= 1, "input too short for conv stack"

    # Zero-pad the length dim so every in-kernel im2col slice is in-bounds and
    # sublane-aligned, then flatten samples into rows (layout no-op).
    seq_p = jnp.pad(seq, ((0, 0), (0, seq_P0 - L_seq), (0, 0))).reshape(B * seq_P0, F_seq)
    pkt_p = jnp.pad(pkt, ((0, 0), (0, pkt_P0 - L_pkt), (0, 0))).reshape(B * pkt_P0, F_pkt)

    kernel = functools.partial(
        _dta_kernel, S=S,
        seq_geom=(seq_P0, seq_P, seq_louts),
        pkt_geom=(pkt_P0, pkt_P, pkt_louts),
    )

    out = pl.pallas_call(
        kernel,
        out_shape=jax.ShapeDtypeStruct((num_steps, S, 1), jnp.float32),
        grid=(num_steps,),
        in_specs=[
            pl.BlockSpec((S * seq_P0, F_seq), lambda i: (i, 0)),
            pl.BlockSpec((S * pkt_P0, F_pkt), lambda i: (i, 0)),
            pl.BlockSpec((W_ROWS, 128), lambda i: (0, 0)),   # one bf16 weight slab
            pl.BlockSpec((F_ROWS, 128), lambda i: (0, 0)),   # one f32 shift/bias/alpha slab
        ],
        out_specs=pl.BlockSpec((1, S, 1), lambda i: (i, 0, 0)),
        compiler_params=pltpu.CompilerParams(
            dimension_semantics=("parallel",)),
    )(seq_p, pkt_p, params["wslab"], params["fslab"])
    return out.reshape(B, 1)


if __name__ == "__main__":
    key = jax.random.PRNGKey(0)
    k_seq, k_pkt, k_par = jax.random.split(key, 3)

    B, L_SEQ, L_PKT = 2, 64, 32
    seq = jax.random.normal(k_seq, (B, L_SEQ, PT_FEATURE_SIZE), jnp.float32)   # protein features
    pkt = jax.random.normal(k_pkt, (B, L_PKT, SM_FEATURE_SIZE), jnp.float32)   # smiles/pocket features

    params = init_params(k_par)
    out = jax.block_until_ready(dta_forward(seq, pkt, params))
    assert out.shape == (B, 1) and out.dtype == jnp.float32
    assert bool(jnp.all(jnp.isfinite(out)))
    print("KERNEL_OK")
</pallas_src>

<mosaic_0001>
module attributes {stable_mosaic.version = 11 : i64} {
  func.func @_dta_kernel(%arg0: i32, %arg1: memref<160x25xf32, #tpu.memory_space<vmem>>, %arg2: memref<96x64xf32, #tpu.memory_space<vmem>>, %arg3: memref<3232x128xbf16, #tpu.memory_space<vmem>>, %arg4: memref<24x128xf32, #tpu.memory_space<vmem>>, %arg5: memref<1x2x1xf32, #tpu.memory_space<vmem>>) attributes {dimension_semantics = [#tpu.dimension_semantics<parallel>], iteration_bounds = array<i64: 1>, scalar_prefetch = 0 : i64, scratch_operands = 0 : i64, tpu.core_type = #tpu.core_type<tc>, window_params = [{transform_indices = @transform_0, window_bounds = array<i64: 160, 25>}, {transform_indices = @transform_1, window_bounds = array<i64: 96, 64>}, {pipeline_mode = #tpu.pipeline_mode<synchronous>, transform_indices = @transform_2, window_bounds = array<i64: 3232, 128>}, {pipeline_mode = #tpu.pipeline_mode<synchronous>, transform_indices = @transform_3, window_bounds = array<i64: 24, 128>}, {transform_indices = @transform_4, window_bounds = array<i64: 1, 2, 1>}]} {
    %c0 = arith.constant 0 : index
    %c0_0 = arith.constant 0 : index
    %0 = vector.load %arg1[%c0, %c0_0] : memref<160x25xf32, #tpu.memory_space<vmem>>, vector<160x25xf32>
    %1 = arith.truncf %0 : vector<160x25xf32> to vector<160x25xbf16>
    %c0_1 = arith.constant 0 : index
    %c0_2 = arith.constant 0 : index
    %2 = vector.load %arg3[%c0_1, %c0_2] : memref<3232x128xbf16, #tpu.memory_space<vmem>>, vector<25x128xbf16>
    %cst = arith.constant dense<0.000000e+00> : vector<160x128xf32>
    %3 = tpu.matmul %1, %2, %cst {dimension_numbers = #tpu.dot_dimension_numbers<[1], [0], [0], [1], [0, 0, 1, 1], [], []>} : vector<160x25xbf16>, vector<25x128xbf16>, vector<160x128xf32> -> vector<160x128xf32>
    %4 = arith.truncf %3 : vector<160x128xf32> to vector<160x128xbf16>
    %5 = vector.extract_strided_slice %4 {offsets = [0, 0], sizes = [72, 128], strides = [1, 1]} : vector<160x128xbf16> to vector<72x128xbf16>
    %6 = vector.extract_strided_slice %4 {offsets = [1, 0], sizes = [72, 128], strides = [1, 1]} : vector<160x128xbf16> to vector<72x128xbf16>
    %7 = vector.extract_strided_slice %4 {offsets = [2, 0], sizes = [72, 128], strides = [1, 1]} : vector<160x128xbf16> to vector<72x128xbf16>
    %8 = vector.extract_strided_slice %4 {offsets = [3, 0], sizes = [72, 128], strides = [1, 1]} : vector<160x128xbf16> to vector<72x128xbf16>
    %9 = tpu.concatenate %5, %6, %7, %8 in 1 : vector<72x128xbf16>, vector<72x128xbf16>, vector<72x128xbf16>, vector<72x128xbf16> -> vector<72x512xbf16>
    %10 = vector.extract_strided_slice %4 {offsets = [80, 0], sizes = [72, 128], strides = [1, 1]} : vector<160x128xbf16> to vector<72x128xbf16>
    %11 = vector.extract_strided_slice %4 {offsets = [81, 0], sizes = [72, 128], strides = [1, 1]} : vector<160x128xbf16> to vector<72x128xbf16>
    %12 = vector.extract_strided_slice %4 {offsets = [82, 0], sizes = [72, 128], strides = [1, 1]} : vector<160x128xbf16> to vector<72x128xbf16>
    %13 = vector.extract_strided_slice %4 {offsets = [83, 0], sizes = [72, 128], strides = [1, 1]} : vector<160x128xbf16> to vector<72x128xbf16>
    %14 = tpu.concatenate %10, %11, %12, %13 in 1 : vector<72x128xbf16>, vector<72x128xbf16>, vector<72x128xbf16>, vector<72x128xbf16> -> vector<72x512xbf16>
    %15 = tpu.concatenate %9, %14 in 0 : vector<72x512xbf16>, vector<72x512xbf16> -> vector<144x512xbf16>
    %c96 = arith.constant 96 : index
    %c0_3 = arith.constant 0 : index
    %16 = vector.load %arg3[%c96, %c0_3] : memref<3232x128xbf16, #tpu.memory_space<vmem>>, vector<512x32xbf16>
    %cst_4 = arith.constant dense<0.000000e+00> : vector<144x32xf32>
    %17 = tpu.matmul %15, %16, %cst_4 {dimension_numbers = #tpu.dot_dimension_numbers<[1], [0], [0], [1], [0, 0, 1, 1], [], []>} : vector<144x512xbf16>, vector<512x32xbf16>, vector<144x32xf32> -> vector<144x32xf32>
    %c0_5 = arith.constant 0 : index
    %c0_6 = arith.constant 0 : index
    %18 = vector.load %arg4[%c0_5, %c0_6] : memref<24x128xf32, #tpu.memory_space<vmem>>, vector<1x32xf32>
    %19 = vector.broadcast %18 : vector<1x32xf32> to vector<144x32xf32>
    %20 = arith.addf %17, %19 : vector<144x32xf32>
    %c10 = arith.constant 10 : index
    %c0_7 = arith.constant 0 : index
    %21 = vector.load %arg4[%c10, %c0_7] : memref<24x128xf32, #tpu.memory_space<vmem>>, vector<1x32xf32>
    %cst_8 = arith.constant 0.000000e+00 : f32
    %22 = vector.broadcast %cst_8 : f32 to vector<144x32xf32>
    %23 = arith.cmpf ogt, %20, %22 : vector<144x32xf32>
    %24 = vector.broadcast %21 : vector<1x32xf32> to vector<144x32xf32>
    %25 = arith.mulf %24, %20 : vector<144x32xf32>
    %26 = arith.select %23, %20, %25 : vector<144x32xi1>, vector<144x32xf32>
    %27 = arith.truncf %26 : vector<144x32xf32> to vector<144x32xbf16>
    %28 = vector.extract_strided_slice %27 {offsets = [0, 0], sizes = [64, 32], strides = [1, 1]} : vector<144x32xbf16> to vector<64x32xbf16>
    %29 = vector.extract_strided_slice %27 {offsets = [1, 0], sizes = [64, 32], strides = [1, 1]} : vector<144x32xbf16> to vector<64x32xbf16>
    %30 = vector.extract_strided_slice %27 {offsets = [2, 0], sizes = [64, 32], strides = [1, 1]} : vector<144x32xbf16> to vector<64x32xbf16>
    %31 = vector.extract_strided_slice %27 {offsets = [3, 0], sizes = [64, 32], strides = [1, 1]} : vector<144x32xbf16> to vector<64x32xbf16>
    %32 = vector.extract_strided_slice %27 {offsets = [4, 0], sizes = [64, 32], strides = [1, 1]} : vector<144x32xbf16> to vector<64x32xbf16>
    %33 = vector.extract_strided_slice %27 {offsets = [5, 0], sizes = [64, 32], strides = [1, 1]} : vector<144x32xbf16> to vector<64x32xbf16>
    %34 = vector.extract_strided_slice %27 {offsets = [6, 0], sizes = [64, 32], strides = [1, 1]} : vector<144x32xbf16> to vector<64x32xbf16>
    %35 = vector.extract_strided_slice %27 {offsets = [7, 0], sizes = [64, 32], strides = [1, 1]} : vector<144x32xbf16> to vector<64x32xbf16>
    %36 = tpu.concatenate %28, %29, %30, %31, %32, %33, %34, %35 in 1 : vector<64x32xbf16>, vector<64x32xbf16>, vector<64x32xbf16>, vector<64x32xbf16>, vector<64x32xbf16>, vector<64x32xbf16>, vector<64x32xbf16>, vector<64x32xbf16> -> vector<64x256xbf16>
    %37 = vector.extract_strided_slice %27 {offsets = [72, 0], sizes = [64, 32], strides = [1, 1]} : vector<144x32xbf16> to vector<64x32xbf16>
    %38 = vector.extract_strided_slice %27 {offsets = [73, 0], sizes = [64, 32], strides = [1, 1]} : vector<144x32xbf16> to vector<64x32xbf16>
    %39 = vector.extract_strided_slice %27 {offsets = [74, 0], sizes = [64, 32], strides = [1, 1]} : vector<144x32xbf16> to vector<64x32xbf16>
    %40 = vector.extract_strided_slice %27 {offsets = [75, 0], sizes = [64, 32], strides = [1, 1]} : vector<144x32xbf16> to vector<64x32xbf16>
    %41 = vector.extract_strided_slice %27 {offsets = [76, 0], sizes = [64, 32], strides = [1, 1]} : vector<144x32xbf16> to vector<64x32xbf16>
    %42 = vector.extract_strided_slice %27 {offsets = [77, 0], sizes = [64, 32], strides = [1, 1]} : vector<144x32xbf16> to vector<64x32xbf16>
    %43 = vector.extract_strided_slice %27 {offsets = [78, 0], sizes = [64, 32], strides = [1, 1]} : vector<144x32xbf16> to vector<64x32xbf16>
    %44 = vector.extract_strided_slice %27 {offsets = [79, 0], sizes = [64, 32], strides = [1, 1]} : vector<144x32xbf16> to vector<64x32xbf16>
    %45 = tpu.concatenate %37, %38, %39, %40, %41, %42, %43, %44 in 1 : vector<64x32xbf16>, vector<64x32xbf16>, vector<64x32xbf16>, vector<64x32xbf16>, vector<64x32xbf16>, vector<64x32xbf16>, vector<64x32xbf16>, vector<64x32xbf16> -> vector<64x256xbf16>
    %46 = tpu.concatenate %36, %45 in 0 : vector<64x256xbf16>, vector<64x256xbf16> -> vector<128x256xbf16>
    %c608 = arith.constant 608 : index
    %c0_9 = arith.constant 0 : index
    %47 = vector.load %arg3[%c608, %c0_9] : memref<3232x128xbf16, #tpu.memory_space<vmem>>, vector<256x64xbf16>
    %cst_10 = arith.constant dense<0.000000e+00> : vector<128x64xf32>
    %48 = tpu.matmul %46, %47, %cst_10 {dimension_numbers = #tpu.dot_dimension_numbers<[1], [0], [0], [1], [0, 0, 1, 1], [], []>} : vector<128x256xbf16>, vector<256x64xbf16>, vector<128x64xf32> -> vector<128x64xf32>
    %c1 = arith.constant 1 : index
    %c0_11 = arith.constant 0 : index
    %49 = vector.load %arg4[%c1, %c0_11] : memref<24x128xf32, #tpu.memory_space<vmem>>, vector<1x64xf32>
    %50 = vector.broadcast %49 : vector<1x64xf32> to vector<128x64xf32>
    %51 = arith.addf %48, %50 : vector<128x64xf32>
    %c11 = arith.constant 11 : index
    %c0_12 = arith.constant 0 : index
    %52 = vector.load %arg4[%c11, %c0_12] : memref<24x128xf32, #tpu.memory_space<vmem>>, vector<1x64xf32>
    %cst_13 = arith.constant 0.000000e+00 : f32
    %53 = vector.broadcast %cst_13 : f32 to vector<128x64xf32>
    %54 = arith.cmpf ogt, %51, %53 : vector<128x64xf32>
    %55 = vector.broadcast %52 : vector<1x64xf32> to vector<128x64xf32>
    %56 = arith.mulf %55, %51 : vector<128x64xf32>
    %57 = arith.select %54, %51, %56 : vector<128x64xi1>, vector<128x64xf32>
    %58 = arith.truncf %57 : vector<128x64xf32> to vector<128x64xbf16>
    %59 = vector.extract_strided_slice %58 {offsets = [0, 0], sizes = [48, 64], strides = [1, 1]} : vector<128x64xbf16> to vector<48x64xbf16>
    %60 = vector.extract_strided_slice %58 {offsets = [1, 0], sizes = [48, 64], strides = [1, 1]} : vector<128x64xbf16> to vector<48x64xbf16>
    %61 = vector.extract_strided_slice %58 {offsets = [2, 0], sizes = [48, 64], strides = [1, 1]} : vector<128x64xbf16> to vector<48x64xbf16>
    %62 = vector.extract_strided_slice %58 {offsets = [3, 0], sizes = [48, 64], strides = [1, 1]} : vector<128x64xbf16> to vector<48x64xbf16>
    %63 = vector.extract_strided_slice %58 {offsets = [4, 0], sizes = [48, 64], strides = [1, 1]} : vector<128x64xbf16> to vector<48x64xbf16>
    %64 = vector.extract_strided_slice %58 {offsets = [5, 0], sizes = [48, 64], strides = [1, 1]} : vector<128x64xbf16> to vector<48x64xbf16>
    %65 = vector.extract_strided_slice %58 {offsets = [6, 0], sizes = [48, 64], strides = [1, 1]} : vector<128x64xbf16> to vector<48x64xbf16>
    %66 = vector.extract_strided_slice %58 {offsets = [7, 0], sizes = [48, 64], strides = [1, 1]} : vector<128x64xbf16> to vector<48x64xbf16>
    %67 = vector.extract_strided_slice %58 {offsets = [8, 0], sizes = [48, 64], strides = [1, 1]} : vector<128x64xbf16> to vector<48x64xbf16>
    %68 = vector.extract_strided_slice %58 {offsets = [9, 0], sizes = [48, 64], strides = [1, 1]} : vector<128x64xbf16> to vector<48x64xbf16>
    %69 = vector.extract_strided_slice %58 {offsets = [10, 0], sizes = [48, 64], strides = [1, 1]} : vector<128x64xbf16> to vector<48x64xbf16>
    %70 = vector.extract_strided_slice %58 {offsets = [11, 0], sizes = [48, 64], strides = [1, 1]} : vector<128x64xbf16> to vector<48x64xbf16>
    %71 = tpu.concatenate %59, %60, %61, %62, %63, %64, %65, %66, %67, %68, %69, %70 in 1 : vector<48x64xbf16>, vector<48x64xbf16>, vector<48x64xbf16>, vector<48x64xbf16>, vector<48x64xbf16>, vector<48x64xbf16>, vector<48x64xbf16>, vector<48x64xbf16>, vector<48x64xbf16>, vector<48x64xbf16>, vector<48x64xbf16>, vector<48x64xbf16> -> vector<48x768xbf16>
    %72 = vector.extract_strided_slice %58 {offsets = [64, 0], sizes = [48, 64], strides = [1, 1]} : vector<128x64xbf16> to vector<48x64xbf16>
    %73 = vector.extract_strided_slice %58 {offsets = [65, 0], sizes = [48, 64], strides = [1, 1]} : vector<128x64xbf16> to vector<48x64xbf16>
    %74 = vector.extract_strided_slice %58 {offsets = [66, 0], sizes = [48, 64], strides = [1, 1]} : vector<128x64xbf16> to vector<48x64xbf16>
    %75 = vector.extract_strided_slice %58 {offsets = [67, 0], sizes = [48, 64], strides = [1, 1]} : vector<128x64xbf16> to vector<48x64xbf16>
    %76 = vector.extract_strided_slice %58 {offsets = [68, 0], sizes = [48, 64], strides = [1, 1]} : vector<128x64xbf16> to vector<48x64xbf16>
    %77 = vector.extract_strided_slice %58 {offsets = [69, 0], sizes = [48, 64], strides = [1, 1]} : vector<128x64xbf16> to vector<48x64xbf16>
    %78 = vector.extract_strided_slice %58 {offsets = [70, 0], sizes = [48, 64], strides = [1, 1]} : vector<128x64xbf16> to vector<48x64xbf16>
    %79 = vector.extract_strided_slice %58 {offsets = [71, 0], sizes = [48, 64], strides = [1, 1]} : vector<128x64xbf16> to vector<48x64xbf16>
    %80 = vector.extract_strided_slice %58 {offsets = [72, 0], sizes = [48, 64], strides = [1, 1]} : vector<128x64xbf16> to vector<48x64xbf16>
    %81 = vector.extract_strided_slice %58 {offsets = [73, 0], sizes = [48, 64], strides = [1, 1]} : vector<128x64xbf16> to vector<48x64xbf16>
    %82 = vector.extract_strided_slice %58 {offsets = [74, 0], sizes = [48, 64], strides = [1, 1]} : vector<128x64xbf16> to vector<48x64xbf16>
    %83 = vector.extract_strided_slice %58 {offsets = [75, 0], sizes = [48, 64], strides = [1, 1]} : vector<128x64xbf16> to vector<48x64xbf16>
    %84 = tpu.concatenate %72, %73, %74, %75, %76, %77, %78, %79, %80, %81, %82, %83 in 1 : vector<48x64xbf16>, vector<48x64xbf16>, vector<48x64xbf16>, vector<48x64xbf16>, vector<48x64xbf16>, vector<48x64xbf16>, vector<48x64xbf16>, vector<48x64xbf16>, vector<48x64xbf16>, vector<48x64xbf16>, vector<48x64xbf16>, vector<48x64xbf16> -> vector<48x768xbf16>
    %85 = tpu.concatenate %71, %84 in 0 : vector<48x768xbf16>, vector<48x768xbf16> -> vector<96x768xbf16>
    %c864 = arith.constant 864 : index
    %c0_14 = arith.constant 0 : index
    %86 = vector.load %arg3[%c864, %c0_14] : memref<3232x128xbf16, #tpu.memory_space<vmem>>, vector<768x128xbf16>
    %cst_15 = arith.constant dense<0.000000e+00> : vector<96x128xf32>
    %87 = tpu.matmul %85, %86, %cst_15 {dimension_numbers = #tpu.dot_dimension_numbers<[1], [0], [0], [1], [0, 0, 1, 1], [], []>} : vector<96x768xbf16>, vector<768x128xbf16>, vector<96x128xf32> -> vector<96x128xf32>
    %c2 = arith.constant 2 : index
    %c0_16 = arith.constant 0 : index
    %88 = vector.load %arg4[%c2, %c0_16] : memref<24x128xf32, #tpu.memory_space<vmem>>, vector<1x128xf32>
    %89 = vector.broadcast %88 : vector<1x128xf32> to vector<96x128xf32>
    %90 = arith.addf %87, %89 : vector<96x128xf32>
    %c12 = arith.constant 12 : index
    %c0_17 = arith.constant 0 : index
    %91 = vector.load %arg4[%c12, %c0_17] : memref<24x128xf32, #tpu.memory_space<vmem>>, vector<1x128xf32>
    %cst_18 = arith.constant 0.000000e+00 : f32
    %92 = vector.broadcast %cst_18 : f32 to vector<96x128xf32>
    %93 = arith.cmpf ogt, %90, %92 : vector<96x128xf32>
    %94 = vector.broadcast %91 : vector<1x128xf32> to vector<96x128xf32>
    %95 = arith.mulf %94, %90 : vector<96x128xf32>
    %96 = arith.select %93, %90, %95 : vector<96x128xi1>, vector<96x128xf32>
    %97 = arith.truncf %96 : vector<96x128xf32> to vector<96x128xbf16>
    %98 = tpu.iota {dimensions = array<i32: 0>} : vector<48x1xi32>
    %c43_i32 = arith.constant 43 : i32
    %99 = vector.broadcast %c43_i32 : i32 to vector<48x1xi32>
    %100 = arith.cmpi slt, %98, %99 : vector<48x1xi32>
    %101 = vector.extract_strided_slice %97 {offsets = [0, 0], sizes = [48, 128], strides = [1, 1]} : vector<96x128xbf16> to vector<48x128xbf16>
    %102 = arith.extf %101 : vector<48x128xbf16> to vector<48x128xf32>
    %cst_19 = arith.constant 0xFF800000 : f32
    %103 = vector.shape_cast %100 : vector<48x1xi1> to vector<48x1xi1>
    %104 = vector.broadcast %103 : vector<48x1xi1> to vector<48x128xi1>
    %105 = vector.broadcast %cst_19 : f32 to vector<48x128xf32>
    %106 = arith.select %104, %102, %105 : vector<48x128xi1>, vector<48x128xf32>
    %cst_20 = arith.constant dense<0xFF800000> : vector<128xf32>
    %107 = vector.multi_reduction <maximumf>, %106, %cst_20 [0] : vector<48x128xf32> to vector<128xf32>
    %108 = vector.shape_cast %107 : vector<128xf32> to vector<1x128xf32>
    %109 = vector.extract_strided_slice %97 {offsets = [48, 0], sizes = [48, 128], strides = [1, 1]} : vector<96x128xbf16> to vector<48x128xbf16>
    %110 = arith.extf %109 : vector<48x128xbf16> to vector<48x128xf32>
    %cst_21 = arith.constant 0xFF800000 : f32
    %111 = vector.shape_cast %100 : vector<48x1xi1> to vector<48x1xi1>
    %112 = vector.broadcast %111 : vector<48x1xi1> to vector<48x128xi1>
    %113 = vector.broadcast %cst_21 : f32 to vector<48x128xf32>
    %114 = arith.select %112, %110, %113 : vector<48x128xi1>, vector<48x128xf32>
    %cst_22 = arith.constant dense<0xFF800000> : vector<128xf32>
    %115 = vector.multi_reduction <maximumf>, %114, %cst_22 [0] : vector<48x128xf32> to vector<128xf32>
    %116 = vector.shape_cast %115 : vector<128xf32> to vector<1x128xf32>
    %117 = tpu.concatenate %108, %116 in 0 : vector<1x128xf32>, vector<1x128xf32> -> vector<2x128xf32>
    %c0_23 = arith.constant 0 : index
    %c0_24 = arith.constant 0 : index
    %118 = vector.load %arg2[%c0_23, %c0_24] : memref<96x64xf32, #tpu.memory_space<vmem>>, vector<96x64xf32>
    %119 = arith.truncf %118 : vector<96x64xf32> to vector<96x64xbf16>
    %c32 = arith.constant 32 : index
    %c0_25 = arith.constant 0 : index
    %120 = vector.load %arg3[%c32, %c0_25] : memref<3232x128xbf16, #tpu.memory_space<vmem>>, vector<64x128xbf16>
    %cst_26 = arith.constant dense<0.000000e+00> : vector<96x128xf32>
    %121 = tpu.matmul %119, %120, %cst_26 {dimension_numbers = #tpu.dot_dimension_numbers<[1], [0], [0], [1], [0, 0, 1, 1], [], []>} : vector<96x64xbf16>, vector<64x128xbf16>, vector<96x128xf32> -> vector<96x128xf32>
    %122 = arith.truncf %121 : vector<96x128xf32> to vector<96x128xbf16>
    %123 = vector.extract_strided_slice %122 {offsets = [0, 0], sizes = [40, 128], strides = [1, 1]} : vector<96x128xbf16> to vector<40x128xbf16>
    %124 = vector.extract_strided_slice %122 {offsets = [1, 0], sizes = [40, 128], strides = [1, 1]} : vector<96x128xbf16> to vector<40x128xbf16>
    %125 = vector.extract_strided_slice %122 {offsets = [2, 0], sizes = [40, 128], strides = [1, 1]} : vector<96x128xbf16> to vector<40x128xbf16>
    %126 = vector.extract_strided_slice %122 {offsets = [3, 0], sizes = [40, 128], strides = [1, 1]} : vector<96x128xbf16> to vector<40x128xbf16>
    %127 = tpu.concatenate %123, %124, %125, %126 in 1 : vector<40x128xbf16>, vector<40x128xbf16>, vector<40x128xbf16>, vector<40x128xbf16> -> vector<40x512xbf16>
    %128 = vector.extract_strided_slice %122 {offsets = [48, 0], sizes = [40, 128], strides = [1, 1]} : vector<96x128xbf16> to vector<40x128xbf16>
    %129 = vector.extract_strided_slice %122 {offsets = [49, 0], sizes = [40, 128], strides = [1, 1]} : vector<96x128xbf16> to vector<40x128xbf16>
    %130 = vector.extract_strided_slice %122 {offsets = [50, 0], sizes = [40, 128], strides = [1, 1]} : vector<96x128xbf16> to vector<40x128xbf16>
    %131 = vector.extract_strided_slice %122 {offsets = [51, 0], sizes = [40, 128], strides = [1, 1]} : vector<96x128xbf16> to vector<40x128xbf16>
    %132 = tpu.concatenate %128, %129, %130, %131 in 1 : vector<40x128xbf16>, vector<40x128xbf16>, vector<40x128xbf16>, vector<40x128xbf16> -> vector<40x512xbf16>
    %133 = tpu.concatenate %127, %132 in 0 : vector<40x512xbf16>, vector<40x512xbf16> -> vector<80x512xbf16>
    %c1632 = arith.constant 1632 : index
    %c0_27 = arith.constant 0 : index
    %134 = vector.load %arg3[%c1632, %c0_27] : memref<3232x128xbf16, #tpu.memory_space<vmem>>, vector<512x32xbf16>
    %cst_28 = arith.constant dense<0.000000e+00> : vector<80x32xf32>
    %135 = tpu.matmul %133, %134, %cst_28 {dimension_numbers = #tpu.dot_dimension_numbers<[1], [0], [0], [1], [0, 0, 1, 1], [], []>} : vector<80x512xbf16>, vector<512x32xbf16>, vector<80x32xf32> -> vector<80x32xf32>
    %c3 = arith.constant 3 : index
    %c0_29 = arith.constant 0 : index
    %136 = vector.load %arg4[%c3, %c0_29] : memref<24x128xf32, #tpu.memory_space<vmem>>, vector<1x32xf32>
    %137 = vector.broadcast %136 : vector<1x32xf32> to vector<80x32xf32>
    %138 = arith.addf %135, %137 : vector<80x32xf32>
    %c13 = arith.constant 13 : index
    %c0_30 = arith.constant 0 : index
    %139 = vector.load %arg4[%c13, %c0_30] : memref<24x128xf32, #tpu.memory_space<vmem>>, vector<1x32xf32>
    %cst_31 = arith.constant 0.000000e+00 : f32
    %140 = vector.broadcast %cst_31 : f32 to vector<80x32xf32>
    %141 = arith.cmpf ogt, %138, %140 : vector<80x32xf32>
    %142 = vector.broadcast %139 : vector<1x32xf32> to vector<80x32xf32>
    %143 = arith.mulf %142, %138 : vector<80x32xf32>
    %144 = arith.select %141, %138, %143 : vector<80x32xi1>, vector<80x32xf32>
    %145 = arith.truncf %144 : vector<80x32xf32> to vector<80x32xbf16>
    %146 = vector.extract_strided_slice %145 {offsets = [0, 0], sizes = [32, 32], strides = [1, 1]} : vector<80x32xbf16> to vector<32x32xbf16>
    %147 = vector.extract_strided_slice %145 {offsets = [1, 0], sizes = [32, 32], strides = [1, 1]} : vector<80x32xbf16> to vector<32x32xbf16>
    %148 = vector.extract_strided_slice %145 {offsets = [2, 0], sizes = [32, 32], strides = [1, 1]} : vector<80x32xbf16> to vector<32x32xbf16>
    %149 = vector.extract_strided_slice %145 {offsets = [3, 0], sizes = [32, 32], strides = [1, 1]} : vector<80x32xbf16> to vector<32x32xbf16>
    %150 = vector.extract_strided_slice %145 {offsets = [4, 0], sizes = [32, 32], strides = [1, 1]} : vector<80x32xbf16> to vector<32x32xbf16>
    %151 = vector.extract_strided_slice %145 {offsets = [5, 0], sizes = [32, 32], strides = [1, 1]} : vector<80x32xbf16> to vector<32x32xbf16>
    %152 = tpu.concatenate %146, %147, %148, %149, %150, %151 in 1 : vector<32x32xbf16>, vector<32x32xbf16>, vector<32x32xbf16>, vector<32x32xbf16>, vector<32x32xbf16>, vector<32x32xbf16> -> vector<32x192xbf16>
    %153 = vector.extract_strided_slice %145 {offsets = [40, 0], sizes = [32, 32], strides = [1, 1]} : vector<80x32xbf16> to vector<32x32xbf16>
    %154 = vector.extract_strided_slice %145 {offsets = [41, 0], sizes = [32, 32], strides = [1, 1]} : vector<80x32xbf16> to vector<32x32xbf16>
    %155 = vector.extract_strided_slice %145 {offsets = [42, 0], sizes = [32, 32], strides = [1, 1]} : vector<80x32xbf16> to vector<32x32xbf16>
    %156 = vector.extract_strided_slice %145 {offsets = [43, 0], sizes = [32, 32], strides = [1, 1]} : vector<80x32xbf16> to vector<32x32xbf16>
    %157 = vector.extract_strided_slice %145 {offsets = [44, 0], sizes = [32, 32], strides = [1, 1]} : vector<80x32xbf16> to vector<32x32xbf16>
    %158 = vector.extract_strided_slice %145 {offsets = [45, 0], sizes = [32, 32], strides = [1, 1]} : vector<80x32xbf16> to vector<32x32xbf16>
    %159 = tpu.concatenate %153, %154, %155, %156, %157, %158 in 1 : vector<32x32xbf16>, vector<32x32xbf16>, vector<32x32xbf16>, vector<32x32xbf16>, vector<32x32xbf16>, vector<32x32xbf16> -> vector<32x192xbf16>
    %160 = tpu.concatenate %152, %159 in 0 : vector<32x192xbf16>, vector<32x192xbf16> -> vector<64x192xbf16>
    %c2144 = arith.constant 2144 : index
    %c0_32 = arith.constant 0 : index
    %161 = vector.load %arg3[%c2144, %c0_32] : memref<3232x128xbf16, #tpu.memory_space<vmem>>, vector<192x64xbf16>
    %cst_33 = arith.constant dense<0.000000e+00> : vector<64x64xf32>
    %162 = tpu.matmul %160, %161, %cst_33 {dimension_numbers = #tpu.dot_dimension_numbers<[1], [0], [0], [1], [0, 0, 1, 1], [], []>} : vector<64x192xbf16>, vector<192x64xbf16>, vector<64x64xf32> -> vector<64x64xf32>
    %c4 = arith.constant 4 : index
    %c0_34 = arith.constant 0 : index
    %163 = vector.load %arg4[%c4, %c0_34] : memref<24x128xf32, #tpu.memory_space<vmem>>, vector<1x64xf32>
    %164 = vector.broadcast %163 : vector<1x64xf32> to vector<64x64xf32>
    %165 = arith.addf %162, %164 : vector<64x64xf32>
    %c14 = arith.constant 14 : index
    %c0_35 = arith.constant 0 : index
    %166 = vector.load %arg4[%c14, %c0_35] : memref<24x128xf32, #tpu.memory_space<vmem>>, vector<1x64xf32>
    %cst_36 = arith.constant 0.000000e+00 : f32
    %167 = vector.broadcast %cst_36 : f32 to vector<64x64xf32>
    %168 = arith.cmpf ogt, %165, %167 : vector<64x64xf32>
    %169 = vector.broadcast %166 : vector<1x64xf32> to vector<64x64xf32>
    %170 = arith.mulf %169, %165 : vector<64x64xf32>
    %171 = arith.select %168, %165, %170 : vector<64x64xi1>, vector<64x64xf32>
    %172 = arith.truncf %171 : vector<64x64xf32> to vector<64x64xbf16>
    %173 = vector.extract_strided_slice %172 {offsets = [0, 0], sizes = [24, 64], strides = [1, 1]} : vector<64x64xbf16> to vector<24x64xbf16>
    %174 = vector.extract_strided_slice %172 {offsets = [1, 0], sizes = [24, 64], strides = [1, 1]} : vector<64x64xbf16> to vector<24x64xbf16>
    %175 = vector.extract_strided_slice %172 {offsets = [2, 0], sizes = [24, 64], strides = [1, 1]} : vector<64x64xbf16> to vector<24x64xbf16>
    %176 = vector.extract_strided_slice %172 {offsets = [3, 0], sizes = [24, 64], strides = [1, 1]} : vector<64x64xbf16> to vector<24x64xbf16>
    %177 = vector.extract_strided_slice %172 {offsets = [4, 0], sizes = [24, 64], strides = [1, 1]} : vector<64x64xbf16> to vector<24x64xbf16>
    %178 = vector.extract_strided_slice %172 {offsets = [5, 0], sizes = [24, 64], strides = [1, 1]} : vector<64x64xbf16> to vector<24x64xbf16>
    %179 = vector.extract_strided_slice %172 {offsets = [6, 0], sizes = [24, 64], strides = [1, 1]} : vector<64x64xbf16> to vector<24x64xbf16>
    %180 = vector.extract_strided_slice %172 {offsets = [7, 0], sizes = [24, 64], strides = [1, 1]} : vector<64x64xbf16> to vector<24x64xbf16>
    %181 = tpu.concatenate %173, %174, %175, %176, %177, %178, %179, %180 in 1 : vector<24x64xbf16>, vector<24x64xbf16>, vector<24x64xbf16>, vector<24x64xbf16>, vector<24x64xbf16>, vector<24x64xbf16>, vector<24x64xbf16>, vector<24x64xbf16> -> vector<24x512xbf16>
    %182 = vector.extract_strided_slice %172 {offsets = [32, 0], sizes = [24, 64], strides = [1, 1]} : vector<64x64xbf16> to vector<24x64xbf16>
    %183 = vector.extract_strided_slice %172 {offsets = [33, 0], sizes = [24, 64], strides = [1, 1]} : vector<64x64xbf16> to vector<24x64xbf16>
    %184 = vector.extract_strided_slice %172 {offsets = [34, 0], sizes = [24, 64], strides = [1, 1]} : vector<64x64xbf16> to vector<24x64xbf16>
    %185 = vector.extract_strided_slice %172 {offsets = [35, 0], sizes = [24, 64], strides = [1, 1]} : vector<64x64xbf16> to vector<24x64xbf16>
    %186 = vector.extract_strided_slice %172 {offsets = [36, 0], sizes = [24, 64], strides = [1, 1]} : vector<64x64xbf16> to vector<24x64xbf16>
    %187 = vector.extract_strided_slice %172 {offsets = [37, 0], sizes = [24, 64], strides = [1, 1]} : vector<64x64xbf16> to vector<24x64xbf16>
    %188 = vector.extract_strided_slice %172 {offsets = [38, 0], sizes = [24, 64], strides = [1, 1]} : vector<64x64xbf16> to vector<24x64xbf16>
    %189 = vector.extract_strided_slice %172 {offsets = [39, 0], sizes = [24, 64], strides = [1, 1]} : vector<64x64xbf16> to vector<24x64xbf16>
    %190 = tpu.concatenate %182, %183, %184, %185, %186, %187, %188, %189 in 1 : vector<24x64xbf16>, vector<24x64xbf16>, vector<24x64xbf16>, vector<24x64xbf16>, vector<24x64xbf16>, vector<24x64xbf16>, vector<24x64xbf16>, vector<24x64xbf16> -> vector<24x512xbf16>
    %191 = tpu.concatenate %181, %190 in 0 : vector<24x512xbf16>, vector<24x512xbf16> -> vector<48x512xbf16>
    %c2336 = arith.constant 2336 : index
    %c0_37 = arith.constant 0 : index
    %192 = vector.load %arg3[%c2336, %c0_37] : memref<3232x128xbf16, #tpu.memory_space<vmem>>, vector<512x128xbf16>
    %cst_38 = arith.constant dense<0.000000e+00> : vector<48x128xf32>
    %193 = tpu.matmul %191, %192, %cst_38 {dimension_numbers = #tpu.dot_dimension_numbers<[1], [0], [0], [1], [0, 0, 1, 1], [], []>} : vector<48x512xbf16>, vector<512x128xbf16>, vector<48x128xf32> -> vector<48x128xf32>
    %c5 = arith.constant 5 : index
    %c0_39 = arith.constant 0 : index
    %194 = vector.load %arg4[%c5, %c0_39] : memref<24x128xf32, #tpu.memory_space<vmem>>, vector<1x128xf32>
    %195 = vector.broadcast %194 : vector<1x128xf32> to vector<48x128xf32>
    %196 = arith.addf %193, %195 : vector<48x128xf32>
    %c15 = arith.constant 15 : index
    %c0_40 = arith.constant 0 : index
    %197 = vector.load %arg4[%c15, %c0_40] : memref<24x128xf32, #tpu.memory_space<vmem>>, vector<1x128xf32>
    %cst_41 = arith.constant 0.000000e+00 : f32
    %198 = vector.broadcast %cst_41 : f32 to vector<48x128xf32>
    %199 = arith.cmpf ogt, %196, %198 : vector<48x128xf32>
    %200 = vector.broadcast %197 : vector<1x128xf32> to vector<48x128xf32>
    %201 = arith.mulf %200, %196 : vector<48x128xf32>
    %202 = arith.select %199, %196, %201 : vector<48x128xi1>, vector<48x128xf32>
    %203 = arith.truncf %202 : vector<48x128xf32> to vector<48x128xbf16>
    %204 = tpu.iota {dimensions = array<i32: 0>} : vector<24x1xi32>
    %c17_i32 = arith.constant 17 : i32
    %205 = vector.broadcast %c17_i32 : i32 to vector<24x1xi32>
    %206 = arith.cmpi slt, %204, %205 : vector<24x1xi32>
    %207 = vector.extract_strided_slice %203 {offsets = [0, 0], sizes = [24, 128], strides = [1, 1]} : vector<48x128xbf16> to vector<24x128xbf16>
    %208 = arith.extf %207 : vector<24x128xbf16> to vector<24x128xf32>
    %cst_42 = arith.constant 0xFF800000 : f32
    %209 = vector.shape_cast %206 : vector<24x1xi1> to vector<24x1xi1>
    %210 = vector.broadcast %209 : vector<24x1xi1> to vector<24x128xi1>
    %211 = vector.broadcast %cst_42 : f32 to vector<24x128xf32>
    %212 = arith.select %210, %208, %211 : vector<24x128xi1>, vector<24x128xf32>
    %cst_43 = arith.constant dense<0xFF800000> : vector<128xf32>
    %213 = vector.multi_reduction <maximumf>, %212, %cst_43 [0] : vector<24x128xf32> to vector<128xf32>
    %214 = vector.shape_cast %213 : vector<128xf32> to vector<1x128xf32>
    %215 = vector.extract_strided_slice %203 {offsets = [24, 0], sizes = [24, 128], strides = [1, 1]} : vector<48x128xbf16> to vector<24x128xbf16>
    %216 = arith.extf %215 : vector<24x128xbf16> to vector<24x128xf32>
    %cst_44 = arith.constant 0xFF800000 : f32
    %217 = vector.shape_cast %206 : vector<24x1xi1> to vector<24x1xi1>
    %218 = vector.broadcast %217 : vector<24x1xi1> to vector<24x128xi1>
    %219 = vector.broadcast %cst_44 : f32 to vector<24x128xf32>
    %220 = arith.select %218, %216, %219 : vector<24x128xi1>, vector<24x128xf32>
    %cst_45 = arith.constant dense<0xFF800000> : vector<128xf32>
    %221 = vector.multi_reduction <maximumf>, %220, %cst_45 [0] : vector<24x128xf32> to vector<128xf32>
    %222 = vector.shape_cast %221 : vector<128xf32> to vector<1x128xf32>
    %223 = tpu.concatenate %214, %222 in 0 : vector<1x128xf32>, vector<1x128xf32> -> vector<2x128xf32>
    %224 = tpu.concatenate %117, %223 in 1 : vector<2x128xf32>, vector<2x128xf32> -> vector<2x256xf32>
    %225 = arith.truncf %224 : vector<2x256xf32> to vector<2x256xbf16>
    %c2848 = arith.constant 2848 : index
    %c0_46 = arith.constant 0 : index
    %226 = vector.load %arg3[%c2848, %c0_46] : memref<3232x128xbf16, #tpu.memory_space<vmem>>, vector<256x128xbf16>
    %cst_47 = arith.constant dense<0.000000e+00> : vector<2x128xf32>
    %227 = tpu.matmul %225, %226, %cst_47 {dimension_numbers = #tpu.dot_dimension_numbers<[1], [0], [0], [1], [0, 0, 1, 1], [], []>} : vector<2x256xbf16>, vector<256x128xbf16>, vector<2x128xf32> -> vector<2x128xf32>
    %c6 = arith.constant 6 : index
    %c0_48 = arith.constant 0 : index
    %228 = vector.load %arg4[%c6, %c0_48] : memref<24x128xf32, #tpu.memory_space<vmem>>, vector<1x128xf32>
    %229 = vector.broadcast %228 : vector<1x128xf32> to vector<2x128xf32>
    %230 = arith.addf %227, %229 : vector<2x128xf32>
    %c16 = arith.constant 16 : index
    %c0_49 = arith.constant 0 : index
    %231 = vector.load %arg4[%c16, %c0_49] : memref<24x128xf32, #tpu.memory_space<vmem>>, vector<1x128xf32>
    %cst_50 = arith.constant 0.000000e+00 : f32
    %232 = vector.broadcast %cst_50 : f32 to vector<2x128xf32>
    %233 = arith.cmpf ogt, %230, %232 : vector<2x128xf32>
    %234 = vector.broadcast %231 : vector<1x128xf32> to vector<2x128xf32>
    %235 = arith.mulf %234, %230 : vector<2x128xf32>
    %236 = arith.select %233, %230, %235 : vector<2x128xi1>, vector<2x128xf32>
    %237 = arith.truncf %236 : vector<2x128xf32> to vector<2x128xbf16>
    %c3104 = arith.constant 3104 : index
    %c0_51 = arith.constant 0 : index
    %238 = vector.load %arg3[%c3104, %c0_51] : memref<3232x128xbf16, #tpu.memory_space<vmem>>, vector<128x128xbf16>
    %cst_52 = arith.constant dense<0.000000e+00> : vector<2x128xf32>
    %239 = tpu.matmul %237, %238, %cst_52 {dimension_numbers = #tpu.dot_dimension_numbers<[1], [0], [0], [1], [0, 0, 1, 1], [], []>} : vector<2x128xbf16>, vector<128x128xbf16>, vector<2x128xf32> -> vector<2x128xf32>
    %c7 = arith.constant 7 : index
    %c0_53 = arith.constant 0 : index
    %240 = vector.load %arg4[%c7, %c0_53] : memref<24x128xf32, #tpu.memory_space<vmem>>, vector<1x128xf32>
    %241 = vector.broadcast %240 : vector<1x128xf32> to vector<2x128xf32>
    %242 = arith.addf %239, %241 : vector<2x128xf32>
    %c17 = arith.constant 17 : index
    %c0_54 = arith.constant 0 : index
    %243 = vector.load %arg4[%c17, %c0_54] : memref<24x128xf32, #tpu.memory_space<vmem>>, vector<1x128xf32>
    %cst_55 = arith.constant 0.000000e+00 : f32
    %244 = vector.broadcast %cst_55 : f32 to vector<2x128xf32>
    %245 = arith.cmpf ogt, %242, %244 : vector<2x128xf32>
    %246 = vector.broadcast %243 : vector<1x128xf32> to vector<2x128xf32>
    %247 = arith.mulf %246, %242 : vector<2x128xf32>
    %248 = arith.select %245, %242, %247 : vector<2x128xi1>, vector<2x128xf32>
    %c8 = arith.constant 8 : index
    %c0_56 = arith.constant 0 : index
    %249 = vector.load %arg4[%c8, %c0_56] : memref<24x128xf32, #tpu.memory_space<vmem>>, vector<1x128xf32>
    %250 = vector.broadcast %249 : vector<1x128xf32> to vector<2x128xf32>
    %251 = arith.mulf %248, %250 : vector<2x128xf32>
    %cst_57 = arith.constant dense<0.000000e+00> : vector<2xf32>
    %252 = vector.multi_reduction <add>, %251, %cst_57 [1] : vector<2x128xf32> to vector<2xf32>
    %253 = vector.shape_cast %252 : vector<2xf32> to vector<2x1xf32>
    %c9 = arith.constant 9 : index
    %c0_58 = arith.constant 0 : index
    %254 = vector.load %arg4[%c9, %c0_58] : memref<24x128xf32, #tpu.memory_space<vmem>>, vector<1x1xf32>
    %255 = vector.broadcast %254 : vector<1x1xf32> to vector<2x1xf32>
    %256 = arith.addf %253, %255 : vector<2x1xf32>
    %c18 = arith.constant 18 : index
    %c0_59 = arith.constant 0 : index
    %257 = vector.load %arg4[%c18, %c0_59] : memref<24x128xf32, #tpu.memory_space<vmem>>, vector<1x1xf32>
    %cst_60 = arith.constant 0.000000e+00 : f32
    %258 = vector.broadcast %cst_60 : f32 to vector<2x1xf32>
    %259 = arith.cmpf ogt, %256, %258 : vector<2x1xf32>
    %260 = vector.broadcast %257 : vector<1x1xf32> to vector<2x1xf32>
    %261 = arith.mulf %260, %256 : vector<2x1xf32>
    %262 = arith.select %259, %256, %261 : vector<2x1xi1>, vector<2x1xf32>
    %263 = vector.shape_cast %262 : vector<2x1xf32> to vector<1x2x1xf32>
    %c0_61 = arith.constant 0 : index
    %c0_62 = arith.constant 0 : index
    %c0_63 = arith.constant 0 : index
    %264 = vector.load %arg5[%c0_61, %c0_62, %c0_63] : memref<1x2x1xf32, #tpu.memory_space<vmem>>, vector<1x2x1xf32>
    tpu.vector_store %arg5[%c0_61, %c0_62, %c0_63], %263 {strides = array<i32>} : memref<1x2x1xf32, #tpu.memory_space<vmem>>, vector<1x2x1xf32>,
    return
  }
  func.func @transform_0(%arg0: i32) -> (i32, i32) {
    %c0_i32 = arith.constant 0 : i32
    %c0_i32_0 = arith.constant 0 : i32
    return %arg0, %c0_i32 : i32, i32
  }
  func.func @transform_1(%arg0: i32) -> (i32, i32) {
    %c0_i32 = arith.constant 0 : i32
    %c0_i32_0 = arith.constant 0 : i32
    return %arg0, %c0_i32 : i32, i32
  }
  func.func @transform_2(%arg0: i32) -> (i32, i32) {
    %c0_i32 = arith.constant 0 : i32
    %c0_i32_0 = arith.constant 0 : i32
    %c0_i32_1 = arith.constant 0 : i32
    return %c0_i32, %c0_i32_0 : i32, i32
  }
  func.func @transform_3(%arg0: i32) -> (i32, i32) {
    %c0_i32 = arith.constant 0 : i32
    %c0_i32_0 = arith.constant 0 : i32
    %c0_i32_1 = arith.constant 0 : i32
    return %c0_i32, %c0_i32_0 : i32, i32
  }
  func.func @transform_4(%arg0: i32) -> (i32, i32, i32) {
    %c0_i32 = arith.constant 0 : i32
    %c0_i32_0 = arith.constant 0 : i32
    %c0_i32_1 = arith.constant 0 : i32
    return %arg0, %c0_i32, %c0_i32_0 : i32, i32, i32
  }
}

</mosaic_0001>

<bundles_post_ra>
// kernel: dta_forward.1
= control target key start
LH: loop header
LB: loop body
LE: loop exit
PB: predicated region body
PF: predicated region fallthrough
CT: control target
= control target key end

     0   :  { %9 = vsyncpa [#allocation3], 0  ;;  %s6308_s15 = smov [#allocation2]   ;;  %s7948_s0 = inlined_call_operand.vmem [shape: f32[160,25], index: 0, kind: input, shape index: {}]   ;;  %s7949_s1 = inlined_call_operand.vmem [shape: f32[96,64], index: 1, kind: input, shape index: {}]   ;;  %s7950_s2 = inlined_call_operand.hbm [shape: bf16[3232,128], index: 2, kind: input, shape index: {}]   ;;  %s7951_s3 = inlined_call_operand.vmem [shape: f32[24,128], index: 3, kind: input, shape index: {}]   ;;  %s7952_s4 = inlined_call_operand.vmem [shape: f32[1,2,1], index: 4, kind: output, shape index: {}]  }
   0x1   :  { %s19_s16 = sshll.u32 %s6308_s15, 4  ;;  %s20_s16 = int_to_ptr.vmem [resolvable:$true] %s19_s16 }
   0x2   :  { %s6294_s17 = scalar_lea.vmem %s20_s16, 25856  ;;  %p6299_p1 = scmp.lt.s32.totalorder %s20_s16, %s20_s16 }
   0x3   :  { %p6295_p0 = scmp.ne.s32.totalorder %s20_s16, %s6294_s17  ;;  %p6300_p2 = scmp.lt.s32.totalorder %s6294_s17, %s6294_s17 }
   0x5   :  { %p6301_p3 = por %p6300_p2, %p6299_p1 }
   0x7   :  { %p6302_p4 = pnand %p6301_p3, %p6295_p0 }
   0x9   :  { %6305 = shalt.err (!%p6302_p4)
}
   0xa   :  { %s6309_s18 = smov 64   ;;  %s6310_s19 = smov 4  }
   0xb   :  { %25 = dma.hbm_to_vmem [thread:$0]  %s7950_s2, 25856, %s20_s16, [#allocation3], %s6309_s18, %s6309_s18, %s6310_s19  }
   0xc   :  { %6306 = dma.done.wait [#allocation3], 25856  }
   0xd   :  { %6307 = vsyncadd [#allocation3], 4294941440  ;;  %vm108_vm0 = vcmask 1043456   ;;  %vm109_vm1 = vcmask 1044480   ;;  %v6311_v0 = vmov 65535   ;;  %v6085_v5 = vld [vmem:[#allocation2] sm:$0xff]  }
   0xe   :  { %v110_v1 = vsel %vm108_vm0, 4294967295, %v6311_v0  ;;  %v6084_v3 = vld [vmem:[#allocation2 + $0x8] sm:$0x1f]   ;;  %v32_v6 = vld [vmem:[%s7948_s0] sm:$0xff]  ;;  %vm77_vm2 = vcmask 203776   ;;  %v34_v9 = vld [vmem:[%s7948_s0 + $0x10] sm:$0xff] }
   0xf   :  { %v111_v2 = vsel %vm109_vm1, %v110_v1, 0  ;;  %v33_v7 = vld [vmem:[%s7948_s0 + $0x8] sm:$0xff]  ;;  %v35_v10 = vld [vmem:[%s7948_s0 + $0x18] sm:$0xff]  ;;  %v36_v11 = vld [vmem:[%s7948_s0 + $0x20] sm:$0xff]  ;;  %vm287_vm3 = vcmask 1046528   ;;  %s6312_s12 = smov 32  }
  0x10   :  { %v113_v4 = vand.u32 %v6084_v3, %v111_v2  ;;  %v52_v8 = vpack.c.bf16 %v33_v7, %v32_v6  ;;  %v37_v12 = vld [vmem:[%s7948_s0 + $0x28] sm:$0xff]  ;;  %v53_v13 = vpack.c.bf16 %v35_v10, %v34_v9  ;;  %v38_v17 = vld [vmem:[%s7948_s0 + $0x30] sm:$0xff]  ;;  %v39_v18 = vld [vmem:[%s7948_s0 + $0x38] sm:$0xff]  ;;  %vm238_vm4 = vsmask.f32 7424  ;;  %s6313_s13 = smov 96  }
  0x11   :  { %v54_v14 = vpack.c.bf16 %v37_v12, %v36_v11  ;;  %v6086_v15 = vld [vmem:[#allocation2 + $0x128] sm:$0xff]   ;;  %v6088_v19 = vld [vmem:[#allocation2 + $0x120] sm:$0xff]   ;;  %v6092_v25 = vld [vmem:[#allocation2 + $0x118] sm:$0xff]   ;;  %v55_v26 = vpack.c.bf16 %v39_v18, %v38_v17  ;;  %vm301_vm5 = vsmask.f32 6400 }
  0x12   :  { %6011 = vmatprep.subr.bf16.mxu0 %v113_v4  ;;  %6015 = vmatprep.mubr.msk.bf16.mxu0 %vm77_vm2, %v52_v8  ;;  %v6087_v16 = vld [vmem:[#allocation2 + $0xe8] sm:$0xff]   ;;  %v40_v20 = vld [vmem:[%s7948_s0 + $0x40] sm:$0xff]  ;;  %v6094_v29 = vld [vmem:[#allocation2 + $0xd8] sm:$0xff]   ;;  %vm1109_vm10 = vsmask.f32 5376 }
  0x13   :  { %6012 = vmatpush3.bf16.msra.mxu0 %v113_v4  ;;  %v41_v21 = vld [vmem:[%s7948_s0 + $0x48] sm:$0xff]  ;;  %v6089_v22 = vld [vmem:[#allocation2 + $0xe0] sm:$0xff]   ;;  %v42_v31 = vld [vmem:[%s7948_s0 + $0x50] sm:$0xff]  ;;  %vm1155_vm13 = vsmask.f32 4352 }
  0x14   :  { %6013 = vmatprep.subr.bf16.mxu0 %v6085_v5  ;;  %v6090_v23 = vld [vmem:[#allocation2 + $0xa8] sm:$0xff]   ;;  %v6093_v27 = vld [vmem:[#allocation2 + $0xa0] sm:$0xff]   ;;  %v56_v28 = vpack.c.bf16 %v41_v21, %v40_v20  ;;  %v43_v32 = vld [vmem:[%s7948_s0 + $0x58] sm:$0xff] }
  0x15   :  { %v6091_v24 = vld [vmem:[#allocation2 + $0x68] sm:$0xff]   ;;  %5450 = vmatprep.subr.bf16.mxu1 %v6090_v23  ;;  %v6095_v30 = vld [vmem:[#allocation2 + $0x60] sm:$0xff]   ;;  %v6096_v33 = vld [vmem:[#allocation2 + $0x98] sm:$0xff]   ;;  %v57_v40 = vpack.c.bf16 %v43_v32, %v42_v31 }
  0x16   :  { %5451 = vmatpush3.bf16.msra.mxu1 %v6091_v24  ;;  %v44_v34 = vld [vmem:[%s7948_s0 + $0x60] sm:$0xff]  ;;  %v45_v35 = vld [vmem:[%s7948_s0 + $0x68] sm:$0xff]  ;;  %v6097_v36 = vld [vmem:[#allocation2 + $0x110] sm:$0xff]  }
  0x17   :  { %6014 = vmatpush3.bf16.msra.mxu0 %v6085_v5  ;;  %5452 = vmatprep.subr.bf16.mxu1 %v6093_v27  ;;  %v6098_v37 = vld [vmem:[#allocation2 + $0x58] sm:$0xff]   ;;  %v6099_v38 = vld [vmem:[#allocation2 + $0xd0] sm:$0xff]   ;;  %v58_v42 = vpack.c.bf16 %v45_v35, %v44_v34  ;;  %v6102_v43 = vld [vmem:[#allocation2 + $0x108] sm:$0xff]  }
  0x18   :  { %5520 = vmatprep.subr.bf16.mxu0 %v6086_v15  ;;  %v6100_v39 = vld [vmem:[#allocation2 + $0x90] sm:$0xff]   ;;  %v6103_v44 = vld [vmem:[#allocation2 + $0xc8] sm:$0xff]   ;;  %v47_v46 = vld [vmem:[%s7948_s0 + $0x78] sm:$0xff] }
  0x19   :  { %v6101_v41 = vld [vmem:[#allocation2 + $0x50] sm:$0xff]   ;;  %v48_v47 = vld [vmem:[%s7948_s0 + $0x80] sm:$0xff]  ;;  %v49_v48 = vld [vmem:[%s7948_s0 + $0x88] sm:$0xff] }
  0x1a   :  { %6016 = vmatmul.mubr.msk.bf16.vlgmr.msra.gmra.mxu0 %vm77_vm2, %v53_v13  ;;  %5453 = vmatpush3.bf16.msra.mxu1 %v6095_v30  ;;  %v46_v45 = vld [vmem:[%s7948_s0 + $0x70] sm:$0xff]  ;;  %v60_v50 = vpack.c.bf16 %v49_v48, %v48_v47  ;;  %v51_v52 = vld [vmem:[%s7948_s0 + $0x98] sm:$0xff]  ;;  %v6104_v54 = vld [vmem:[#allocation2 + $0x88] sm:$0xff]  }
  0x1b   :  { %6019 = vmatprep.mubr.msk.bf16.mxu0 %vm77_vm2, %v54_v14  ;;  %5521 = vmatpush3.bf16.msra.mxu0 %v6087_v16  ;;  %v59_v49 = vpack.c.bf16 %v47_v46, %v46_v45  ;;  %v50_v51 = vld [vmem:[%s7948_s0 + $0x90] sm:$0xff]  ;;  %v6105_v55 = vld [vmem:[#allocation2 + $0x48] sm:$0xff]   ;;  %v6106_v56 = vld [vmem:[#allocation2 + $0x100] sm:$0xff]  }
  0x1c   :  { %5522 = vmatprep.subr.bf16.mxu0 %v6088_v19  ;;  %5454 = vmatprep.subr.bf16.mxu1 %v6096_v33  ;;  %v61_v53 = vpack.c.bf16 %v51_v52, %v50_v51  ;;  %v6108_v57 = vld [vmem:[#allocation2 + $0x80] sm:$0xff]   ;;  %v6110_v60 = vld [vmem:[#allocation2 + $0xf8] sm:$0xff]   ;;  %v6114_v0 = vld [vmem:[#allocation2 + $0x70] sm:$0xff]  }
  0x1d   :  { %v6107_v58 = vld [vmem:[#allocation2 + $0xc0] sm:$0xff]   ;;  %v6111_v61 = vld [vmem:[#allocation2 + $0x78] sm:$0xff]   ;;  %v6115_v1 = vld [vmem:[#allocation2 + $0xf0] sm:$0xff]  }
  0x1e   :  { %5455 = vmatpush3.bf16.msra.mxu1 %v6098_v37  ;;  %v6109_v59 = vld [vmem:[#allocation2 + $0x40] sm:$0xff]   ;;  %v6112_v62 = vld [vmem:[#allocation2 + $0xb8] sm:$0xff]   ;;  %v6116_v2 = vld [vmem:[#allocation2 + $0x30] sm:$0xff]  }
  0x1f   :  { %5523 = vmatpush3.bf16.msra.mxu0 %v6089_v22  ;;  %5456 = vmatprep.subr.bf16.mxu1 %v6100_v39  ;;  %v6113_v63 = vld [vmem:[#allocation2 + $0x38] sm:$0xff]   ;;  %v6117_v3 = vld [vmem:[#allocation2 + $0xb0] sm:$0xff]  }
  0x20   :  { %5524 = vmatprep.subr.bf16.mxu0 %v6092_v25 }
  0x22   :  { %6020 = vmatmul.mubr.msk.bf16.gmra.mxu0 %vm77_vm2, %v55_v26  ;;  %5457 = vmatpush3.bf16.msra.mxu1 %v6101_v41 }
  0x23   :  { %6023 = vmatprep.mubr.msk.bf16.mxu0 %vm77_vm2, %v56_v28  ;;  %5525 = vmatpush3.bf16.msra.mxu0 %v6094_v29 }
  0x24   :  { %5526 = vmatprep.subr.bf16.mxu0 %v6097_v36  ;;  %5458 = vmatprep.subr.bf16.mxu1 %v6104_v54 }
  0x26   :  { %5459 = vmatpush3.bf16.msra.mxu1 %v6105_v55 }
  0x27   :  { %5527 = vmatpush3.bf16.msra.mxu0 %v6099_v38  ;;  %5460 = vmatprep.subr.bf16.mxu1 %v6108_v57 }
  0x28   :  { %5528 = vmatprep.subr.bf16.mxu0 %v6102_v43 }
  0x2a   :  { %6024 = vmatmul.mubr.msk.bf16.gmra.mxu0 %vm77_vm2, %v57_v40  ;;  %5461 = vmatpush3.bf16.msra.mxu1 %v6109_v59 }
  0x2b   :  { %6027 = vmatprep.mubr.msk.bf16.mxu0 %vm77_vm2, %v58_v42  ;;  %5529 = vmatpush3.bf16.msra.mxu0 %v6103_v44 }
  0x2c   :  { %5530 = vmatprep.subr.bf16.mxu0 %v6106_v56  ;;  %5462 = vmatprep.subr.bf16.mxu1 %v6111_v61 }
  0x2e   :  { %5463 = vmatpush3.bf16.msra.mxu1 %v6113_v63 }
  0x2f   :  { %5531 = vmatpush3.bf16.msra.mxu0 %v6107_v58  ;;  %5464 = vmatprep.subr.bf16.mxu1 %v6114_v0 }
  0x30   :  { %5532 = vmatprep.subr.bf16.mxu0 %v6110_v60 }
  0x32   :  { %6028 = vmatmul.mubr.msk.bf16.gmra.mxu0 %vm77_vm2, %v59_v49  ;;  %5465 = vmatpush3.bf16.msra.mxu1 %v6116_v2 }
  0x33   :  { %6031 = vmatprep.mubr.msk.bf16.mxu0 %vm77_vm2, %v60_v50  ;;  %5533 = vmatpush3.bf16.msra.mxu0 %v6112_v62 }
  0x34   :  { %5534 = vmatprep.subr.bf16.mxu0 %v6115_v1 }
  0x37   :  { %5535 = vmatpush3.bf16.msra.mxu0 %v6117_v3 }
  0x3a   :  { %6032 = vmatmul.mubr.msk.bf16.gmra.mxu0 %vm77_vm2, %v61_v53 }
  0xda   :  { %v6017_v4 = vpop.f32.mrf.mxu0 }
  0xdc   :  { %v149_v5 = vpop.f32.mrf.mxu0 }
  0xde   :  { %v6018_v6 = vpop.f32.mrf.mxu0 }
  0xdf   :  { %v6419_v7 = vpack.c.bf16 %v6018_v6, %v6017_v4 }
  0xe0   :  { %v152_v8 = vpop.f32.mrf.mxu0 }
  0xe1   :  { %v251_v9 = vshrl.u32 %v6419_v7, 16  ;;  %v228_v10 = vpack.c.bf16 %v152_v8, %v149_v5  ;;  %v247_v11 = vshll.u32 %v6419_v7, 16  ;;  %v289_v28 = vrot.slane %v6419_v7, 1 }
  0xe2   :  { %v6021_v12 = vpop.f32.mrf.mxu0 }
  0xe3   :  { %v240_v13 = vshrl.u32 %v228_v10, 16  ;;  %v242_v14 = vshll.u32 %v228_v10, 16  ;;  %v305_v16 = vrot.slane %v251_v9, 1  ;;  %v306_v17 = vrot.slane %v247_v11, 2 }
  0xe4   :  { %v165_v15 = vpop.f32.mrf.mxu0  ;;  %v288_v21 = vrot.slane %v228_v10, 1  ;;  %v249_v23 = vrot.slane %v247_v11, 1 }
  0xe5   :  { %v244_v18 = vrot.slane %v242_v14, 1  ;;  %v302_v19 = vrot.slane %v240_v13, 1  ;;  %v303_v20 = vrot.slane %v242_v14, 2  ;;  %v307_v27 = vor.u32 %v306_v17, %v305_v16 }
  0xe6   :  { %v6022_v22 = vpop.f32.mrf.mxu0  ;;  %v290_v35 = vsel %vm287_vm3, %v288_v21, %v289_v28  ;;  %v253_v40 = vor.u32 %v251_v9, %v249_v23 }
  0xe7   :  { %v6423_v24 = vpack.c.bf16 %v6022_v22, %v6021_v12  ;;  %v245_v25 = vor.u32 %v244_v18, %v240_v13  ;;  %v304_v26 = vor.u32 %v303_v20, %v302_v19 }
  0xe8   :  { %v168_v29 = vpop.f32.mrf.mxu0 }
  0xe9   :  { %v6426_v30 = vpack.c.bf16 %v168_v29, %v165_v15  ;;  %v250_v31 = vsel %vm238_vm4, %v245_v25, %v249_v23  ;;  %v308_v32 = vsel %vm301_vm5, %v304_v26, %v307_v27  ;;  %v267_v33 = vshrl.u32 %v6423_v24, 16 }
  0xea   :  { %v6025_v34 = vpop.f32.mrf.mxu0  ;;  %758 = vmatprep.mubr.bf16.mxu1 %v250_v31  ;;  %863 = vmatprep.mubr.bf16.mxu0 %v308_v32  ;;  %v263_v36 = vshll.u32 %v6423_v24, 16  ;;  %v293_v9 = vrot.slane %v6423_v24, 1 }
  0xeb   :  { %v259_v37 = vshrl.u32 %v6426_v30, 16  ;;  %759 = vmatmul.mubr.bf16.vlgmr.msra.gmra.mxu1 %v228_v10  ;;  %864 = vmatmul.mubr.bf16.vlgmr.msra.gmra.mxu0 %v290_v35  ;;  %v255_v38 = vshll.u32 %v6426_v30, 16  ;;  %v291_v45 = vrot.slane %v6426_v30, 1  ;;  %v313_v46 = vrot.slane %v267_v33, 1 }
  0xec   :  { %v181_v39 = vpop.f32.mrf.mxu0  ;;  %v314_v47 = vrot.slane %v263_v36, 2  ;;  %v265_v54 = vrot.slane %v263_v36, 1 }
  0xed   :  { %v257_v41 = vrot.slane %v255_v38, 1  ;;  %v309_v42 = vrot.slane %v259_v37, 1  ;;  %v310_v43 = vrot.slane %v255_v38, 2  ;;  %v292_v60 = vsel %vm287_vm3, %v289_v28, %v291_v45 }
  0xee   :  { %v6026_v44 = vpop.f32.mrf.mxu0  ;;  %v315_v57 = vor.u32 %v314_v47, %v313_v46  ;;  %v269_v14 = vor.u32 %v267_v33, %v265_v54  ;;  %v294_v20 = vsel %vm287_vm3, %v291_v45, %v293_v9 }
  0xef   :  { %v6436_v48 = vpack.c.bf16 %v6026_v44, %v6025_v34  ;;  %v258_v49 = vsel %vm238_vm4, %v253_v40, %v257_v41  ;;  %v311_v50 = vor.u32 %v310_v43, %v309_v42  ;;  %v261_v51 = vor.u32 %v259_v37, %v257_v41 }
  0xf0   :  { %v184_v52 = vpop.f32.mrf.mxu0  ;;  %766 = vmatprep.mubr.bf16.mxu1 %v258_v49 }
  0xf1   :  { %v6439_v53 = vpack.c.bf16 %v184_v52, %v181_v39  ;;  %v312_v55 = vsel %vm301_vm5, %v307_v27, %v311_v50  ;;  %v328_v58 = vshll.u32 %v6436_v48, 16  ;;  %v266_v61 = vsel %vm238_vm4, %v261_v51, %v265_v54 }
  0xf2   :  { %v6029_v56 = vpop.f32.mrf.mxu0  ;;  %871 = vmatprep.mubr.bf16.mxu0 %v312_v55  ;;  %v316_v62 = vsel %vm301_vm5, %v311_v50, %v315_v57  ;;  %v326_v2 = vshrl.u32 %v6436_v48, 16  ;;  %v369_v34 = vrot.slane %v6436_v48, 1 }
  0xf3   :  { %v275_v59 = vshrl.u32 %v6439_v53, 16  ;;  %767 = vmatmul.mubr.bf16.gmra.mxu1 %v6419_v7  ;;  %872 = vmatmul.mubr.bf16.gmra.mxu0 %v292_v60  ;;  %v271_v0 = vshll.u32 %v6439_v53, 16  ;;  %v330_v5 = vrot.slane %v328_v58, 1  ;;  %v379_v16 = vrot.slane %v328_v58, 2 }
  0xf4   :  { %774 = vmatprep.mubr.bf16.mxu1 %v266_v61  ;;  %v197_v63 = vpop.f32.mrf.mxu0  ;;  %879 = vmatprep.mubr.bf16.mxu0 %v316_v62  ;;  %v378_v15 = vrot.slane %v326_v2, 1  ;;  %v295_v36 = vrot.slane %v6439_v53, 1 }
  0xf5   :  { %v317_v1 = vrot.slane %v275_v59, 1  ;;  %v318_v4 = vrot.slane %v271_v0, 2  ;;  %v273_v7 = vrot.slane %v271_v0, 1  ;;  %v331_v18 = vor.u32 %v330_v5, %v326_v2 }
  0xf6   :  { %v6030_v3 = vpop.f32.mrf.mxu0  ;;  %v296_v49 = vsel %vm287_vm3, %v293_v9, %v295_v36 }
  0xf7   :  { %v6450_v6 = vpack.c.bf16 %v6030_v3, %v6029_v56  ;;  %v319_v10 = vor.u32 %v318_v4, %v317_v1  ;;  %v274_v21 = vsel %vm238_vm4, %v269_v14, %v273_v7  ;;  %v277_v33 = vor.u32 %v275_v59, %v273_v7 }
  0xf8   :  { %v200_v8 = vpop.f32.mrf.mxu0 }
  0xf9   :  { %v341_v11 = vshll.u32 %v6450_v6, 16  ;;  %v345_v12 = vshrl.u32 %v6450_v6, 16  ;;  %v6455_v13 = vpack.c.bf16 %v200_v8, %v197_v63  ;;  %v320_v23 = vsel %vm301_vm5, %v315_v57, %v319_v10 }
  0xfa   :  { %v6033_v17 = vpop.f32.mrf.mxu0  ;;  %v372_v63 = vrot.slane %v6450_v6, 1 }
  0xfb   :  { %v333_v19 = vshll.u32 %v6455_v13, 16  ;;  %775 = vmatmul.mubr.bf16.gmra.mxu1 %v6426_v30  ;;  %v337_v22 = vshrl.u32 %v6455_v13, 16  ;;  %880 = vmatmul.mubr.bf16.gmra.mxu0 %v294_v20  ;;  %v385_v26 = vrot.slane %v345_v12, 1  ;;  %v386_v27 = vrot.slane %v341_v11, 2 }
  0xfc   :  { %782 = vmatprep.mubr.bf16.mxu1 %v274_v21  ;;  %v213_v25 = vpop.f32.mrf.mxu0  ;;  %887 = vmatprep.mubr.bf16.mxu0 %v320_v23  ;;  %v380_v30 = vor.u32 %v379_v16, %v378_v15  ;;  %v343_v35 = vrot.slane %v341_v11, 1  ;;  %v370_v38 = vrot.slane %v6455_v13, 1 }
  0xfd   :  { %v382_v28 = vrot.slane %v333_v19, 2  ;;  %v335_v29 = vrot.slane %v333_v19, 1  ;;  %v381_v31 = vrot.slane %v337_v22, 1  ;;  %v387_v44 = vor.u32 %v386_v27, %v385_v26 }
  0xfe   :  { %v6034_v32 = vpop.f32.mrf.mxu0  ;;  %v371_v52 = vsel %vm287_vm3, %v369_v34, %v370_v38  ;;  %v347_v62 = vor.u32 %v345_v12, %v343_v35  ;;  %v373_v9 = vsel %vm287_vm3, %v370_v38, %v372_v63 }
  0xff   :  { %v336_v37 = vsel %vm238_vm4, %v331_v18, %v335_v29  ;;  %v383_v41 = vor.u32 %v382_v28, %v381_v31  ;;  %v339_v42 = vor.u32 %v337_v22, %v335_v29  ;;  %v6477_v55 = vpack.c.bf16 %v6034_v32, %v6033_v17 }
 0x100   :  { %v216_v39 = vpop.f32.mrf.mxu0  ;;  %v399_v40 = vrot.slane %v336_v37, 4  ;;  %v400_v60 = vrot.slane %v371_v52, 4  ;;  %v406_v15 = vrot.slane %v373_v9, 4  ;;  %v410_v29 = vrot.slane %v6450_v6, 4  ;;  %v6118_v52 = vld [vmem:[#allocation2 + $0x1a8] sm:$0xff]   ;;  %v6125_v9 = vld [vmem:[#allocation2 + $0x150] sm:$0xff]  }
 0x101   :  { %v6467_v43 = vpack.c.bf16 %v216_v39, %v213_v25  ;;  %v384_v46 = vsel %vm301_vm5, %v380_v30, %v383_v41  ;;  %v344_v54 = vsel %vm238_vm4, %v339_v42, %v343_v35  ;;  %v388_v57 = vsel %vm301_vm5, %v383_v41, %v387_v44  ;;  %5590 = vmatprep.subr.bf16.mxu1 %v6118_v52  ;;  %v6131_v52 = vld [vmem:[#allocation2 + $0x138] sm:$0xff]  }
 0x102   :  { %v455_v45 = vsel %vm108_vm0, %v277_v33, %v399_v40  ;;  %v401_v51 = vrot.slane %v384_v46, 4  ;;  %v404_v61 = vrot.slane %v344_v54, 4  ;;  %v408_v0 = vrot.slane %v388_v57, 4  ;;  %v6119_v54 = vld [vmem:[#allocation2 + $0x168] sm:$0xff]   ;;  %v6121_v57 = vld [vmem:[#allocation2 + $0x160] sm:$0xff]  }
 0x103   :  { %v349_v47 = vshll.u32 %v6467_v43, 16  ;;  %783 = vmatmul.mubr.bf16.gmra.mxu1 %v6423_v24  ;;  %v353_v50 = vshrl.u32 %v6467_v43, 16  ;;  %888 = vmatmul.mubr.bf16.gmra.mxu0 %v296_v49  ;;  %v398_v24 = vrot.slane %v6436_v48, 4  ;;  %v357_v1 = vshll.u32 %v6477_v55, 16 }
 0x104   :  { %790 = vmatprep.mubr.bf16.mxu1 %v455_v45  ;;  %v463_v59 = vsel %vm108_vm0, %v319_v10, %v401_v51  ;;  %v361_v2 = vshrl.u32 %v6477_v55, 16  ;;  %v459_v7 = vsel %vm108_vm0, %v295_v36, %v400_v60  ;;  %v405_v48 = vsel %vm108_vm0, %v399_v40, %v404_v61  ;;  %5591 = vmatpush3.bf16.msra.mxu1 %v6119_v54 }
 0x105   :  { %v390_v56 = vrot.slane %v349_v47, 2  ;;  %v389_v58 = vrot.slane %v353_v50, 1  ;;  %895 = vmatprep.mubr.bf16.mxu0 %v463_v59  ;;  %v451_v4 = vsel %vm108_vm0, %v6439_v53, %v398_v24  ;;  %v351_v5 = vrot.slane %v349_v47, 1 }
 0x106   :  { %v409_v8 = vsel %vm108_vm0, %v401_v51, %v408_v0  ;;  %v393_v11 = vrot.slane %v361_v2, 1  ;;  %v394_v12 = vrot.slane %v357_v1, 2  ;;  %v402_v53 = vrot.slane %v6455_v13, 4 }
 0x107   :  { %v391_v3 = vor.u32 %v390_v56, %v389_v58  ;;  %v352_v10 = vsel %vm238_vm4, %v347_v62, %v351_v5  ;;  %v359_v17 = vrot.slane %v357_v1, 1  ;;  %v374_v18 = vrot.slane %v6467_v43, 1  ;;  %v6120_v56 = vld [vmem:[#allocation2 + $0x1a0] sm:$0xff]   ;;  %v6122_v62 = vld [vmem:[#allocation2 + $0x198] sm:$0xff]  }
 0x108   :  { %v412_v16 = vrot.slane %v352_v10, 4  ;;  %v355_v20 = vor.u32 %v353_v50, %v351_v5  ;;  %v395_v21 = vor.u32 %v394_v12, %v393_v11  ;;  %v403_v22 = vsel %vm108_vm0, %v398_v24, %v402_v53  ;;  %5592 = vmatprep.subr.bf16.mxu1 %v6120_v56  ;;  %v6126_v10 = vld [vmem:[#allocation2 + $0x188] sm:$0xff]  }
 0x109   :  { %v392_v14 = vsel %vm301_vm5, %v387_v44, %v391_v3  ;;  %v407_v23 = vsel %vm108_vm0, %v400_v60, %v406_v15  ;;  %v375_v13 = vsel %vm287_vm3, %v372_v63, %v374_v18  ;;  %v376_v33 = vrot.slane %v6477_v55, 1  ;;  %5593 = vmatpush3.bf16.msra.mxu1 %v6121_v57  ;;  %v6123_v63 = vld [vmem:[#allocation2 + $0x158] sm:$0xff]   ;;  %v6526_v11 = vld [vmem:[%s7951_s3 + $0xa] ss:$0 sm:$0xff] }
 0x10a   :  { %v416_v19 = vrot.slane %v392_v14, 4  ;;  %v413_v25 = vsel %vm108_vm0, %v404_v61, %v412_v16  ;;  %v360_v27 = vsel %vm238_vm4, %v355_v20, %v359_v17  ;;  %v396_v28 = vsel %vm301_vm5, %v391_v3, %v395_v21  ;;  %5594 = vmatprep.subr.bf16.mxu1 %v6122_v62 }
 0x10b   :  { %791 = vmatmul.mubr.bf16.gmra.mxu1 %v451_v4  ;;  %896 = vmatmul.mubr.bf16.gmra.mxu0 %v459_v7  ;;  %v414_v31 = vrot.slane %v375_v13, 4  ;;  %v420_v32 = vrot.slane %v360_v27, 4  ;;  %v424_v30 = vrot.slane %v396_v28, 4  ;;  %v411_v34 = vsel %vm108_vm0, %v402_v53, %v410_v29 }
 0x10c   :  { %798 = vmatprep.mubr.bf16.mxu1 %v405_v48  ;;  %903 = vmatprep.mubr.bf16.mxu0 %v409_v8  ;;  %v417_v26 = vsel %vm108_vm0, %v408_v0, %v416_v19  ;;  %v363_v37 = vor.u32 %v361_v2, %v359_v17  ;;  %v377_v39 = vsel %vm287_vm3, %v374_v18, %v376_v33  ;;  %v418_v6 = vrot.slane %v6467_v43, 4  ;;  %v6124_v8 = vld [vmem:[#allocation2 + $0x190] sm:$0xff]   ;;  %v6127_v17 = vld [vmem:[#allocation2 + $0x148] sm:$0xff]  }
 0x10d   :  { %v415_v35 = vsel %vm108_vm0, %v406_v15, %v414_v31  ;;  %v421_v36 = vsel %vm108_vm0, %v412_v16, %v420_v32  ;;  %v425_v38 = vsel %vm108_vm0, %v416_v19, %v424_v30  ;;  %v422_v40 = vrot.slane %v377_v39, 4  ;;  %5595 = vmatpush3.bf16.msra.mxu1 %v6123_v63 }
 0x10e   :  { %v428_v41 = vrot.slane %v363_v37, 4  ;;  %v432_v42 = vrot.slane %v395_v21, 4  ;;  %v419_v44 = vsel %vm108_vm0, %v410_v29, %v418_v6  ;;  %v426_v49 = vrot.slane %v6477_v55, 4  ;;  %v6520_v55 = vld [vmem:[%s7951_s3] ss:$0 sm:$0xff]  ;;  %5596 = vmatprep.subr.bf16.mxu1 %v6124_v8  ;;  %v6132_v8 = vld [vmem:[#allocation2 + $0x170] sm:$0xff]  }
 0x10f   :  { %v423_v45 = vsel %vm108_vm0, %v414_v31, %v422_v40  ;;  %v430_v50 = vrot.slane %v376_v33, 4 }
 0x110   :  { %v429_v46 = vsel %vm108_vm0, %v420_v32, %v428_v41  ;;  %v433_v47 = vsel %vm108_vm0, %v424_v30, %v432_v42  ;;  %v427_v43 = vsel %vm108_vm0, %v418_v6, %v426_v49  ;;  %v6128_v30 = vld [vmem:[#allocation2 + $0x180] sm:$0xff]  }
 0x111   :  { %v431_v51 = vsel %vm108_vm0, %v422_v40, %v430_v50  ;;  %5597 = vmatpush3.bf16.msra.mxu1 %v6125_v9  ;;  %v6133_v9 = vld [vmem:[#allocation2 + $0x130] sm:$0xff]  }
 0x112   :  { %5598 = vmatprep.subr.bf16.mxu1 %v6126_v10 }
 0x113   :  { %799 = vmatmul.mubr.bf16.gmra.mxu1 %v403_v22  ;;  %904 = vmatmul.mubr.bf16.gmra.mxu0 %v407_v23 }
 0x114   :  { %806 = vmatprep.mubr.bf16.mxu1 %v413_v25  ;;  %911 = vmatprep.mubr.bf16.mxu0 %v417_v26 }
 0x115   :  { %5599 = vmatpush3.bf16.msra.mxu1 %v6127_v17 }
 0x116   :  { %5600 = vmatprep.subr.bf16.mxu1 %v6128_v30 }
 0x11b   :  { %807 = vmatmul.mubr.bf16.gmra.mxu1 %v411_v34  ;;  %912 = vmatmul.mubr.bf16.gmra.mxu0 %v415_v35  ;;  %v6129_v34 = vld [vmem:[#allocation2 + $0x140] sm:$0xff]  }
 0x11c   :  { %814 = vmatprep.mubr.bf16.mxu1 %v421_v36  ;;  %919 = vmatprep.mubr.bf16.mxu0 %v425_v38 }
 0x11d   :  { %5601 = vmatpush3.bf16.msra.mxu1 %v6129_v34 }
 0x123   :  { %815 = vmatmul.mubr.bf16.gmra.mxu1 %v419_v44  ;;  %920 = vmatmul.mubr.bf16.gmra.mxu0 %v423_v45 }
 0x124   :  { %822 = vmatprep.mubr.bf16.mxu1 %v429_v46  ;;  %927 = vmatprep.mubr.bf16.mxu0 %v433_v47 }
 0x12b   :  { %823 = vmatmul.mubr.bf16.gmra.mxu1 %v427_v43  ;;  %928 = vmatmul.mubr.bf16.gmra.mxu0 %v431_v51  ;;  %v6130_v51 = vld [vmem:[#allocation2 + $0x178] sm:$0xff]  }
 0x12c   :  { %5602 = vmatprep.subr.bf16.mxu1 %v6130_v51 }
 0x12d   :  { %5603 = vmatpush3.bf16.msra.mxu1 %v6131_v52 }
 0x12e   :  { %5604 = vmatprep.subr.bf16.mxu1 %v6132_v8 }
 0x131   :  { %5605 = vmatpush3.bf16.msra.mxu1 %v6133_v9 }
 0x1ab   :  { %v5466_v58 = vpop.f32.mrf.mxu1  ;;  %v5536_v59 = vpop.f32.mrf.mxu0 }
 0x1ad   :  { %v5467_v24 = vpop.f32.mrf.mxu1  ;;  %v5537_v60 = vpop.f32.mrf.mxu0 }
 0x1ae   :  { %v5468_v61 = vadd.f32 %v5467_v24, %v5466_v58  ;;  %v5538_v3 = vadd.f32 %v5537_v60, %v5536_v59 }
 0x1af   :  { %v5469_v0 = vpop.f32.mrf.mxu1  ;;  %v5539_v1 = vpop.f32.mrf.mxu0 }
 0x1b0   :  { %v761_v2 = vadd.f32 %v5468_v61, %v6520_v55 }
 0x1b1   :  { %v5470_v4 = vpop.f32.mrf.mxu1  ;;  %v5540_v5 = vpop.f32.mrf.mxu0 }
 0x1b2   :  { %v866_v7 = vadd.f32 %v5538_v3, %v761_v2  ;;  %v5471_v48 = vadd.f32 %v5470_v4, %v5469_v0  ;;  %v5541_v53 = vadd.f32 %v5540_v5, %v5539_v1 }
 0x1b3   :  { %v5472_v12 = vpop.f32.mrf.mxu1  ;;  %v5542_v15 = vpop.f32.mrf.mxu0 }
 0x1b4   :  { %v764_v14 = vadd.f32 %v5471_v48, %v6520_v55  ;;  %v959_v18 = vmul.f32 %v6526_v11, %v866_v7  ;;  %vm937_vm6 = vcmp.gt.f32.partialorder %v866_v7, 0.0 }
 0x1b5   :  { %v5473_v16 = vpop.f32.mrf.mxu1  ;;  %v5543_v21 = vpop.f32.mrf.mxu0 }
 0x1b6   :  { %v869_v19 = vadd.f32 %v5541_v53, %v764_v14  ;;  %v5474_v20 = vadd.f32 %v5473_v16, %v5472_v12  ;;  %v5544_v26 = vadd.f32 %v5543_v21, %v5542_v15  ;;  %v977_v28 = vsel %vm937_vm6, %v866_v7, %v959_v18 }
 0x1b7   :  { %v5475_v22 = vpop.f32.mrf.mxu1  ;;  %v5545_v13 = vpop.f32.mrf.mxu0 }
 0x1b8   :  { %vm938_vm7 = vcmp.gt.f32.partialorder %v869_v19, 0.0  ;;  %v960_v23 = vmul.f32 %v6526_v11, %v869_v19  ;;  %v769_v25 = vadd.f32 %v5474_v20, %v6520_v55 }
 0x1b9   :  { %v5476_v27 = vpop.f32.mrf.mxu1  ;;  %v5546_v33 = vpop.f32.mrf.mxu0 }
 0x1ba   :  { %v978_v29 = vsel %vm938_vm7, %v869_v19, %v960_v23  ;;  %v874_v31 = vadd.f32 %v5544_v26, %v769_v25  ;;  %v5477_v32 = vadd.f32 %v5476_v27, %v5475_v22  ;;  %v5547_v38 = vadd.f32 %v5546_v33, %v5545_v13 }
 0x1bb   :  { %v6532_v35 = vpack.c.bf16 %v978_v29, %v977_v28  ;;  %v5478_v36 = vpop.f32.mrf.mxu1  ;;  %v5548_v39 = vpop.f32.mrf.mxu0 }
 0x1bc   :  { %v772_v37 = vadd.f32 %v5477_v32, %v6520_v55  ;;  %v961_v6 = vmul.f32 %v6526_v11, %v874_v31  ;;  %vm939_vm8 = vcmp.gt.f32.partialorder %v874_v31, 0.0 }
 0x1bd   :  { %v5479_v40 = vpop.f32.mrf.mxu1  ;;  %v6537_v41 = vshrl.u32 %v6532_v35, 16  ;;  %v6540_v42 = vshll.u32 %v6532_v35, 16  ;;  %v5549_v46 = vpop.f32.mrf.mxu0  ;;  %v1138_v60 = vrot.slane %v6532_v35, 3  ;;  %v1053_v61 = vrot.slane %v6532_v35, 1 }
 0x1be   :  { %v877_v44 = vadd.f32 %v5547_v38, %v772_v37  ;;  %v5480_v45 = vadd.f32 %v5479_v40, %v5478_v36  ;;  %v5550_v57 = vadd.f32 %v5549_v46, %v5548_v39  ;;  %v979_v59 = vsel %vm939_vm8, %v874_v31, %v961_v6 }
 0x1bf   :  { %v5481_v47 = vpop.f32.mrf.mxu1  ;;  %v1009_v49 = vrot.slane %v6540_v42, 1  ;;  %v1110_v50 = vrot.slane %v6537_v41, 2  ;;  %v1111_v43 = vrot.slane %v6540_v42, 3  ;;  %v5551_v58 = vpop.f32.mrf.mxu0  ;;  %v1070_v2 = vrot.slane %v6537_v41, 1 }
 0x1c0   :  { %vm940_vm9 = vcmp.gt.f32.partialorder %v877_v44, 0.0  ;;  %v962_v54 = vmul.f32 %v6526_v11, %v877_v44  ;;  %v777_v56 = vadd.f32 %v5480_v45, %v6520_v55  ;;  %v1071_v48 = vrot.slane %v6540_v42, 2 }
 0x1c1   :  { %v5482_v24 = vpop.f32.mrf.mxu1  ;;  %v5552_v1 = vpop.f32.mrf.mxu0  ;;  %v1010_v5 = vor.u32 %v1009_v49, %v6537_v41  ;;  %v1112_v7 = vor.u32 %v1111_v43, %v1110_v50  ;;  %v1156_v19 = vrot.slane %v6537_v41, 3  ;;  %v1157_v25 = vrot.slane %v6540_v42, 4 }
 0x1c2   :  { %v980_v62 = vsel %vm940_vm9, %v877_v44, %v962_v54  ;;  %v882_v63 = vadd.f32 %v5550_v57, %v777_v56  ;;  %v5483_v0 = vadd.f32 %v5482_v24, %v5481_v47  ;;  %v5553_v14 = vadd.f32 %v5552_v1, %v5551_v58 }
 0x1c3   :  { %v6550_v3 = vpack.c.bf16 %v980_v62, %v979_v59  ;;  %v5484_v4 = vpop.f32.mrf.mxu1  ;;  %v5554_v53 = vpop.f32.mrf.mxu0  ;;  %v1072_v24 = vor.u32 %v1071_v48, %v1070_v2 }
 0x1c4   :  { %vm941_vm11 = vcmp.gt.f32.partialorder %v882_v63, 0.0  ;;  %v963_v10 = vmul.f32 %v6526_v11, %v882_v63  ;;  %v780_v12 = vadd.f32 %v5483_v0, %v6520_v55 }
 0x1c5   :  { %v5485_v15 = vpop.f32.mrf.mxu1  ;;  %v1139_v16 = vrot.slane %v6550_v3, 3  ;;  %v6558_v17 = vshll.u32 %v6550_v3, 16  ;;  %v6561_v18 = vshrl.u32 %v6550_v3, 16  ;;  %v5555_v22 = vpop.f32.mrf.mxu0  ;;  %v1054_v23 = vrot.slane %v6550_v3, 1 }
 0x1c6   :  { %v885_v20 = vadd.f32 %v5553_v14, %v780_v12  ;;  %v5486_v21 = vadd.f32 %v5485_v15, %v5484_v4  ;;  %v981_v26 = vsel %vm941_vm11, %v882_v63, %v963_v10  ;;  %v5556_v13 = vadd.f32 %v5555_v22, %v5554_v53 }
 0x1c7   :  { %v5487_v27 = vpop.f32.mrf.mxu1  ;;  %v1140_v28 = vsel %vm109_vm1, %v1138_v60, %v1139_v16  ;;  %v1014_v29 = vrot.slane %v6558_v17, 1  ;;  %v5557_v33 = vpop.f32.mrf.mxu0  ;;  %v1113_v30 = vrot.slane %v6561_v18, 2  ;;  %v1114_v37 = vrot.slane %v6558_v17, 3 }
 0x1c8   :  { %vm942_vm12 = vcmp.gt.f32.partialorder %v885_v20, 0.0  ;;  %v964_v31 = vmul.f32 %v6526_v11, %v885_v20  ;;  %v785_v32 = vadd.f32 %v5486_v21, %v6520_v55  ;;  %1147 = vrot.lane.b32.xlu1 %v1140_v28, %s6309_s18  ;;  %v1073_v38 = vrot.slane %v6561_v18, 1 }
 0x1c9   :  { %v5488_v34 = vpop.f32.mrf.mxu1  ;;  %v1015_v36 = vsel %vm238_vm4, %v1010_v5, %v1014_v29  ;;  %v1074_v39 = vrot.slane %v6558_v17, 2  ;;  %v5558_v44 = vpop.f32.mrf.mxu0  ;;  %v1159_v45 = vrot.slane %v6561_v18, 3  ;;  %v1055_v49 = vsel %vm287_vm3, %v1053_v61, %v1054_v23 }
 0x1ca   :  { %v982_v6 = vsel %vm942_vm12, %v885_v20, %v964_v31  ;;  %v890_v40 = vadd.f32 %v5556_v13, %v785_v32  ;;  %v5489_v42 = vadd.f32 %v5488_v34, %v5487_v27  ;;  %1040 = vrot.lane.b32.xlu0 %v1015_v36, %s6312_s12  ;;  %v6588_v50 = vor.u32 %v1114_v37, %v1113_v30 }
 0x1cb   :  { %v6583_v46 = vpack.c.bf16 %v982_v6, %v981_v26  ;;  %v5490_v47 = vpop.f32.mrf.mxu1  ;;  %v6590_v43 = vor.u32 %v1074_v39, %v1073_v38  ;;  %v5559_v52 = vadd.f32 %v5558_v44, %v5557_v33  ;;  %v5560_v54 = vpop.f32.mrf.mxu0  ;;  %v1160_v56 = vrot.slane %v6558_v17, 4 }
 0x1cc   :  { %v788_v51 = vadd.f32 %v5489_v42, %v6520_v55  ;;  %1062 = vrot.lane.b32.xlu1 %v1055_v49, %s6309_s18  ;;  %v965_v57 = vmul.f32 %v6526_v11, %v890_v40  ;;  %v1116_v59 = vsel %vm1109_vm10, %v1112_v7, %v6588_v50  ;;  %vm943_vm14 = vcmp.gt.f32.partialorder %v890_v40, 0.0 }
 0x1cd   :  { %v5491_v58 = vpop.f32.mrf.mxu1  ;;  %v5561_v62 = vpop.f32.mrf.mxu0  ;;  %v6601_v63 = vor.u32 %v1160_v56, %v1159_v45  ;;  %v1056_v0 = vrot.slane %v6583_v46, 1  ;;  %v1076_v4 = vsel %vm301_vm5, %v1072_v24, %v6590_v43  ;;  %v1158_v5 = vor.u32 %v1157_v25, %v1156_v19 }
 0x1ce   :  { %v893_v60 = vadd.f32 %v5559_v52, %v788_v51  ;;  %v5492_v61 = vadd.f32 %v5491_v58, %v5490_v47  ;;  %1129 = vrot.lane.b32.xlu0 %v1116_v59, %s6312_s12  ;;  %v1141_v7 = vrot.slane %v6583_v46, 3  ;;  %v6613_v10 = vshll.u32 %v6583_v46, 16 }
 0x1cf   :  { %v5493_v1 = vpop.f32.mrf.mxu1  ;;  %v5563_v2 = vpop.f32.mrf.mxu0  ;;  %v1162_v9 = vsel %vm1155_vm13, %v1158_v5, %v6601_v63  ;;  %v6616_v12 = vshrl.u32 %v6583_v46, 16  ;;  %v983_v14 = vsel %vm943_vm14, %v890_v40, %v965_v57  ;;  %v5562_v53 = vadd.f32 %v5561_v62, %v5560_v54 }
 0x1d0   :  { %vm944_vm15 = vcmp.gt.f32.partialorder %v893_v60, 0.0  ;;  %v966_v41 = vmul.f32 %v6526_v11, %v893_v60  ;;  %1091 = vrot.lane.b32.xlu1 %v1076_v4, %s6313_s13  ;;  %v793_v48 = vadd.f32 %v5492_v61, %v6520_v55  ;;  %v1057_v20 = vsel %vm287_vm3, %v1054_v23, %v1056_v0 }
 0x1d1   :  { %v5494_v8 = vpop.f32.mrf.mxu1  ;;  %v5564_v19 = vpop.f32.mrf.mxu0  ;;  %v1142_v25 = vsel %vm109_vm1, %v1139_v16, %v1141_v7  ;;  %v1022_v26 = vrot.slane %v6613_v10, 1  ;;  %v1117_v13 = vrot.slane %v6616_v12, 2  ;;  %v1018_v23 = vor.u32 %v6561_v18, %v1014_v29 }
 0x1d2   :  { %v5495_v15 = vadd.f32 %v5494_v8, %v5493_v1  ;;  %1175 = vrot.lane.b32.xlu0 %v1162_v9, %s6313_s13  ;;  %v984_v21 = vsel %vm944_vm15, %v893_v60, %v966_v41  ;;  %v5565_v28 = vadd.f32 %v5564_v19, %v5563_v2  ;;  %v1118_v32 = vrot.slane %v6613_v10, 3 }
 0x1d3   :  { %v5496_v22 = vpop.f32.mrf.mxu1  ;;  %v6633_v31 = vpop.f32.mrf.mxu0  ;;  %v898_v33 = vadd.f32 %v5562_v53, %v793_v48  ;;  %v1077_v16 = vrot.slane %v6616_v12, 1  ;;  %v1078_v34 = vrot.slane %v6613_v10, 2  ;;  %v1163_v36 = vrot.slane %v6616_v12, 3 }
 0x1d4   :  { %v796_v27 = vadd.f32 %v5495_v15, %v6520_v55  ;;  %1064 = vrot.lane.b32.xlu1 %v1057_v20, %s6309_s18  ;;  %v6643_v37 = vpack.c.bf16 %v984_v21, %v983_v14  ;;  %v6648_v17 = vor.u32 %v1118_v32, %v1117_v13  ;;  %v1023_v29 = vsel %vm238_vm4, %v1018_v23, %v1022_v26 }
 0x1d5   :  { %v5497_v30 = vpop.f32.mrf.mxu1  ;;  %v6645_v39 = vpop.f32.mrf.mxu0  ;;  %v6651_v6 = vor.u32 %v1078_v34, %v1077_v16  ;;  %v1164_v40 = vrot.slane %v6613_v10, 4  ;;  %v967_v44 = vmul.f32 %v6526_v11, %v898_v33  ;;  %vm945_vm2 = vcmp.gt.f32.partialorder %v898_v33, 0.0 }
 0x1d6   :  { %v901_v38 = vadd.f32 %v5565_v28, %v796_v27  ;;  %1149 = vrot.lane.b32.xlu0 %v1142_v25, %s6309_s18  ;;  %v1120_v49 = vsel %vm1109_vm10, %v6588_v50, %v6648_v17  ;;  %v1058_v54 = vrot.slane %v6643_v37, 1  ;;  %v1143_v59 = vrot.slane %v6643_v37, 3 }
 0x1d7   :  { %v5499_v18 = vpop.f32.mrf.mxu1  ;;  %v5569_v42 = vpop.f32.mrf.mxu0  ;;  %v6660_v51 = vor.u32 %v1164_v40, %v1163_v36  ;;  %v1080_v57 = vsel %vm301_vm5, %v6590_v43, %v6651_v6  ;;  %v6670_v50 = vshll.u32 %v6643_v37, 16  ;;  %v985_v24 = vsel %vm945_vm2, %v898_v33, %v967_v44 }
 0x1d8   :  { %1042 = vrot.lane.b32.xlu1 %v1023_v29, %s6312_s12  ;;  %v968_v45 = vmul.f32 %v6526_v11, %v901_v38  ;;  %vm946_vm6 = vcmp.gt.f32.partialorder %v901_v38, 0.0  ;;  %v6676_v1 = vshrl.u32 %v6643_v37, 16  ;;  %v5498_v4 = vadd.f32 %v5497_v30, %v5496_v22 }
 0x1d9   :  { %v5500_v47 = vpop.f32.mrf.mxu1  ;;  %v5570_v52 = vpop.f32.mrf.mxu0  ;;  %v1166_v62 = vsel %vm1155_vm13, %v6601_v63, %v6660_v51  ;;  %v1059_v2 = vsel %vm287_vm3, %v1056_v0, %v1058_v54  ;;  %v1030_v8 = vrot.slane %v6670_v50, 1  ;;  %v1122_v9 = vrot.slane %v6670_v50, 3 }
 0x1da   :  { %1131 = vrot.lane.b32.xlu0 %v1120_v49, %s6312_s12  ;;  %v986_v60 = vsel %vm946_vm6, %v901_v38, %v968_v45  ;;  %v5501_v43 = vadd.f32 %v5500_v47, %v5499_v18  ;;  %v1121_v63 = vrot.slane %v6676_v1, 2  ;;  %v1081_v10 = vrot.slane %v6676_v1, 1 }
 0x1db   :  { %v5502_v56 = vpop.f32.mrf.mxu1  ;;  %v5572_v58 = vpop.f32.mrf.mxu0  ;;  %v6688_v14 = vpack.c.bf16 %v986_v60, %v985_v24  ;;  %v1144_v0 = vsel %vm109_vm1, %v1141_v7, %v1143_v59  ;;  %v1026_v15 = vor.u32 %v6616_v12, %v1022_v26  ;;  %v1082_v21 = vrot.slane %v6670_v50, 2 }
 0x1dc   :  { %1093 = vrot.lane.b32.xlu1 %v1080_v57, %s6313_s13  ;;  %v6697_v20 = vor.u32 %v1122_v9, %v1121_v63  ;;  %v1167_v22 = vrot.slane %v6676_v1, 3  ;;  %v1168_v25 = vrot.slane %v6670_v50, 4  ;;  %v804_v13 = vadd.f32 %v5501_v43, %v6520_v55 }
 0x1dd   :  { %v5503_v61 = vpop.f32.mrf.mxu1  ;;  %v5573_v41 = vpop.f32.mrf.mxu0  ;;  %v801_v7 = vadd.f32 %v5498_v4, %v6520_v55  ;;  %v1031_v26 = vsel %vm238_vm4, %v1026_v15, %v1030_v8  ;;  %v6711_v32 = vor.u32 %v1082_v21, %v1081_v10  ;;  %v5571_v33 = vadd.f32 %v5570_v52, %v5569_v42 }
 0x1de   :  { %v5504_v5 = vadd.f32 %v5503_v61, %v5502_v56  ;;  %1177 = vrot.lane.b32.xlu0 %v1166_v62, %s6313_s13  ;;  %v5574_v30 = vadd.f32 %v5573_v41, %v5572_v58  ;;  %v5568_v36 = vadd.f32 %v6645_v39, %v6633_v31  ;;  %v1124_v18 = vsel %vm1109_vm10, %v6648_v17, %v6697_v20 }
 0x1df   :  { %v5505_v48 = vpop.f32.mrf.mxu1  ;;  %v5575_v53 = vpop.f32.mrf.mxu0  ;;  %v1169_v29 = vor.u32 %v1168_v25, %v1167_v22  ;;  %v6721_v40 = vshll.u32 %v6688_v14, 16  ;;  %v909_v44 = vadd.f32 %v5571_v33, %v804_v13  ;;  %v1060_v47 = vrot.slane %v6688_v14, 1 }
 0x1e0   :  { %1066 = vrot.lane.b32.xlu1 %v1059_v2, %s6309_s18  ;;  %v809_v27 = vadd.f32 %v5504_v5, %v6520_v55  ;;  %v1084_v31 = vsel %vm301_vm5, %v6651_v6, %v6711_v32  ;;  %v6731_v39 = vshrl.u32 %v6688_v14, 16  ;;  %v906_v17 = vadd.f32 %v5568_v36, %v801_v7 }
 0x1e1   :  { %v5506_v19 = vpop.f32.mrf.mxu1  ;;  %v5576_v23 = vpop.f32.mrf.mxu0  ;;  %v1145_v56 = vrot.slane %v6688_v14, 3  ;;  %v1170_v58 = vsel %vm1155_vm13, %v6660_v51, %v1169_v29  ;;  %v1126_v60 = vrot.slane %v6721_v40, 3  ;;  %vm948_vm8 = vcmp.gt.f32.partialorder %v909_v44, 0.0 }
 0x1e2   :  { %v5507_v28 = vadd.f32 %v5506_v19, %v5505_v48  ;;  %1151 = vrot.lane.b32.xlu0 %v1144_v0, %s6309_s18  ;;  %v5577_v34 = vadd.f32 %v5576_v23, %v5575_v53  ;;  %v914_v42 = vadd.f32 %v5574_v30, %v809_v27  ;;  %v1125_v24 = vrot.slane %v6731_v39, 2 }
 0x1e3   :  { %v6706_v12 = vpop.f32.mrf.mxu1  ;;  %v6725_v49 = vpop.f32.mrf.mxu0  ;;  %v970_v6 = vmul.f32 %v6526_v11, %v909_v44  ;;  %v1061_v62 = vsel %vm287_vm3, %v1058_v54, %v1060_v47  ;;  %v1038_v51 = vrot.slane %v6721_v40, 1  ;;  %v1087_v43 = vrot.slane %v6731_v39, 1 }
 0x1e4   :  { %v812_v16 = vadd.f32 %v5507_v28, %v6520_v55  ;;  %1044 = vrot.lane.b32.xlu1 %v1031_v26, %s6312_s12  ;;  %v971_v61 = vmul.f32 %v6526_v11, %v914_v42  ;;  %vm949_vm9 = vcmp.gt.f32.partialorder %v914_v42, 0.0  ;;  %v1088_v5 = vrot.slane %v6721_v40, 2 }
 0x1e5   :  { %v5509_v38 = vpop.f32.mrf.mxu1  ;;  %v5579_v4 = vpop.f32.mrf.mxu0  ;;  %vm947_vm11 = vcmp.gt.f32.partialorder %v906_v17, 0.0  ;;  %v969_v41 = vmul.f32 %v6526_v11, %v906_v17  ;;  %v1146_v54 = vsel %vm109_vm1, %v1143_v59, %v1145_v56  ;;  %v1034_v63 = vor.u32 %v6676_v1, %v1030_v8 }
 0x1e6   :  { %v917_v45 = vadd.f32 %v5577_v34, %v812_v16  ;;  %1133 = vrot.lane.b32.xlu0 %v1124_v18, %s6312_s12  ;;  %v6762_v9 = vor.u32 %v1126_v60, %v1125_v24  ;;  %v1171_v10 = vrot.slane %v6731_v39, 3  ;;  %v1172_v53 = vrot.slane %v6721_v40, 4 }
 0x1e7   :  { %v5511_v57 = vpop.f32.mrf.mxu1  ;;  %v988_v0 = vsel %vm948_vm8, %v909_v44, %v970_v6  ;;  %v989_v15 = vsel %vm949_vm9, %v914_v42, %v971_v61  ;;  %v5581_v59 = vpop.f32.mrf.mxu0  ;;  %v1039_v50 = vsel %vm238_vm4, %v1034_v63, %v1038_v51  ;;  %v6774_v1 = vor.u32 %v1088_v5, %v1087_v43 }
 0x1e8   :  { %v972_v52 = vmul.f32 %v6526_v11, %v917_v45  ;;  %1095 = vrot.lane.b32.xlu1 %v1084_v31, %s6313_s13  ;;  %vm950_vm7 = vcmp.gt.f32.partialorder %v917_v45, 0.0  ;;  %v987_v8 = vsel %vm947_vm11, %v906_v17, %v969_v41  ;;  %v1128_v13 = vsel %vm1109_vm10, %v6697_v20, %v6762_v9 }
 0x1e9   :  { %v5512_v48 = vpop.f32.mrf.mxu1  ;;  %v6778_v22 = vpack.c.bf16 %v988_v0, %v987_v8  ;;  %v1173_v27 = vor.u32 %v1172_v53, %v1171_v10  ;;  %v5510_v28 = vadd.f32 %v5509_v38, %v6706_v12  ;;  %v5582_v23 = vpop.f32.mrf.mxu0  ;;  %v1090_v7 = vsel %vm301_vm5, %v6711_v32, %v6774_v1 }
 0x1ea   :  { %1179 = vrot.lane.b32.xlu0 %v1170_v58, %s6313_s13  ;;  %v990_v2 = vsel %vm950_vm7, %v917_v45, %v972_v52  ;;  %v5513_v21 = vadd.f32 %v5512_v48, %v5511_v57  ;;  %v5583_v36 = vadd.f32 %v5582_v23, %v5581_v59  ;;  %v5580_v42 = vadd.f32 %v5579_v4, %v6725_v49 }
 0x1eb   :  { %v6769_v19 = vpack.c.bf16 %v990_v2, %v989_v15  ;;  %v6780_v25 = vpop.f32.mrf.mxu1  ;;  %v1174_v20 = vsel %vm1155_vm13, %v1169_v29, %v1173_v27  ;;  %v1371_v16 = vrot.slane %v6778_v22, 3  ;;  %v6798_v12 = vshll.u32 %v6778_v22, 16  ;;  %v6802_v32 = vpop.f32.mrf.mxu0 }
 0x1ec   :  { %1068 = vrot.lane.b32.xlu1 %v1061_v62, %s6309_s18  ;;  %v820_v33 = vadd.f32 %v5513_v21, %v6520_v55  ;;  %v817_v34 = vadd.f32 %v5510_v28, %v6520_v55  ;;  %v1293_v52 = vrot.slane %v6778_v22, 1  ;;  %v1252_v58 = vshrl.u32 %v6778_v22, 16 }
 0x1ed   :  { %v1373_v26 = vrot.slane %v6769_v19, 3  ;;  %v5515_v30 = vpop.f32.mrf.mxu1  ;;  %v1295_v18 = vrot.slane %v6769_v19, 1  ;;  %v6809_v29 = vshll.u32 %v6769_v19, 16  ;;  %v6812_v44 = vshrl.u32 %v6769_v19, 16  ;;  %v5585_v60 = vpop.f32.mrf.mxu0 }
 0x1ee   :  { %1153 = vrot.lane.b32.xlu0 %v1146_v54, %s6309_s18  ;;  %v925_v45 = vadd.f32 %v5583_v36, %v820_v33  ;;  %v1372_v17 = vsel %vm109_vm1, %v1145_v56, %v1371_v16  ;;  %v1250_v57 = vrot.slane %v6798_v12, 1  ;;  %v922_v24 = vadd.f32 %v5580_v42, %v817_v34 }
 0x1ef   :  { %v1374_v38 = vsel %vm109_vm1, %v1371_v16, %v1373_v26  ;;  %v5517_v31 = vpop.f32.mrf.mxu1  ;;  %v1296_v49 = vsel %vm287_vm3, %v1293_v52, %v1295_v18  ;;  %v1258_v6 = vrot.slane %v6809_v29, 1  ;;  %v1349_v61 = vrot.slane %v6812_v44, 2  ;;  %v5587_v63 = vpop.f32.mrf.mxu0 }
 0x1f0   :  { %1046 = vrot.lane.b32.xlu1 %v1039_v50, %s6312_s12  ;;  %v1350_v56 = vrot.slane %v6809_v29, 3  ;;  %vm952_vm12 = vcmp.gt.f32.partialorder %v925_v45, 0.0  ;;  %v974_v62 = vmul.f32 %v6526_v11, %v925_v45  ;;  %v1294_v43 = vsel %vm287_vm3, %v1060_v47, %v1293_v52 }
 0x1f1   :  { %v5518_v4 = vpop.f32.mrf.mxu1  ;;  %v1254_v5 = vor.u32 %v1252_v58, %v1250_v57  ;;  %v1345_v41 = vrot.slane %v1252_v58, 2  ;;  %v1346_v2 = vrot.slane %v6798_v12, 3  ;;  %vm951_vm14 = vcmp.gt.f32.partialorder %v922_v24, 0.0  ;;  %v5588_v28 = vpop.f32.mrf.mxu0 }
 0x1f2   :  { %1135 = vrot.lane.b32.xlu0 %v1128_v13, %s6312_s12  ;;  %v973_v54 = vmul.f32 %v6526_v11, %v922_v24  ;;  %v1246_v48 = vor.u32 %v6731_v39, %v1038_v51  ;;  %v6843_v0 = vor.u32 %v1350_v56, %v1349_v61  ;;  %v1393_v47 = vrot.slane %v6812_v44, 3 }
 0x1f3   :  { %v1259_v53 = vsel %vm238_vm4, %v1254_v5, %v1258_v6  ;;  %v1394_v15 = vrot.slane %v6809_v29, 4  ;;  %v992_v59 = vsel %vm952_vm12, %v925_v45, %v974_v62  ;;  %v5519_v50 = vadd.f32 %v5518_v4, %v5517_v31 }
 0x1f4   :  { %1097 = vrot.lane.b32.xlu1 %v1090_v7, %s6313_s13  ;;  %v1251_v40 = vsel %vm238_vm4, %v1246_v48, %v1250_v57  ;;  %v1347_v8 = vor.u32 %v1346_v2, %v1345_v41  ;;  %v1389_v51 = vrot.slane %v1252_v58, 3  ;;  %v1390_v21 = vrot.slane %v6798_v12, 4 }
 0x1f5   :  { %v991_v13 = vsel %vm951_vm14, %v922_v24, %v973_v54  ;;  %v5516_v27 = vadd.f32 %v5515_v30, %v6780_v25  ;;  %v1395_v7 = vor.u32 %v1394_v15, %v1393_v47  ;;  %v1315_v33 = vrot.slane %v6812_v44, 1 }
 0x1f6   :  { %1181 = vrot.lane.b32.xlu0 %v1174_v20, %s6313_s13  ;;  %v1352_v23 = vsel %vm1109_vm10, %v1347_v8, %v6843_v0  ;;  %v1316_v20 = vrot.slane %v6809_v29, 2  ;;  %v6858_v16 = vpack.c.bf16 %v992_v59, %v991_v13  ;;  %v828_v34 = vadd.f32 %v5519_v50, %v6520_v55 }
 0x1f7   :  { %v1348_v25 = vsel %vm1109_vm10, %v6762_v9, %v1347_v8  ;;  %v1391_v30 = vor.u32 %v1390_v21, %v1389_v51  ;;  %v1311_v36 = vrot.slane %v1252_v58, 1  ;;  %v825_v42 = vadd.f32 %v5516_v27, %v6520_v55 }
 0x1f8   :  { %1381 = vrot.lane.b32.xlu1 %v1374_v38, %s6309_s18  ;;  %v1312_v38 = vrot.slane %v6798_v12, 2  ;;  %v5589_v45 = vadd.f32 %v5588_v28, %v5587_v63  ;;  %v5586_v52 = vadd.f32 %v5585_v60, %v6802_v32  ;;  %v1264_v12 = vshll.u32 %v6858_v16, 16 }
 0x1f9   :  { %v1396_v31 = vsel %vm1155_vm13, %v1391_v30, %v1395_v7  ;;  %v1392_v9 = vsel %vm1155_vm13, %v1171_v10, %v1391_v30  ;;  %v1268_v55 = vshrl.u32 %v6858_v16, 16  ;;  %v1297_v61 = vrot.slane %v6858_v16, 1 }
 0x1fa   :  { %1379 = vrot.lane.b32.xlu0 %v1372_v17, %s6309_s18  ;;  %v1317_v17 = vor.u32 %v1316_v20, %v1315_v33  ;;  %v933_v57 = vadd.f32 %v5589_v45, %v828_v34  ;;  %v1313_v58 = vor.u32 %v1312_v38, %v1311_v36  ;;  %v930_v24 = vadd.f32 %v5586_v52, %v825_v42 }
 0x1fb   :  { %v1375_v10 = vrot.slane %v6858_v16, 3  ;;  %v1353_v60 = vrot.slane %v1268_v55, 2  ;;  %v1354_v56 = vrot.slane %v1264_v12, 3  ;;  %v1298_v4 = vsel %vm287_vm3, %v1295_v18, %v1297_v61 }
 0x1fc   :  { %1303 = vrot.lane.b32.xlu1 %v1296_v49, %s6309_s18  ;;  %v1318_v49 = vsel %vm301_vm5, %v1313_v58, %v1317_v17  ;;  %vm954_vm15 = vcmp.gt.f32.partialorder %v933_v57, 0.0  ;;  %v976_v32 = vmul.f32 %v6526_v11, %v933_v57  ;;  %v1314_v39 = vsel %vm301_vm5, %v6774_v1, %v1313_v58 }
 0x1fd   :  { %vm953_vm2 = vcmp.gt.f32.partialorder %v930_v24, 0.0  ;;  %v975_v62 = vmul.f32 %v6526_v11, %v930_v24  ;;  %v1319_v5 = vrot.slane %v1268_v55, 1  ;;  %v1320_v41 = vrot.slane %v1264_v12, 2 }
 0x1fe   :  { %1301 = vrot.lane.b32.xlu0 %v1294_v43, %s6309_s18  ;;  %v1266_v43 = vrot.slane %v1264_v12, 1  ;;  %v994_v2 = vsel %vm954_vm15, %v933_v57, %v976_v32  ;;  %v1262_v1 = vor.u32 %v6812_v44, %v1258_v6  ;;  %v1376_v11 = vsel %vm109_vm1, %v1373_v26, %v1375_v10 }
 0x1ff   :  { %v1355_v54 = vor.u32 %v1354_v56, %v1353_v60  ;;  %v1397_v48 = vrot.slane %v1268_v55, 3  ;;  %v1398_v63 = vrot.slane %v1264_v12, 4  ;;  %v1321_v15 = vor.u32 %v1320_v41, %v1319_v5 }
 0x200   :  { %1281 = vrot.lane.b32.xlu1 %v1259_v53, %s6312_s12  ;;  %v993_v53 = vsel %vm953_vm2, %v930_v24, %v975_v62  ;;  %v1267_v47 = vsel %vm238_vm4, %v1262_v1, %v1266_v43  ;;  %v1270_v28 = vor.u32 %v1268_v55, %v1266_v43  ;;  %v1101_v57 = vrot.slane %v6550_v3, 2 }
 0x201   :  { %v6896_v18 = vpack.c.bf16 %v994_v2, %v993_v53  ;;  %v1356_v29 = vsel %vm1109_vm10, %v6843_v0, %v1355_v54  ;;  %v1399_v44 = vor.u32 %v1398_v63, %v1397_v48  ;;  %v1322_v26 = vsel %vm301_vm5, %v1317_v17, %v1321_v15 }
 0x202   :  { %1279 = vrot.lane.b32.xlu0 %v1251_v40, %s6312_s12  ;;  %vm1099_vm6 = vcmask 1045504   ;;  %v1100_v58 = vrot.slane %v6532_v35, 2  ;;  %vm1183_vm7 = vcmask 261120   ;;  %vm1192_vm8 = vcmask 523264  }
 0x203   :  { %v1299_v6 = vrot.slane %v6896_v18, 1  ;;  %v1272_v59 = vshll.u32 %v6896_v18, 16  ;;  %v1276_v50 = vshrl.u32 %v6896_v18, 16  ;;  %v1400_v40 = vsel %vm1155_vm13, %v1395_v7, %v1399_v44 }
 0x204   :  { %1363 = vrot.lane.b32.xlu1 %v1352_v23, %s6312_s12  ;;  %v1377_v8 = vrot.slane %v6896_v18, 3  ;;  %v1102_v12 = vsel %vm1099_vm6, %v1100_v58, %v1101_v57  ;;  %vm1201_vm9 = vcmask 785408   ;;  %v1103_v43 = vrot.slane %v6583_v46, 2 }
 0x205   :  { %v1300_v0 = vsel %vm287_vm3, %v1297_v61, %v1299_v6  ;;  %v1274_v51 = vrot.slane %v1272_v59, 1  ;;  %v1357_v21 = vrot.slane %v1276_v50, 2  ;;  %v1358_v13 = vrot.slane %v1272_v59, 3 }
 0x206   :  { %1361 = vrot.lane.b32.xlu0 %v1348_v25, %s6312_s12  ;;  %v1378_v27 = vsel %vm109_vm1, %v1375_v10, %v1377_v8  ;;  %v1323_v33 = vrot.slane %v1276_v50, 1  ;;  %v1324_v7 = vrot.slane %v1272_v59, 2  ;;  %v1401_v34 = vrot.slane %v1276_v50, 3 }
 0x207   :  { %v1275_v23 = vsel %vm238_vm4, %v1270_v28, %v1274_v51  ;;  %v1359_v20 = vor.u32 %v1358_v13, %v1357_v21  ;;  %v1402_v25 = vrot.slane %v1272_v59, 4  ;;  %v1278_v30 = vor.u32 %v1276_v50, %v1274_v51 }
 0x208   :  { %1407 = vrot.lane.b32.xlu1 %v1396_v31, %s6313_s13  ;;  %v1325_v36 = vor.u32 %v1324_v7, %v1323_v33  ;;  %v1339_v58 = vrot.slane %v6769_v19, 2  ;;  %vm1938_vm2 = vsmask.f32 3328 }
 0x209   :  { %v1360_v38 = vsel %vm1109_vm10, %v1355_v54, %v1359_v20  ;;  %v1403_v42 = vor.u32 %v1402_v25, %v1401_v34 }
 0x20a   :  { %1405 = vrot.lane.b32.xlu0 %v1392_v9, %s6313_s13  ;;  %v1326_v45 = vsel %vm301_vm5, %v1321_v15, %v1325_v36 }
 0x20b   :  { %v1404_v31 = vsel %vm1155_vm13, %v1399_v44, %v1403_v42  ;;  %v1105_v44 = vrot.slane %v6643_v37, 2 }
 0x20c   :  { %1329 = vrot.lane.b32.xlu1 %v1318_v49, %s6313_s13 }
 0x20e   :  { %1327 = vrot.lane.b32.xlu0 %v1314_v39, %s6313_s13 }
 0x210   :  { %1305 = vrot.lane.b32.xlu1 %v1298_v4, %s6309_s18 }
 0x212   :  { %1383 = vrot.lane.b32.xlu0 %v1376_v11, %s6309_s18 }
 0x214   :  { %1283 = vrot.lane.b32.xlu1 %v1267_v47, %s6312_s12 }
 0x216   :  { %1365 = vrot.lane.b32.xlu0 %v1356_v29, %s6312_s12 }
 0x218   :  { %1331 = vrot.lane.b32.xlu1 %v1322_v26, %s6313_s13 }
 0x21a   :  { %1409 = vrot.lane.b32.xlu0 %v1400_v40, %s6313_s13 }
 0x21c   :  { %1307 = vrot.lane.b32.xlu1 %v1300_v0, %s6309_s18 }
 0x21e   :  { %1385 = vrot.lane.b32.xlu0 %v1378_v27, %s6309_s18 }
 0x220   :  { %1285 = vrot.lane.b32.xlu1 %v1275_v23, %s6312_s12  ;;  %v1107_v23 = vrot.slane %v6688_v14, 2 }
 0x222   :  { %1369 = vrot.lane.b32.xlu0 %v1359_v20, %s6312_s12  ;;  %v1108_v7 = vsel %vm1099_vm6, %v1105_v44, %v1107_v23 }
 0x224   :  { %1287 = vrot.lane.b32.xlu1 %v1278_v30, %s6312_s12 }
 0x226   :  { %1367 = vrot.lane.b32.xlu0 %v1360_v38, %s6312_s12 }
 0x228   :  { %1333 = vrot.lane.b32.xlu1 %v1326_v45, %s6313_s13 }
 0x22a   :  { %1411 = vrot.lane.b32.xlu0 %v1404_v31, %s6313_s13 }
 0x22c   :  { %1309 = vrot.lane.b32.xlu1 %v1299_v6, %s6309_s18  ;;  %v1106_v6 = vsel %vm1099_vm6, %v1103_v43, %v1105_v44 }
 0x22e   :  { %1387 = vrot.lane.b32.xlu0 %v1377_v8, %s6309_s18 }
 0x230   :  { %1335 = vrot.lane.b32.xlu1 %v1325_v36, %s6313_s13 }
 0x232   :  { %1413 = vrot.lane.b32.xlu0 %v1403_v42, %s6313_s13 }
 0x23a   :  { %v1148_v17 = vpop.permute.xlu1 %1147 }
 0x23c   :  { %v1041_v52 = vpop.permute.xlu0 %1040 }
 0x23d   :  { %v1185_v49 = vsel %vm1183_vm7, %v6532_v35, %v1041_v52  ;;  %v1104_v35 = vsel %vm1099_vm6, %v1101_v57, %v1103_v43 }
 0x23e   :  { %v1063_v9 = vpop.permute.xlu1 %1062 }
 0x23f   :  { %v1194_v10 = vsel %vm1192_vm8, %v1185_v49, %v1063_v9 }
 0x240   :  { %v1130_v55 = vpop.permute.xlu0 %1129 }
 0x241   :  { %v1216_v24 = vsel %vm1183_vm7, %v1102_v12, %v1130_v55  ;;  %v1337_v12 = vrot.slane %v6778_v22, 2 }
 0x242   :  { %v1092_v61 = vpop.permute.xlu1 %1091  ;;  %v1227_v39 = vsel %vm1192_vm8, %v1216_v24, %v1148_v17 }
 0x243   :  { %v1203_v56 = vsel %vm1201_vm9, %v1194_v10, %v1092_v61  ;;  %v1340_v55 = vsel %vm1099_vm6, %v1337_v12, %v1339_v58  ;;  %v1338_v61 = vsel %vm1099_vm6, %v1107_v23, %v1337_v12 }
 0x244   :  { %v1176_v32 = vpop.permute.xlu0 %1175 }
 0x245   :  { %v1235_v60 = vsel %vm1201_vm9, %v1227_v39, %v1176_v32 }
 0x246   :  { %v1065_v62 = vpop.permute.xlu1 %1064  ;;  %1681 = vmatprep.mubr.bf16.mxu1 %v1235_v60 }
 0x247   :  { %1682 = vmatmul.mubr.bf16.vlgmr.msra.gmra.mxu1 %v1203_v56 }
 0x248   :  { %v1150_v4 = vpop.permute.xlu0 %1149 }
 0x24a   :  { %v1043_v5 = vpop.permute.xlu1 %1042 }
 0x24b   :  { %v1187_v1 = vsel %vm1183_vm7, %v6550_v3, %v1043_v5 }
 0x24c   :  { %v1132_v41 = vpop.permute.xlu0 %1131  ;;  %v1196_v53 = vsel %vm1192_vm8, %v1187_v1, %v1065_v62 }
 0x24d   :  { %v1219_v2 = vsel %vm1183_vm7, %v1104_v35, %v1132_v41 }
 0x24e   :  { %v1094_v11 = vpop.permute.xlu1 %1093  ;;  %v1229_v48 = vsel %vm1192_vm8, %v1219_v2, %v1150_v4 }
 0x24f   :  { %v1206_v15 = vsel %vm1201_vm9, %v1196_v53, %v1094_v11 }
 0x250   :  { %v1178_v54 = vpop.permute.xlu0 %1177 }
 0x251   :  { %v1238_v63 = vsel %vm1201_vm9, %v1229_v48, %v1178_v54 }
 0x252   :  { %v1067_v47 = vpop.permute.xlu1 %1066  ;;  %1689 = vmatprep.mubr.bf16.mxu1 %v1238_v63 }
 0x253   :  { %1690 = vmatmul.mubr.bf16.gmra.mxu1 %v1206_v15 }
 0x254   :  { %v1152_v29 = vpop.permute.xlu0 %1151 }
 0x256   :  { %v1045_v26 = vpop.permute.xlu1 %1044 }
 0x257   :  { %v1189_v50 = vsel %vm1183_vm7, %v6583_v46, %v1045_v26  ;;  %v1341_v26 = vrot.slane %v6858_v16, 2 }
 0x258   :  { %v1134_v3 = vpop.permute.xlu0 %1133  ;;  %v1198_v21 = vsel %vm1192_vm8, %v1189_v50, %v1067_v47 }
 0x259   :  { %v1222_v59 = vsel %vm1183_vm7, %v1106_v6, %v1134_v3 }
 0x25a   :  { %v1096_v40 = vpop.permute.xlu1 %1095  ;;  %v1231_v0 = vsel %vm1192_vm8, %v1222_v59, %v1152_v29  ;;  %v1342_v59 = vsel %vm1099_vm6, %v1339_v58, %v1341_v26 }
 0x25b   :  { %v1209_v27 = vsel %vm1201_vm9, %v1198_v21, %v1096_v40 }
 0x25c   :  { %v1180_v8 = vpop.permute.xlu0 %1179 }
 0x25d   :  { %v1241_v51 = vsel %vm1201_vm9, %v1231_v0, %v1180_v8 }
 0x25e   :  { %v1069_v13 = vpop.permute.xlu1 %1068  ;;  %1697 = vmatprep.mubr.bf16.mxu1 %v1241_v51 }
 0x25f   :  { %1698 = vmatmul.mubr.bf16.gmra.mxu1 %v1209_v27 }
 0x260   :  { %v1154_v28 = vpop.permute.xlu0 %1153 }
 0x262   :  { %v1047_v33 = vpop.permute.xlu1 %1046 }
 0x263   :  { %v1191_v34 = vsel %vm1183_vm7, %v6643_v37, %v1047_v33 }
 0x264   :  { %v1136_v46 = vpop.permute.xlu0 %1135  ;;  %v1200_v42 = vsel %vm1192_vm8, %v1191_v34, %v1069_v13  ;;  %v1343_v34 = vrot.slane %v6896_v18, 2 }
 0x265   :  { %v1225_v20 = vsel %vm1183_vm7, %v1108_v7, %v1136_v46 }
 0x266   :  { %v1098_v25 = vpop.permute.xlu1 %1097  ;;  %v1233_v36 = vsel %vm1192_vm8, %v1225_v20, %v1154_v28 }
 0x267   :  { %v1212_v31 = vsel %vm1201_vm9, %v1200_v42, %v1098_v25 }
 0x268   :  { %v1182_v30 = vpop.permute.xlu0 %1181 }
 0x269   :  { %v1244_v38 = vsel %vm1201_vm9, %v1233_v36, %v1182_v30 }
 0x26a   :  { %1705 = vmatprep.mubr.bf16.mxu1 %v1244_v38  ;;  %v1382_v45 = vpop.permute.xlu1 %1381  ;;  %v1344_v38 = vsel %vm1099_vm6, %v1341_v26, %v1343_v34  ;;  %v7026_v26 = vld [vmem:[%s7951_s3 + $0xb] ss:$0 sm:$0xff] }
 0x26b   :  { %1706 = vmatmul.mubr.bf16.gmra.mxu1 %v1212_v31 }
 0x26c   :  { %v1380_v17 = vpop.permute.xlu0 %1379 }
 0x26e   :  { %v1304_v52 = vpop.permute.xlu1 %1303 }
 0x270   :  { %v1302_v57 = vpop.permute.xlu0 %1301 }
 0x272   :  { %v1282_v9 = vpop.permute.xlu1 %1281 }
 0x273   :  { %v1418_v56 = vsel %vm1183_vm7, %v6778_v22, %v1282_v9 }
 0x274   :  { %v1280_v37 = vpop.permute.xlu0 %1279  ;;  %v1428_v1 = vsel %vm1192_vm8, %v1418_v56, %v1304_v52 }
 0x275   :  { %v1416_v5 = vsel %vm1183_vm7, %v6688_v14, %v1280_v37 }
 0x276   :  { %v1364_v24 = vpop.permute.xlu1 %1363  ;;  %v1426_v48 = vsel %vm1192_vm8, %v1416_v5, %v1302_v57 }
 0x277   :  { %v1450_v49 = vsel %vm1183_vm7, %v1340_v55, %v1364_v24 }
 0x278   :  { %v1362_v32 = vpop.permute.xlu0 %1361  ;;  %v1463_v10 = vsel %vm1192_vm8, %v1450_v49, %v1382_v45 }
 0x279   :  { %v1447_v39 = vsel %vm1183_vm7, %v1338_v61, %v1362_v32 }
 0x27a   :  { %v1408_v60 = vpop.permute.xlu1 %1407  ;;  %v1461_v4 = vsel %vm1192_vm8, %v1447_v39, %v1380_v17 }
 0x27b   :  { %v1473_v62 = vsel %vm1201_vm9, %v1463_v10, %v1408_v60 }
 0x27c   :  { %v1406_v43 = vpop.permute.xlu0 %1405  ;;  %v1494_v41 = vrot.slane %v1473_v62, 4 }
 0x27d   :  { %v1471_v35 = vsel %vm1201_vm9, %v1461_v4, %v1406_v43 }
 0x27e   :  { %v1493_v2 = vrot.slane %v1471_v35, 4  ;;  %v1330_v11 = vpop.permute.xlu1 %1329 }
 0x27f   :  { %v1438_v54 = vsel %vm1201_vm9, %v1428_v1, %v1330_v11  ;;  %v6136_v1 = vld [vmem:[#allocation2 + $0x220] sm:$0xff]  }
 0x280   :  { %v1328_v22 = vpop.permute.xlu0 %1327  ;;  %v1495_v63 = vsel %vm108_vm0, %v1493_v2, %v1494_v41  ;;  %v1491_v47 = vrot.slane %v1438_v54, 4  ;;  %v6135_v2 = vld [vmem:[#allocation2 + $0x1e8] sm:$0xff]   ;;  %v6137_v11 = vld [vmem:[#allocation2 + $0x1e0] sm:$0xff]   ;;  %v6138_v54 = vld [vmem:[#allocation2 + $0x218] sm:$0xff]  }
 0x281   :  { %v1436_v53 = vsel %vm1201_vm9, %v1426_v48, %v1328_v22  ;;  %1713 = vmatprep.mubr.bf16.mxu1 %v1495_v63  ;;  %v6139_v22 = vld [vmem:[#allocation2 + $0x1d8] sm:$0xff]   ;;  %v7020_v63 = vld [vmem:[%s7951_s3 + $0x1] ss:$0 sm:$0xff] }
 0x282   :  { %v1490_v15 = vrot.slane %v1436_v53, 4  ;;  %v1306_v14 = vpop.permute.xlu1 %1305 }
 0x284   :  { %v1384_v29 = vpop.permute.xlu0 %1383  ;;  %v1492_v44 = vsel %vm108_vm0, %v1490_v15, %v1491_v47 }
 0x285   :  { %1714 = vmatmul.mubr.bf16.gmra.mxu1 %v1492_v44 }
 0x286   :  { %v1284_v6 = vpop.permute.xlu1 %1283 }
 0x287   :  { %v1420_v3 = vsel %vm1183_vm7, %v6769_v19, %v1284_v6 }
 0x288   :  { %v1366_v50 = vpop.permute.xlu0 %1365  ;;  %v1430_v8 = vsel %vm1192_vm8, %v1420_v3, %v1306_v14  ;;  %v6142_v3 = vld [vmem:[#allocation2 + $0x208] sm:$0xff]  }
 0x289   :  { %v1453_v40 = vsel %vm1183_vm7, %v1342_v59, %v1366_v50  ;;  %v6143_v50 = vld [vmem:[#allocation2 + $0x1c8] sm:$0xff]  }
 0x28a   :  { %v1332_v0 = vpop.permute.xlu1 %1331  ;;  %v1465_v21 = vsel %vm1192_vm8, %v1453_v40, %v1384_v29  ;;  %v6141_v29 = vld [vmem:[#allocation2 + $0x1d0] sm:$0xff]  }
 0x28b   :  { %v1440_v51 = vsel %vm1201_vm9, %v1430_v8, %v1332_v0  ;;  %v6144_v0 = vld [vmem:[#allocation2 + $0x200] sm:$0xff]  }
 0x28c   :  { %v1410_v13 = vpop.permute.xlu0 %1409  ;;  %v1496_v27 = vrot.slane %v1440_v51, 4 }
 0x28d   :  { %v1475_v28 = vsel %vm1201_vm9, %v1465_v21, %v1410_v13  ;;  %v6145_v13 = vld [vmem:[#allocation2 + $0x1c0] sm:$0xff]  }
 0x28e   :  { %v1498_v23 = vrot.slane %v1475_v28, 4  ;;  %v1308_v33 = vpop.permute.xlu1 %1307  ;;  %v1497_v46 = vsel %vm108_vm0, %v1491_v47, %v1496_v27  ;;  %v6140_v47 = vld [vmem:[#allocation2 + $0x210] sm:$0xff]  }
 0x290   :  { %v1386_v7 = vpop.permute.xlu0 %1385  ;;  %v1499_v19 = vsel %vm108_vm0, %v1494_v41, %v1498_v23  ;;  %v6134_v41 = vld [vmem:[#allocation2 + $0x228] sm:$0xff]  }
 0x291   :  { %1721 = vmatprep.mubr.bf16.mxu1 %v1499_v19  ;;  %5654 = vmatprep.subr.bf16.mxu0 %v6134_v41 }
 0x292   :  { %1722 = vmatmul.mubr.bf16.gmra.mxu1 %v1497_v46  ;;  %v1286_v20 = vpop.permute.xlu1 %1285  ;;  %5655 = vmatpush3.bf16.msra.mxu0 %v6135_v2 }
 0x293   :  { %v1422_v36 = vsel %vm1183_vm7, %v6858_v16, %v1286_v20  ;;  %5656 = vmatprep.subr.bf16.mxu0 %v6136_v1 }
 0x294   :  { %v1370_v25 = vpop.permute.xlu0 %1369  ;;  %v1432_v31 = vsel %vm1192_vm8, %v1422_v36, %v1308_v33 }
 0x295   :  { %v1459_v10 = vsel %vm1183_vm7, %v1343_v34, %v1370_v25  ;;  %v6147_v25 = vld [vmem:[#allocation2 + $0x1b8] sm:$0xff]  }
 0x296   :  { %v1288_v30 = vpop.permute.xlu1 %1287  ;;  %5657 = vmatpush3.bf16.msra.mxu0 %v6137_v11 }
 0x297   :  { %v1424_v49 = vsel %vm1183_vm7, %v6896_v18, %v1288_v30  ;;  %5658 = vmatprep.subr.bf16.mxu0 %v6138_v54 }
 0x298   :  { %v1368_v42 = vpop.permute.xlu0 %1367 }
 0x299   :  { %v1456_v45 = vsel %vm1183_vm7, %v1344_v38, %v1368_v42 }
 0x29a   :  { %v1334_v17 = vpop.permute.xlu1 %1333  ;;  %v1467_v57 = vsel %vm1192_vm8, %v1456_v45, %v1386_v7  ;;  %5659 = vmatpush3.bf16.msra.mxu0 %v6139_v22  ;;  %v6146_v7 = vld [vmem:[#allocation2 + $0x1f8] sm:$0xff]  }
 0x29b   :  { %v1442_v52 = vsel %vm1201_vm9, %v1432_v31, %v1334_v17  ;;  %5660 = vmatprep.subr.bf16.mxu0 %v6140_v47 }
 0x29c   :  { %v1412_v9 = vpop.permute.xlu0 %1411  ;;  %v1500_v58 = vrot.slane %v1442_v52, 4  ;;  %v6148_v52 = vld [vmem:[#allocation2 + $0x1f0] sm:$0xff]  }
 0x29d   :  { %v1477_v37 = vsel %vm1201_vm9, %v1467_v57, %v1412_v9  ;;  %v6149_v57 = vld [vmem:[#allocation2 + $0x1b0] sm:$0xff]  }
 0x29e   :  { %v1502_v12 = vrot.slane %v1477_v37, 4  ;;  %v1310_v55 = vpop.permute.xlu1 %1309  ;;  %v1501_v61 = vsel %vm108_vm0, %v1496_v27, %v1500_v58  ;;  %5661 = vmatpush3.bf16.msra.mxu0 %v6141_v29 }
 0x29f   :  { %v1434_v32 = vsel %vm1192_vm8, %v1424_v49, %v1310_v55  ;;  %5662 = vmatprep.subr.bf16.mxu0 %v6142_v3 }
 0x2a0   :  { %v1388_v24 = vpop.permute.xlu0 %1387  ;;  %v1503_v16 = vsel %vm108_vm0, %v1498_v23, %v1502_v12 }
 0x2a1   :  { %1729 = vmatprep.mubr.bf16.mxu1 %v1503_v16  ;;  %v1469_v56 = vsel %vm1192_vm8, %v1459_v10, %v1388_v24 }
 0x2a2   :  { %1730 = vmatmul.mubr.bf16.gmra.mxu1 %v1501_v61  ;;  %v1336_v39 = vpop.permute.xlu1 %1335  ;;  %5663 = vmatpush3.bf16.msra.mxu0 %v6143_v50 }
 0x2a3   :  { %v1444_v60 = vsel %vm1201_vm9, %v1434_v32, %v1336_v39  ;;  %5664 = vmatprep.subr.bf16.mxu0 %v6144_v0 }
 0x2a4   :  { %v1414_v62 = vpop.permute.xlu0 %1413  ;;  %v1504_v4 = vrot.slane %v1444_v60, 4 }
 0x2a5   :  { %v1479_v43 = vsel %vm1201_vm9, %v1469_v56, %v1414_v62 }
 0x2a6   :  { %v1506_v5 = vrot.slane %v1479_v43, 4  ;;  %v1505_v35 = vsel %vm108_vm0, %v1500_v58, %v1504_v4  ;;  %5665 = vmatpush3.bf16.msra.mxu0 %v6145_v13 }
 0x2a7   :  { %5666 = vmatprep.subr.bf16.mxu0 %v6146_v7 }
 0x2a8   :  { %v1507_v18 = vsel %vm108_vm0, %v1502_v12, %v1506_v5 }
 0x2a9   :  { %1737 = vmatprep.mubr.bf16.mxu1 %v1507_v18 }
 0x2aa   :  { %1738 = vmatmul.mubr.bf16.gmra.mxu1 %v1505_v35  ;;  %5667 = vmatpush3.bf16.msra.mxu0 %v6147_v25 }
 0x2ab   :  { %5668 = vmatprep.subr.bf16.mxu0 %v6148_v52 }
 0x2ae   :  { %5669 = vmatpush3.bf16.msra.mxu0 %v6149_v57 }
 0x307   :  { %v5606_v48 = vpop.f32.mrf.mxu1 }
 0x309   :  { %v5607_v53 = vpop.f32.mrf.mxu1 }
 0x30a   :  { %v5608_v15 = vadd.f32 %v5607_v53, %v5606_v48 }
 0x30b   :  { %v5609_v14 = vpop.f32.mrf.mxu1 }
 0x30c   :  { %v1684_v44 = vadd.f32 %v5608_v15, %v7020_v63 }
 0x30d   :  { %v5610_v6 = vpop.f32.mrf.mxu1 }
 0x30e   :  { %v5611_v59 = vadd.f32 %v5610_v6, %v5609_v14  ;;  %v1767_v40 = vmul.f32 %v7026_v26, %v1684_v44  ;;  %vm1747_vm11 = vcmp.gt.f32.partialorder %v1684_v44, 0.0 }
 0x310   :  { %v1687_v8 = vadd.f32 %v5611_v59, %v7020_v63  ;;  %v1783_v27 = vsel %vm1747_vm11, %v1684_v44, %v1767_v40 }
 0x312   :  { %vm1748_vm12 = vcmp.gt.f32.partialorder %v1687_v8, 0.0  ;;  %v1768_v51 = vmul.f32 %v7026_v26, %v1687_v8 }
 0x313   :  { %v5612_v21 = vpop.f32.mrf.mxu1 }
 0x314   :  { %v1784_v28 = vsel %vm1748_vm12, %v1687_v8, %v1768_v51 }
 0x315   :  { %v7031_v23 = vpack.c.bf16 %v1784_v28, %v1783_v27  ;;  %v5613_v33 = vpop.f32.mrf.mxu1 }
 0x316   :  { %v5614_v19 = vadd.f32 %v5613_v33, %v5612_v21 }
 0x317   :  { %v5615_v46 = vpop.f32.mrf.mxu1  ;;  %v1808_v20 = vshrl.u32 %v7031_v23, 16  ;;  %v1810_v34 = vshll.u32 %v7031_v23, 16 }
 0x318   :  { %v1692_v30 = vadd.f32 %v5614_v19, %v7020_v63 }
 0x319   :  { %v5616_v36 = vpop.f32.mrf.mxu1  ;;  %v1882_v38 = vrot.slane %v1808_v20, 2  ;;  %v1883_v45 = vrot.slane %v1810_v34, 3  ;;  %v1910_v31 = vrot.slane %v1808_v20, 3  ;;  %v1911_v17 = vrot.slane %v1810_v34, 4 }
 0x31a   :  { %v5617_v42 = vadd.f32 %v5616_v36, %v5615_v46  ;;  %vm1749_vm14 = vcmp.gt.f32.partialorder %v1692_v30, 0.0  ;;  %v1769_v9 = vmul.f32 %v7026_v26, %v1692_v30  ;;  %v1939_v12 = vrot.slane %v1808_v20, 4 }
 0x31b   :  { %v1884_v37 = vor.u32 %v1883_v45, %v1882_v38  ;;  %v1912_v55 = vor.u32 %v1911_v17, %v1910_v31  ;;  %v1940_v24 = vrot.slane %v1810_v34, 5  ;;  %v1969_v16 = vrot.slane %v1808_v20, 5 }
 0x31c   :  { %v1695_v58 = vadd.f32 %v5617_v42, %v7020_v63  ;;  %v1970_v49 = vrot.slane %v1810_v34, 6  ;;  %v1785_v60 = vsel %vm1749_vm14, %v1692_v30, %v1769_v9  ;;  %v1812_v62 = vrot.slane %v1810_v34, 1 }
 0x31d   :  { %v1941_v39 = vor.u32 %v1940_v24, %v1939_v12  ;;  %v1852_v18 = vrot.slane %v1808_v20, 1  ;;  %v1853_v35 = vrot.slane %v1810_v34, 2  ;;  %vm1968_vm14 = vsmask.f32 2304 }
 0x31e   :  { %vm1750_vm15 = vcmp.gt.f32.partialorder %v1695_v58, 0.0  ;;  %v1770_v61 = vmul.f32 %v7026_v26, %v1695_v58  ;;  %v1971_v10 = vor.u32 %v1970_v49, %v1969_v16  ;;  %v1813_v54 = vor.u32 %v1812_v62, %v1808_v20 }
 0x31f   :  { %v5618_v32 = vpop.f32.mrf.mxu1  ;;  %v1854_v29 = vor.u32 %v1853_v35, %v1852_v18 }
 0x320   :  { %v1786_v56 = vsel %vm1750_vm15, %v1695_v58, %v1770_v61 }
 0x321   :  { %v7040_v4 = vpack.c.bf16 %v1786_v56, %v1785_v60  ;;  %v5619_v43 = vpop.f32.mrf.mxu1 }
 0x322   :  { %v5620_v5 = vadd.f32 %v5619_v43, %v5618_v32 }
 0x323   :  { %v5621_v41 = vpop.f32.mrf.mxu1  ;;  %v1815_v2 = vshll.u32 %v7040_v4, 16  ;;  %v1819_v1 = vshrl.u32 %v7040_v4, 16 }
 0x324   :  { %v1700_v11 = vadd.f32 %v5620_v5, %v7020_v63 }
 0x325   :  { %v5622_v48 = vpop.f32.mrf.mxu1  ;;  %v1817_v22 = vrot.slane %v1815_v2, 1  ;;  %v1855_v53 = vrot.slane %v1819_v1, 1  ;;  %v1856_v47 = vrot.slane %v1815_v2, 2  ;;  %v1885_v15 = vrot.slane %v1819_v1, 2 }
 0x326   :  { %v5623_v14 = vadd.f32 %v5622_v48, %v5621_v41  ;;  %v1886_v44 = vrot.slane %v1815_v2, 3  ;;  %vm1751_vm11 = vcmp.gt.f32.partialorder %v1700_v11, 0.0  ;;  %v1913_v59 = vrot.slane %v1819_v1, 3 }
 0x327   :  { %v1818_v6 = vsel %vm238_vm4, %v1813_v54, %v1817_v22  ;;  %v1857_v3 = vor.u32 %v1856_v47, %v1855_v53  ;;  %v1771_v50 = vmul.f32 %v7026_v26, %v1700_v11  ;;  %v1914_v0 = vrot.slane %v1815_v2, 4  ;;  %v6150_v53 = vld [vmem:[#allocation2 + $0x2a8] sm:$0xff]  }
 0x328   :  { %v1703_v40 = vadd.f32 %v5623_v14, %v7020_v63  ;;  %1835 = vrot.lane.b32.xlu1 %v1818_v6, %s6309_s18  ;;  %v1887_v8 = vor.u32 %v1886_v44, %v1885_v15  ;;  %v1942_v21 = vrot.slane %v1819_v1, 4  ;;  %v1943_v13 = vrot.slane %v1815_v2, 5  ;;  %5706 = vmatprep.subr.bf16.mxu0 %v6150_v53 }
 0x329   :  { %v1858_v51 = vsel %vm301_vm5, %v1854_v29, %v1857_v3  ;;  %v1972_v27 = vrot.slane %v1819_v1, 5  ;;  %v1915_v7 = vor.u32 %v1914_v0, %v1913_v59  ;;  %v1973_v20 = vrot.slane %v1815_v2, 6 }
 0x32a   :  { %vm1752_vm12 = vcmp.gt.f32.partialorder %v1703_v40, 0.0  ;;  %v1772_v28 = vmul.f32 %v7026_v26, %v1703_v40  ;;  %1869 = vrot.lane.b32.xlu0 %v1858_v51, %s6309_s18  ;;  %v7053_v33 = vsel %vm1109_vm10, %v1884_v37, %v1887_v8  ;;  %v1944_v46 = vor.u32 %v1943_v13, %v1942_v21 }
 0x32b   :  { %v5624_v19 = vpop.f32.mrf.mxu1  ;;  %v1787_v34 = vsel %vm1751_vm11, %v1700_v11, %v1771_v50  ;;  %v7057_v30 = vsel %vm1155_vm13, %v1912_v55, %v1915_v7  ;;  %v1974_v45 = vor.u32 %v1973_v20, %v1972_v27  ;;  %v1821_v37 = vor.u32 %v1819_v1, %v1817_v22 }
 0x32c   :  { %v1788_v25 = vsel %vm1752_vm12, %v1703_v40, %v1772_v28  ;;  %v7062_v42 = vsel %vm1938_vm2, %v1941_v39, %v1944_v46 }
 0x32d   :  { %v7059_v36 = vpack.c.bf16 %v1788_v25, %v1787_v34  ;;  %v5625_v38 = vpop.f32.mrf.mxu1  ;;  %v7067_v9 = vsel %vm1968_vm14, %v1971_v10, %v1974_v45 }
 0x32e   :  { %v5626_v31 = vadd.f32 %v5625_v38, %v5624_v19 }
 0x32f   :  { %v5627_v17 = vpop.f32.mrf.mxu1  ;;  %v1823_v52 = vshll.u32 %v7059_v36, 16  ;;  %v1827_v57 = vshrl.u32 %v7059_v36, 16 }
 0x330   :  { %v1708_v58 = vadd.f32 %v5626_v31, %v7020_v63 }
 0x331   :  { %v5628_v12 = vpop.f32.mrf.mxu1  ;;  %v1825_v55 = vrot.slane %v1823_v52, 1  ;;  %v1859_v24 = vrot.slane %v1827_v57, 1  ;;  %v1860_v16 = vrot.slane %v1823_v52, 2  ;;  %v1889_v49 = vrot.slane %v1827_v57, 2 }
 0x332   :  { %v5629_v61 = vadd.f32 %v5628_v12, %v5627_v17  ;;  %v1890_v32 = vrot.slane %v1823_v52, 3  ;;  %vm1753_vm15 = vcmp.gt.f32.partialorder %v1708_v58, 0.0  ;;  %v1917_v56 = vrot.slane %v1827_v57, 3 }
 0x333   :  { %v1826_v39 = vsel %vm238_vm4, %v1821_v37, %v1825_v55  ;;  %v1861_v60 = vor.u32 %v1860_v16, %v1859_v24  ;;  %v1773_v62 = vmul.f32 %v7026_v26, %v1708_v58  ;;  %v1918_v5 = vrot.slane %v1823_v52, 4 }
 0x334   :  { %v1711_v10 = vadd.f32 %v5629_v61, %v7020_v63  ;;  %1837 = vrot.lane.b32.xlu1 %v1826_v39, %s6309_s18  ;;  %v1891_v43 = vor.u32 %v1890_v32, %v1889_v49  ;;  %v1946_v35 = vrot.slane %v1827_v57, 4  ;;  %v1947_v41 = vrot.slane %v1823_v52, 5 }
 0x335   :  { %v1862_v18 = vsel %vm301_vm5, %v1857_v3, %v1861_v60  ;;  %v1976_v2 = vrot.slane %v1827_v57, 5  ;;  %v1919_v54 = vor.u32 %v1918_v5, %v1917_v56  ;;  %v1977_v22 = vrot.slane %v1823_v52, 6 }
 0x336   :  { %vm1754_vm11 = vcmp.gt.f32.partialorder %v1711_v10, 0.0  ;;  %v1774_v1 = vmul.f32 %v7026_v26, %v1711_v10  ;;  %1871 = vrot.lane.b32.xlu0 %v1862_v18, %s6309_s18  ;;  %v7078_v11 = vsel %vm1109_vm10, %v1887_v8, %v1891_v43  ;;  %v1948_v48 = vor.u32 %v1947_v41, %v1946_v35 }
 0x337   :  { %v1789_v47 = vsel %vm1753_vm15, %v1708_v58, %v1773_v62  ;;  %v7082_v14 = vsel %vm1155_vm13, %v1915_v7, %v1919_v54  ;;  %v1978_v6 = vor.u32 %v1977_v22, %v1976_v2  ;;  %v1829_v40 = vor.u32 %v1827_v57, %v1825_v55 }
 0x338   :  { %v1790_v15 = vsel %vm1754_vm11, %v1711_v10, %v1774_v1  ;;  %v7087_v44 = vsel %vm1938_vm2, %v1944_v46, %v1948_v48 }
 0x339   :  { %v7084_v29 = vpack.c.bf16 %v1790_v15, %v1789_v47  ;;  %v7092_v50 = vsel %vm1968_vm14, %v1974_v45, %v1978_v6 }
 0x33b   :  { %v1831_v3 = vshll.u32 %v7084_v29, 16  ;;  %v1863_v59 = vshrl.u32 %v7084_v29, 16 }
 0x33d   :  { %v1833_v8 = vrot.slane %v1831_v3, 1  ;;  %v1865_v0 = vrot.slane %v1863_v59, 1  ;;  %v1866_v51 = vrot.slane %v1831_v3, 2  ;;  %v1893_v21 = vrot.slane %v1863_v59, 2 }
 0x33e   :  { %v1894_v13 = vrot.slane %v1831_v3, 3  ;;  %v1921_v27 = vrot.slane %v1863_v59, 3  ;;  %v1922_v28 = vrot.slane %v1831_v3, 4  ;;  %v1950_v7 = vrot.slane %v1863_v59, 4 }
 0x33f   :  { %v1834_v19 = vsel %vm238_vm4, %v1829_v40, %v1833_v8  ;;  %v1867_v46 = vor.u32 %v1866_v51, %v1865_v0  ;;  %v1951_v20 = vrot.slane %v1831_v3, 5  ;;  %v1980_v34 = vrot.slane %v1863_v59, 5 }
 0x340   :  { %1839 = vrot.lane.b32.xlu1 %v1834_v19, %s6309_s18  ;;  %v1895_v25 = vor.u32 %v1894_v13, %v1893_v21  ;;  %v1923_v38 = vor.u32 %v1922_v28, %v1921_v27  ;;  %v1981_v45 = vrot.slane %v1831_v3, 6 }
 0x341   :  { %v1868_v31 = vsel %vm301_vm5, %v1861_v60, %v1867_v46  ;;  %v1952_v17 = vor.u32 %v1951_v20, %v1950_v7 }
 0x342   :  { %1873 = vrot.lane.b32.xlu0 %v1868_v31, %s6309_s18  ;;  %v7099_v52 = vsel %vm1109_vm10, %v1891_v43, %v1895_v25  ;;  %v7102_v57 = vsel %vm1155_vm13, %v1919_v54, %v1923_v38  ;;  %v1982_v58 = vor.u32 %v1981_v45, %v1980_v34 }
 0x343   :  { %v7105_v37 = vsel %vm1938_vm2, %v1948_v48, %v1952_v17 }
 0x344   :  { %v7108_v12 = vsel %vm1968_vm14, %v1978_v6, %v1982_v58 }
 0x345   :  { %v5630_v55 = vpop.f32.mrf.mxu1 }
 0x347   :  { %v5631_v24 = vpop.f32.mrf.mxu1 }
 0x348   :  { %v5632_v16 = vadd.f32 %v5631_v24, %v5630_v55 }
 0x349   :  { %v5633_v49 = vpop.f32.mrf.mxu1 }
 0x34a   :  { %v1716_v61 = vadd.f32 %v5632_v16, %v7020_v63 }
 0x34b   :  { %v5634_v32 = vpop.f32.mrf.mxu1 }
 0x34c   :  { %v5635_v39 = vadd.f32 %v5634_v32, %v5633_v49  ;;  %v1775_v60 = vmul.f32 %v7026_v26, %v1716_v61  ;;  %vm1755_vm12 = vcmp.gt.f32.partialorder %v1716_v61, 0.0 }
 0x34e   :  { %v1719_v56 = vadd.f32 %v5635_v39, %v7020_v63  ;;  %v1791_v10 = vsel %vm1755_vm12, %v1716_v61, %v1775_v60 }
 0x350   :  { %vm1756_vm15 = vcmp.gt.f32.partialorder %v1719_v56, 0.0  ;;  %v1776_v62 = vmul.f32 %v7026_v26, %v1719_v56 }
 0x352   :  { %v1792_v43 = vsel %vm1756_vm15, %v1719_v56, %v1776_v62  ;;  %v5636_v5 = vpop.f32.mrf.mxu1 }
 0x353   :  { %v7114_v18 = vpack.c.bf16 %v1792_v43, %v1791_v10 }
 0x354   :  { %v5637_v35 = vpop.f32.mrf.mxu1 }
 0x355   :  { %v5638_v41 = vadd.f32 %v5637_v35, %v5636_v5  ;;  %v7118_v54 = vshrl.u32 %v7114_v18, 16  ;;  %v7121_v22 = vshll.u32 %v7114_v18, 16 }
 0x356   :  { %v5639_v2 = vpop.f32.mrf.mxu1 }
 0x357   :  { %v1724_v1 = vadd.f32 %v5638_v41, %v7020_v63  ;;  %v2218_v6 = vrot.slane %v7118_v54, 5  ;;  %v2219_v3 = vrot.slane %v7121_v22, 6  ;;  %v2064_v21 = vrot.slane %v7121_v22, 1 }
 0x358   :  { %v5640_v48 = vpop.f32.mrf.mxu1  ;;  %v2104_v7 = vrot.slane %v7118_v54, 1  ;;  %v2105_v19 = vrot.slane %v7121_v22, 2 }
 0x359   :  { %v5641_v53 = vadd.f32 %v5640_v48, %v5639_v2  ;;  %v1777_v47 = vmul.f32 %v7026_v26, %v1724_v1  ;;  %vm1757_vm11 = vcmp.gt.f32.partialorder %v1724_v1, 0.0  ;;  %v2220_v40 = vor.u32 %v2219_v3, %v2218_v6  ;;  %v6164_v3 = vld [vmem:[#allocation2 + $0x328] sm:$0xff]  }
 0x35a   :  { %v2065_v20 = vor.u32 %v2064_v21, %v7118_v54  ;;  %v2106_v58 = vor.u32 %v2105_v19, %v2104_v7  ;;  %5758 = vmatprep.subr.bf16.mxu1 %v6164_v3  ;;  %v2135_v3 = vrot.slane %v7121_v22, 3 }
 0x35b   :  { %v1727_v15 = vadd.f32 %v5641_v53, %v7020_v63  ;;  %v1793_v8 = vsel %vm1757_vm11, %v1724_v1, %v1777_v47 }
 0x35d   :  { %vm1758_vm12 = vcmp.gt.f32.partialorder %v1727_v15, 0.0  ;;  %v1778_v59 = vmul.f32 %v7026_v26, %v1727_v15 }
 0x35f   :  { %v1794_v0 = vsel %vm1758_vm12, %v1727_v15, %v1778_v59  ;;  %v6165_v59 = vld [vmem:[#allocation2 + $0x2e8] sm:$0xff]  }
 0x360   :  { %v7128_v51 = vpack.c.bf16 %v1794_v0, %v1793_v8  ;;  %5759 = vmatpush3.bf16.msra.mxu1 %v6165_v59 }
 0x362   :  { %v5642_v13 = vpop.f32.mrf.mxu1  ;;  %v7132_v27 = vshll.u32 %v7128_v51, 16  ;;  %v7135_v28 = vshrl.u32 %v7128_v51, 16 }
 0x364   :  { %v5643_v46 = vpop.f32.mrf.mxu1  ;;  %v2069_v34 = vrot.slane %v7132_v27, 1  ;;  %v2107_v25 = vrot.slane %v7135_v28, 1  ;;  %v2108_v38 = vrot.slane %v7132_v27, 2  ;;  %v2221_v61 = vrot.slane %v7135_v28, 5 }
 0x365   :  { %v5644_v45 = vadd.f32 %v5643_v46, %v5642_v13  ;;  %v2222_v32 = vrot.slane %v7132_v27, 6  ;;  %v2166_v59 = vrot.slane %v7132_v27, 4 }
 0x366   :  { %v5645_v31 = vpop.f32.mrf.mxu1  ;;  %v2070_v17 = vsel %vm238_vm4, %v2065_v20, %v2069_v34  ;;  %v2109_v55 = vor.u32 %v2108_v38, %v2107_v25  ;;  %v2073_v13 = vor.u32 %v7135_v28, %v2069_v34 }
 0x367   :  { %v1732_v24 = vadd.f32 %v5644_v45, %v7020_v63  ;;  %2087 = vrot.lane.b32.xlu1 %v2070_v17, %s6309_s18  ;;  %v7150_v56 = vor.u32 %v2222_v32, %v2221_v61  ;;  %v6166_v45 = vld [vmem:[#allocation2 + $0x320] sm:$0xff]  }
 0x368   :  { %v5646_v16 = vpop.f32.mrf.mxu1  ;;  %v2110_v49 = vsel %vm301_vm5, %v2106_v58, %v2109_v55  ;;  %5760 = vmatprep.subr.bf16.mxu1 %v6166_v45 }
 0x369   :  { %v5647_v39 = vadd.f32 %v5646_v16, %v5645_v31  ;;  %2121 = vrot.lane.b32.xlu0 %v2110_v49, %s6309_s18  ;;  %v1779_v62 = vmul.f32 %v7026_v26, %v1732_v24  ;;  %vm1759_vm15 = vcmp.gt.f32.partialorder %v1732_v24, 0.0  ;;  %v7156_v5 = vsel %vm1968_vm14, %v2220_v40, %v7150_v56  ;;  %v6167_v31 = vld [vmem:[#allocation2 + $0x2e0] sm:$0xff]   ;;  %v6171_v16 = vld [vmem:[#allocation2 + $0x2d8] sm:$0xff]  }
 0x36a   :  { %v5648_v60 = vpop.f32.mrf.mxu1  ;;  %5761 = vmatpush3.bf16.msra.mxu1 %v6167_v31 }
 0x36b   :  { %v1735_v10 = vadd.f32 %v5647_v39, %v7020_v63  ;;  %v1795_v1 = vsel %vm1759_vm15, %v1732_v24, %v1779_v62  ;;  %v6170_v24 = vld [vmem:[#allocation2 + $0x318] sm:$0xff]  }
 0x36c   :  { %v5649_v43 = vpop.f32.mrf.mxu1  ;;  %5762 = vmatprep.subr.bf16.mxu1 %v6170_v24 }
 0x36d   :  { %vm1760_vm11 = vcmp.gt.f32.partialorder %v1735_v10, 0.0  ;;  %v1780_v35 = vmul.f32 %v7026_v26, %v1735_v10  ;;  %v5650_v41 = vadd.f32 %v5649_v43, %v5648_v60  ;;  %v6174_v43 = vld [vmem:[#allocation2 + $0x2d0] sm:$0xff]  }
 0x36e   :  { %v5651_v2 = vpop.f32.mrf.mxu1  ;;  %5763 = vmatpush3.bf16.msra.mxu1 %v6171_v16 }
 0x36f   :  { %v1796_v48 = vsel %vm1760_vm11, %v1735_v10, %v1780_v35  ;;  %v1740_v53 = vadd.f32 %v5650_v41, %v7020_v63  ;;  %v6173_v10 = vld [vmem:[#allocation2 + $0x310] sm:$0xff]   ;;  %v6175_v41 = vld [vmem:[#allocation2 + $0x308] sm:$0xff]  }
 0x370   :  { %v7160_v47 = vpack.c.bf16 %v1796_v48, %v1795_v1  ;;  %v5652_v15 = vpop.f32.mrf.mxu1  ;;  %5764 = vmatprep.subr.bf16.mxu1 %v6173_v10  ;;  %v2137_v1 = vrot.slane %v7135_v28, 2  ;;  %v2138_v48 = vrot.slane %v7132_v27, 3 }
 0x371   :  { %v5653_v6 = vadd.f32 %v5652_v15, %v5651_v2  ;;  %v1781_v0 = vmul.f32 %v7026_v26, %v1740_v53  ;;  %vm1761_vm12 = vcmp.gt.f32.partialorder %v1740_v53, 0.0  ;;  %v6176_v2 = vld [vmem:[#allocation2 + $0x2c8] sm:$0xff]   ;;  %v6178_v15 = vld [vmem:[#allocation2 + $0x2c0] sm:$0xff]  }
 0x372   :  { %v7163_v8 = vshll.u32 %v7160_v47, 16  ;;  %v7166_v40 = vshrl.u32 %v7160_v47, 16  ;;  %5765 = vmatpush3.bf16.msra.mxu1 %v6174_v43  ;;  %v1846_v43 = vrot.slane %v7040_v4, 1 }
 0x373   :  { %v1743_v21 = vadd.f32 %v5653_v6, %v7020_v63  ;;  %v1797_v63 = vsel %vm1761_vm12, %v1740_v53, %v1781_v0  ;;  %5766 = vmatprep.subr.bf16.mxu1 %v6175_v41  ;;  %v6177_v53 = vld [vmem:[#allocation2 + $0x300] sm:$0xff]   ;;  %v2134_v6 = vrot.slane %v7118_v54, 2  ;;  %v2163_v0 = vrot.slane %v7121_v22, 4 }
 0x374   :  { %v2077_v7 = vrot.slane %v7163_v8, 1  ;;  %v2111_v19 = vrot.slane %v7166_v40, 1  ;;  %v2112_v46 = vrot.slane %v7163_v8, 2 }
 0x375   :  { %vm1762_vm15 = vcmp.gt.f32.partialorder %v1743_v21, 0.0  ;;  %v1782_v20 = vmul.f32 %v7026_v26, %v1743_v21 }
 0x376   :  { %v2078_v25 = vsel %vm238_vm4, %v2073_v13, %v2077_v7  ;;  %v2113_v38 = vor.u32 %v2112_v46, %v2111_v19  ;;  %v2081_v61 = vor.u32 %v7166_v40, %v2077_v7  ;;  %5767 = vmatpush3.bf16.msra.mxu1 %v6176_v2  ;;  %v6181_v13 = vld [vmem:[#allocation2 + $0x2b8] sm:$0xff]   ;;  %v2141_v7 = vrot.slane %v7166_v40, 2 }
 0x377   :  { %v1798_v17 = vsel %vm1762_vm15, %v1743_v21, %v1782_v20  ;;  %2089 = vrot.lane.b32.xlu1 %v2078_v25, %s6309_s18  ;;  %5768 = vmatprep.subr.bf16.mxu1 %v6177_v53  ;;  %v6180_v21 = vld [vmem:[#allocation2 + $0x2f8] sm:$0xff]   ;;  %v2142_v19 = vrot.slane %v7163_v8, 3  ;;  %v2136_v46 = vor.u32 %v2135_v3, %v2134_v6  ;;  %v2170_v25 = vrot.slane %v7163_v8, 4 }
 0x378   :  { %v7177_v34 = vpack.c.bf16 %v1798_v17, %v1797_v63  ;;  %v2114_v58 = vsel %vm301_vm5, %v2109_v55, %v2113_v38  ;;  %v2193_v3 = vrot.slane %v7135_v28, 4 }
 0x379   :  { %2123 = vrot.lane.b32.xlu0 %v2114_v58, %s6309_s18  ;;  %v2143_v31 = vor.u32 %v2142_v19, %v2141_v7  ;;  %v6183_v58 = vld [vmem:[#allocation2 + $0x2b0] sm:$0xff]  }
 0x37a   :  { %v7182_v26 = vshll.u32 %v7177_v34, 16  ;;  %v7185_v49 = vshrl.u32 %v7177_v34, 16  ;;  %5769 = vmatpush3.bf16.msra.mxu1 %v6178_v15  ;;  %v6152_v15 = vld [vmem:[#allocation2 + $0x2a0] sm:$0xff]  }
 0x37b   :  { %5770 = vmatprep.subr.bf16.mxu1 %v6180_v21  ;;  %v2226_v21 = vrot.slane %v7163_v8, 6 }
 0x37c   :  { %v2085_v32 = vrot.slane %v7182_v26, 1  ;;  %v2117_v39 = vrot.slane %v7185_v49, 1  ;;  %v2118_v55 = vrot.slane %v7182_v26, 2  ;;  %v2145_v63 = vrot.slane %v7185_v49, 2 }
 0x37d   :  { %v2146_v17 = vrot.slane %v7182_v26, 3  ;;  %v2201_v19 = vrot.slane %v7185_v49, 4 }
 0x37e   :  { %v2086_v60 = vsel %vm238_vm4, %v2081_v61, %v2085_v32  ;;  %v2119_v62 = vor.u32 %v2118_v55, %v2117_v39  ;;  %5771 = vmatpush3.bf16.msra.mxu1 %v6181_v13  ;;  %v2173_v61 = vrot.slane %v7185_v49, 3  ;;  %v6155_v13 = vld [vmem:[#allocation2 + $0x258] sm:$0xff]  }
 0x37f   :  { %2091 = vrot.lane.b32.xlu1 %v2086_v60, %s6309_s18  ;;  %v2147_v39 = vor.u32 %v2146_v17, %v2145_v63 }
 0x380   :  { %v2120_v35 = vsel %vm301_vm5, %v2113_v38, %v2119_v62 }
 0x381   :  { %2125 = vrot.lane.b32.xlu0 %v2120_v35, %s6309_s18  ;;  %v2148_v62 = vsel %vm1109_vm10, %v2143_v31, %v2147_v39  ;;  %v1845_v35 = vrot.slane %v7031_v23, 1 }
 0x383   :  { %1897 = vrot.lane.b32.xlu1 %v7053_v33, %s6309_s18  ;;  %v2165_v33 = vrot.slane %v7135_v28, 3  ;;  %v2197_v28 = vrot.slane %v7166_v40, 4 }
 0x385   :  { %1925 = vrot.lane.b32.xlu0 %v7057_v30, %s6309_s18  ;;  %v2162_v30 = vrot.slane %v7118_v54, 3  ;;  %v2167_v20 = vor.u32 %v2166_v59, %v2165_v33  ;;  %v2194_v33 = vrot.slane %v7132_v27, 5  ;;  %v2191_v59 = vrot.slane %v7121_v22, 5 }
 0x386   :  { %v2198_v27 = vrot.slane %v7163_v8, 5  ;;  %v2225_v22 = vrot.slane %v7166_v40, 5 }
 0x387   :  { %1899 = vrot.lane.b32.xlu1 %v7078_v11, %s6309_s18  ;;  %v2139_v11 = vor.u32 %v2138_v48, %v2137_v1  ;;  %v2164_v38 = vor.u32 %v2163_v0, %v2162_v30  ;;  %v1847_v1 = vsel %vm287_vm3, %v1845_v35, %v1846_v43  ;;  %v6151_v48 = vld [vmem:[#allocation2 + $0x268] sm:$0xff]   ;;  %v6154_v30 = vld [vmem:[#allocation2 + $0x298] sm:$0xff]   ;;  %v2195_v0 = vor.u32 %v2194_v33, %v2193_v3 }
 0x388   :  { %v2199_v7 = vor.u32 %v2198_v27, %v2197_v28  ;;  %v6172_v35 = vld [vmem:[#allocation2 + $0x28] sm:$0xff]   ;;  %v2100_v3 = vrot.slane %v7160_v47, 1 }
 0x389   :  { %1927 = vrot.lane.b32.xlu0 %v7082_v14, %s6309_s18  ;;  %v2169_v14 = vrot.slane %v7166_v40, 3  ;;  %v2140_v45 = vsel %vm1109_vm10, %v2136_v46, %v2139_v11  ;;  %v2168_v24 = vsel %vm1155_vm13, %v2164_v38, %v2167_v20  ;;  %v2144_v32 = vsel %vm1109_vm10, %v2139_v11, %v2143_v31 }
 0x38a   :  { %v2200_v31 = vsel %vm1938_vm2, %v2195_v0, %v2199_v7 }
 0x38b   :  { %1901 = vrot.lane.b32.xlu1 %v7099_v52, %s6309_s18  ;;  %v6182_v52 = vld [vmem:[#allocation2 + $0x2f0] sm:$0xff]   ;;  %v2171_v16 = vor.u32 %v2170_v25, %v2169_v14  ;;  %v2229_v14 = vrot.slane %v7185_v49, 5 }
 0x38c   :  { %5772 = vmatprep.subr.bf16.mxu1 %v6182_v52  ;;  %v6157_v25 = vld [vmem:[#allocation2 + $0x250] sm:$0xff]   ;;  %v6160_v52 = vld [vmem:[#allocation2 + $0x280] sm:$0xff]  }
 0x38d   :  { %1929 = vrot.lane.b32.xlu0 %v7102_v57, %s6309_s18  ;;  %v2174_v57 = vrot.slane %v7182_v26, 4  ;;  %5773 = vmatpush3.bf16.msra.mxu1 %v6183_v58  ;;  %v2172_v55 = vsel %vm1155_vm13, %v2167_v20, %v2171_v16  ;;  %v2227_v20 = vor.u32 %v2226_v21, %v2225_v22 }
 0x38f   :  { %2149 = vrot.lane.b32.xlu1 %v2140_v45, %s6309_s18  ;;  %v2175_v60 = vor.u32 %v2174_v57, %v2173_v61  ;;  %v6158_v45 = vld [vmem:[#allocation2 + $0x288] sm:$0xff]   ;;  %v6161_v61 = vld [vmem:[#allocation2 + $0x240] sm:$0xff]  }
 0x391   :  { %2177 = vrot.lane.b32.xlu0 %v2168_v24, %s6309_s18  ;;  %v2176_v10 = vsel %vm1155_vm13, %v2171_v16, %v2175_v60  ;;  %v1850_v16 = vrot.slane %v7084_v29, 1 }
 0x393   :  { %2151 = vrot.lane.b32.xlu1 %v2144_v32, %s6309_s18 }
 0x395   :  { %2179 = vrot.lane.b32.xlu0 %v2172_v55, %s6309_s18  ;;  %v6163_v55 = vld [vmem:[#allocation2 + $0x238] sm:$0xff]  }
 0x397   :  { %2153 = vrot.lane.b32.xlu1 %v2148_v62, %s6309_s18  ;;  %v6168_v62 = vld [vmem:[#allocation2 + $0x270] sm:$0xff]  }
 0x399   :  { %2181 = vrot.lane.b32.xlu0 %v2176_v10, %s6309_s18 }
 0x39a   :  { %v1836_v41 = vpop.permute.xlu1 %1835 }
 0x39b   :  { %1954 = vrot.lane.b32.xlu1 %v7062_v42, %s6309_s18  ;;  %v1991_v6 = vsel %vm1192_vm8, %v7031_v23, %v1836_v41  ;;  %v2190_v42 = vrot.slane %v7118_v54, 4  ;;  %v1848_v54 = vrot.slane %v7059_v36, 1  ;;  %v2098_v41 = vrot.slane %v7128_v51, 1 }
 0x39c   :  { %v1870_v2 = vpop.permute.xlu0 %1869 }
 0x39d   :  { %1984 = vrot.lane.b32.xlu0 %v7067_v9, %s6309_s18  ;;  %v2001_v53 = vsel %vm1192_vm8, %v1847_v1, %v1870_v2  ;;  %v6153_v9 = vld [vmem:[#allocation2 + $0x260] sm:$0xff]   ;;  %v1849_v8 = vsel %vm287_vm3, %v1846_v43, %v1848_v54  ;;  %v1851_v39 = vsel %vm287_vm3, %v1848_v54, %v1850_v16  ;;  %v6169_v43 = vld [vmem:[#allocation2 + $0x230] sm:$0xff]   ;;  %v2097_v2 = vrot.slane %v7114_v18, 1 }
 0x39e   :  { %2729 = vmatprep.mubr.bf16.mxu0 %v2001_v53  ;;  %v1904_v54 = vrot.slane %v7040_v4, 3 }
 0x39f   :  { %1956 = vrot.lane.b32.xlu1 %v7087_v44, %s6309_s18  ;;  %2730 = vmatmul.mubr.bf16.vlgmr.msra.gmra.mxu0 %v1991_v6  ;;  %v2192_v44 = vor.u32 %v2191_v59, %v2190_v42  ;;  %v2099_v53 = vsel %vm287_vm3, %v2097_v2, %v2098_v41  ;;  %v2101_v59 = vsel %vm287_vm3, %v2098_v41, %v2100_v3 }
 0x3a0   :  { %5707 = vmatpush3.bf16.msra.mxu0 %v6151_v48 }
 0x3a1   :  { %1986 = vrot.lane.b32.xlu0 %v7092_v50, %s6309_s18  ;;  %5708 = vmatprep.subr.bf16.mxu0 %v6152_v15  ;;  %v6156_v50 = vld [vmem:[#allocation2 + $0x290] sm:$0xff]   ;;  %v2196_v11 = vsel %vm1938_vm2, %v2192_v44, %v2195_v0  ;;  %v2102_v0 = vrot.slane %v7177_v34, 1 }
 0x3a3   :  { %1958 = vrot.lane.b32.xlu1 %v7105_v37, %s6309_s18  ;;  %v2202_v37 = vrot.slane %v7182_v26, 5  ;;  %v2103_v44 = vsel %vm287_vm3, %v2100_v3, %v2102_v0  ;;  %v2127_v0 = vrot.slane %v7114_v18, 2 }
 0x3a4   :  { %5709 = vmatpush3.bf16.msra.mxu0 %v6153_v9 }
 0x3a5   :  { %1988 = vrot.lane.b32.xlu0 %v7108_v12, %s6309_s18  ;;  %5710 = vmatprep.subr.bf16.mxu0 %v6154_v30  ;;  %v2230_v12 = vrot.slane %v7182_v26, 6  ;;  %v2203_v17 = vor.u32 %v2202_v37, %v2201_v19  ;;  %v2228_v26 = vsel %vm1968_vm14, %v7150_v56, %v2227_v20  ;;  %v6162_v56 = vld [vmem:[#allocation2 + $0x278] sm:$0xff]   ;;  %v1876_v19 = vrot.slane %v7040_v4, 2 }
 0x3a6   :  { %v1838_v46 = vpop.permute.xlu1 %1837 }
 0x3a7   :  { %2205 = vrot.lane.b32.xlu1 %v2196_v11, %s6309_s18  ;;  %v1994_v63 = vsel %vm1192_vm8, %v7040_v4, %v1838_v46  ;;  %v2231_v49 = vor.u32 %v2230_v12, %v2229_v14  ;;  %v2204_v58 = vsel %vm1938_vm2, %v2199_v7, %v2203_v17  ;;  %v6179_v12 = vld [vmem:[#allocation2 + $0x20] sm:$0xff]   ;;  %v1878_v17 = vrot.slane %v7059_v36, 2 }
 0x3a8   :  { %v1872_v40 = vpop.permute.xlu0 %1871  ;;  %5711 = vmatpush3.bf16.msra.mxu0 %v6155_v13  ;;  %vm1960_vm2 = vcmask 1042432  }
 0x3a9   :  { %2233 = vrot.lane.b32.xlu0 %v7156_v5, %s6309_s18  ;;  %v2005_v38 = vsel %vm1192_vm8, %v1849_v8, %v1872_v40  ;;  %5712 = vmatprep.subr.bf16.mxu0 %v6156_v50  ;;  %v6159_v5 = vld [vmem:[#allocation2 + $0x248] sm:$0xff]   ;;  %v2232_v24 = vsel %vm1968_vm14, %v2227_v20, %v2231_v49  ;;  %v1903_v50 = vrot.slane %v7031_v23, 3  ;;  %v1906_v40 = vrot.slane %v7059_v36, 3 }
 0x3aa   :  { %2737 = vmatprep.mubr.bf16.mxu0 %v2005_v38  ;;  %v1875_v8 = vrot.slane %v7031_v23, 2 }
 0x3ab   :  { %2207 = vrot.lane.b32.xlu1 %v2200_v31, %s6309_s18  ;;  %2738 = vmatmul.mubr.bf16.gmra.mxu0 %v1994_v63  ;;  %v1905_v7 = vsel %vm109_vm1, %v1903_v50, %v1904_v54  ;;  %v1966_v50 = vrot.slane %v7084_v29, 5 }
 0x3ac   :  { %5713 = vmatpush3.bf16.msra.mxu0 %v6157_v25  ;;  %v1877_v14 = vsel %vm1099_vm6, %v1875_v8, %v1876_v19  ;;  %v2160_v8 = vrot.slane %v7177_v34, 3 }
 0x3ad   :  { %2235 = vrot.lane.b32.xlu0 %v2228_v26, %s6309_s18  ;;  %5714 = vmatprep.subr.bf16.mxu0 %v6158_v45  ;;  %v1907_v45 = vsel %vm109_vm1, %v1904_v54, %v1906_v40  ;;  %v6184_v26 = vld [vmem:[#allocation2 + $0x18] sm:$0xff]  }
 0x3af   :  { %2209 = vrot.lane.b32.xlu1 %v2204_v58, %s6309_s18  ;;  %v1879_v58 = vsel %vm1099_vm6, %v1876_v19, %v1878_v17 }
 0x3b0   :  { %5715 = vmatpush3.bf16.msra.mxu0 %v6159_v5  ;;  %v1908_v5 = vrot.slane %v7084_v29, 3 }
 0x3b1   :  { %2237 = vrot.lane.b32.xlu0 %v2232_v24, %s6309_s18  ;;  %5716 = vmatprep.subr.bf16.mxu0 %v6160_v52  ;;  %v6185_v24 = vld [vmem:[#allocation2 + $0x10] sm:$0xff]  }
 0x3b2   :  { %v1840_v57 = vpop.permute.xlu1 %1839 }
 0x3b3   :  { %v1997_v10 = vsel %vm1192_vm8, %v7059_v36, %v1840_v57 }
 0x3b4   :  { %v1874_v32 = vpop.permute.xlu0 %1873  ;;  %5717 = vmatpush3.bf16.msra.mxu0 %v6161_v61 }
 0x3b5   :  { %v2009_v60 = vsel %vm1192_vm8, %v1851_v39, %v1874_v32  ;;  %5718 = vmatprep.subr.bf16.mxu0 %v6162_v56  ;;  %v1909_v56 = vsel %vm109_vm1, %v1906_v40, %v1908_v5  ;;  %v1880_v39 = vrot.slane %v7084_v29, 2  ;;  %v2132_v5 = vrot.slane %v7177_v34, 2 }
 0x3b6   :  { %2745 = vmatprep.mubr.bf16.mxu0 %v2009_v60  ;;  %v2156_v60 = vrot.slane %v7128_v51, 3 }
 0x3b7   :  { %2746 = vmatmul.mubr.bf16.gmra.mxu0 %v1997_v10  ;;  %v2155_v10 = vrot.slane %v7114_v18, 3  ;;  %v1881_v41 = vsel %vm1099_vm6, %v1878_v17, %v1880_v39  ;;  %v2214_v39 = vrot.slane %v7160_v47, 5 }
 0x3b8   :  { %5719 = vmatpush3.bf16.msra.mxu0 %v6163_v55 }
 0x3b9   :  { %5720 = vmatprep.subr.bf16.mxu0 %v6168_v62 }
 0x3bc   :  { %5721 = vmatpush3.bf16.msra.mxu0 %v6169_v43  ;;  %v1962_v43 = vrot.slane %v7040_v4, 5 }
 0x3bd   :  { %6035 = vmatprep.subr.bf16.mxu0 %v6172_v35 }
 0x3d9   :  { %v2088_v1 = vpop.permute.xlu1 %2087 }
 0x3da   :  { %v2240_v6 = vsel %vm1192_vm8, %v7114_v18, %v2088_v1  ;;  %v2157_v1 = vsel %vm109_vm1, %v2155_v10, %v2156_v60 }
 0x3db   :  { %v2122_v48 = vpop.permute.xlu0 %2121 }
 0x3dc   :  { %v2250_v15 = vsel %vm1192_vm8, %v2099_v53, %v2122_v48  ;;  %v1961_v48 = vrot.slane %v7031_v23, 5  ;;  %v1931_v53 = vrot.slane %v7031_v23, 4  ;;  %v2158_v23 = vrot.slane %v7160_v47, 3 }
 0x3dd   :  { %2753 = vmatprep.mubr.bf16.mxu0 %v2250_v15 }
 0x3de   :  { %2754 = vmatmul.mubr.bf16.gmra.mxu0 %v2240_v6 }
 0x3e9   :  { %v2090_v33 = vpop.permute.xlu1 %2089 }
 0x3ea   :  { %v2243_v30 = vsel %vm1192_vm8, %v7128_v51, %v2090_v33  ;;  %v1963_v33 = vsel %vm1960_vm2, %v1961_v48, %v1962_v43 }
 0x3eb   :  { %v2124_v42 = vpop.permute.xlu0 %2123 }
 0x3ec   :  { %v2254_v9 = vsel %vm1192_vm8, %v2101_v59, %v2124_v42 }
 0x3ed   :  { %2761 = vmatprep.mubr.bf16.mxu0 %v2254_v9  ;;  %v2128_v9 = vrot.slane %v7128_v51, 2 }
 0x3ee   :  { %2762 = vmatmul.mubr.bf16.gmra.mxu0 %v2243_v30 }
 0x3ef   :  { %v2129_v54 = vsel %vm1099_vm6, %v2127_v0, %v2128_v9 }
 0x3f1   :  { %v2092_v28 = vpop.permute.xlu1 %2091 }
 0x3f2   :  { %v2246_v13 = vsel %vm1192_vm8, %v7160_v47, %v2092_v28 }
 0x3f3   :  { %v2126_v27 = vpop.permute.xlu0 %2125 }
 0x3f4   :  { %v2258_v22 = vsel %vm1192_vm8, %v2103_v44, %v2126_v27 }
 0x3f5   :  { %2769 = vmatprep.mubr.bf16.mxu0 %v2258_v22  ;;  %v1898_v21 = vpop.permute.xlu1 %1897  ;;  %v1934_v22 = vrot.slane %v7059_v36, 4 }
 0x3f6   :  { %2770 = vmatmul.mubr.bf16.gmra.mxu0 %v2246_v13  ;;  %v2013_v25 = vsel %vm1192_vm8, %v1877_v14, %v1898_v21  ;;  %v2159_v13 = vsel %vm109_vm1, %v2156_v60, %v2158_v23 }
 0x3f7   :  { %v1926_v11 = vpop.permute.xlu0 %1925 }
 0x3f8   :  { %v2025_v37 = vsel %vm1192_vm8, %v1905_v7, %v1926_v11 }
 0x3f9   :  { %2810 = vmatprep.mubr.bf16.mxu0 %v2025_v37  ;;  %v1900_v46 = vpop.permute.xlu1 %1899 }
 0x3fa   :  { %v2017_v61 = vsel %vm1192_vm8, %v1879_v58, %v1900_v46  ;;  %v2130_v46 = vrot.slane %v7160_v47, 2 }
 0x3fb   :  { %v1928_v20 = vpop.permute.xlu0 %1927 }
 0x3fc   :  { %v2029_v31 = vsel %vm1192_vm8, %v1907_v45, %v1928_v20  ;;  %v2131_v14 = vsel %vm1099_vm6, %v2128_v9, %v2130_v46  ;;  %v2212_v45 = vrot.slane %v7128_v51, 5  ;;  %v3069_v9 = vld [vmem:[%s7949_s1 + $0x48] sm:$0xff] }
 0x3fd   :  { %v1902_v38 = vpop.permute.xlu1 %1901 }
 0x3fe   :  { %2811 = vmatmul.mubr.bf16.vlgmr.msra.gmra.mxu0 %v2013_v25  ;;  %v2021_v2 = vsel %vm1192_vm8, %v1881_v41, %v1902_v38  ;;  %v2161_v38 = vsel %vm109_vm1, %v2158_v23, %v2160_v8  ;;  %v6190_v8 = vld [vmem:[#allocation2 + $0x398] sm:$0xff]  }
 0x3ff   :  { %6036 = vmatpush3.bf16.msra.mxu0 %v6172_v35  ;;  %v1930_v63 = vpop.permute.xlu0 %1929  ;;  %2818 = vmatprep.mubr.bf16.mxu0 %v2029_v31  ;;  %v1932_v35 = vrot.slane %v7040_v4, 4  ;;  %v1964_v4 = vrot.slane %v7059_v36, 5 }
 0x400   :  { %6037 = vmatprep.subr.bf16.mxu0 %v6179_v12  ;;  %v2033_v57 = vsel %vm1192_vm8, %v1909_v56, %v1930_v63  ;;  %v2133_v56 = vsel %vm1099_vm6, %v2130_v46, %v2132_v5  ;;  %v6198_v5 = vld [vmem:[#allocation2 + $0x388] sm:$0xff]  }
 0x401   :  { %v2150_v49 = vpop.permute.xlu1 %2149  ;;  %v1933_v42 = vsel %vm108_vm0, %v1931_v53, %v1932_v35  ;;  %v1965_v27 = vsel %vm1960_vm2, %v1962_v43, %v1964_v4  ;;  %v1935_v37 = vsel %vm108_vm0, %v1932_v35, %v1934_v22  ;;  %v1967_v36 = vsel %vm1960_vm2, %v1964_v4, %v1966_v50  ;;  %v3062_v43 = vld [vmem:[%s7949_s1 + $0x10] sm:$0xff] }
 0x402   :  { %v2262_v21 = vsel %vm1192_vm8, %v2129_v54, %v2150_v49  ;;  %v3066_v4 = vld [vmem:[%s7949_s1 + $0x30] sm:$0xff] }
 0x403   :  { %v2178_v52 = vpop.permute.xlu0 %2177  ;;  %6038 = vmatpush3.bf16.msra.mxu0 %v6179_v12  ;;  %v1936_v12 = vrot.slane %v7084_v29, 4  ;;  %v3060_v29 = vld [vmem:[%s7949_s1] sm:$0xff] }
 0x404   :  { %6039 = vmatprep.subr.bf16.mxu0 %v6184_v26  ;;  %v2274_v6 = vsel %vm1192_vm8, %v2157_v1, %v2178_v52  ;;  %v3061_v52 = vld [vmem:[%s7949_s1 + $0x8] sm:$0xff] }
 0x405   :  { %v7318_v16 = vpop.permute.xlu1 %2151  ;;  %v1937_v49 = vsel %vm108_vm0, %v1934_v22, %v1936_v12  ;;  %v3070_v22 = vld [vmem:[%s7949_s1 + $0x50] sm:$0xff]  ;;  %v6192_v12 = vld [vmem:[#allocation2 + $0x428] sm:$0xff]  }
 0x406   :  { %2819 = vmatmul.mubr.bf16.gmra.mxu0 %v2017_v61  ;;  %v2266_v25 = vsel %vm1192_vm8, %v2131_v14, %v7318_v16  ;;  %v3072_v61 = vpack.c.bf16 %v3061_v52, %v3060_v29  ;;  %v6191_v14 = vld [vmem:[#allocation2 + $0x358] sm:$0xff]   ;;  %v6197_v52 = vld [vmem:[#allocation2 + $0x3e0] sm:$0xff]  }
 0x407   :  { %v2180_v32 = vpop.permute.xlu0 %2179  ;;  %2826 = vmatprep.mubr.bf16.mxu0 %v2033_v57  ;;  %6040 = vmatpush3.bf16.msra.mxu0 %v6184_v26  ;;  %v2211_v26 = vrot.slane %v7114_v18, 5  ;;  %v2184_v57 = vrot.slane %v7128_v51, 4  ;;  %v3063_v51 = vld [vmem:[%s7949_s1 + $0x18] sm:$0xff] }
 0x408   :  { %6041 = vmatprep.subr.bf16.mxu0 %v6185_v24  ;;  %v2278_v7 = vsel %vm1192_vm8, %v2159_v13, %v2180_v32  ;;  %v3073_v48 = vpack.c.bf16 %v3063_v51, %v3062_v43  ;;  %v6204_v43 = vld [vmem:[#allocation2 + $0x380] sm:$0xff]  }
 0x409   :  { %v7324_v55 = vpop.permute.xlu1 %2153 }
 0x40a   :  { %v2270_v32 = vsel %vm1192_vm8, %v2133_v56, %v7324_v55  ;;  %v3064_v55 = vld [vmem:[%s7949_s1 + $0x20] sm:$0xff] }
 0x40b   :  { %v2182_v62 = vpop.permute.xlu0 %2181  ;;  %6042 = vmatpush3.bf16.msra.mxu0 %v6185_v24  ;;  %v2213_v24 = vsel %vm1960_vm2, %v2211_v26, %v2212_v45 }
 0x40c   :  { %v2282_v63 = vsel %vm1192_vm8, %v2161_v38, %v2182_v62  ;;  %v2183_v62 = vrot.slane %v7114_v18, 4  ;;  %v3065_v18 = vld [vmem:[%s7949_s1 + $0x28] sm:$0xff]  ;;  %5866 = vmatprep.subr.bf16.mxu0 %v6192_v12 }
 0x40d   :  { %v1955_v15 = vpop.permute.xlu1 %1954  ;;  %v3074_v53 = vpack.c.bf16 %v3065_v18, %v3064_v55  ;;  %v6205_v55 = vld [vmem:[#allocation2 + $0x340] sm:$0xff]  }
 0x40e   :  { %2827 = vmatmul.mubr.bf16.gmra.mxu0 %v2021_v2  ;;  %v2037_v30 = vsel %vm1192_vm8, %v1933_v42, %v1955_v15  ;;  %v2185_v35 = vsel %vm108_vm0, %v2183_v62, %v2184_v57  ;;  %v2215_v2 = vsel %vm1960_vm2, %v2212_v45, %v2214_v39  ;;  %v2186_v15 = vrot.slane %v7160_v47, 4  ;;  %v3067_v42 = vld [vmem:[%s7949_s1 + $0x38] sm:$0xff]  ;;  %v3068_v47 = vld [vmem:[%s7949_s1 + $0x40] sm:$0xff] }
 0x40f   :  { %v1985_v3 = vpop.permute.xlu0 %1984  ;;  %2834 = vmatprep.mubr.bf16.mxu0 %v2274_v6  ;;  %v2216_v6 = vrot.slane %v7177_v34, 5  ;;  %v6201_v62 = vld [vmem:[#allocation2 + $0x3d8] sm:$0xff]  }
 0x410   :  { %v2049_v59 = vsel %vm1192_vm8, %v1963_v33, %v1985_v3 }
 0x411   :  { %2891 = vmatprep.mubr.bf16.mxu1 %v2049_v59  ;;  %v1957_v11 = vpop.permute.xlu1 %1956  ;;  %v2187_v59 = vsel %vm108_vm0, %v2184_v57, %v2186_v15  ;;  %v2217_v23 = vsel %vm1960_vm2, %v2214_v39, %v2216_v6  ;;  %v6211_v6 = vld [vmem:[#allocation2 + $0x3c0] sm:$0xff]  }
 0x412   :  { %2892 = vmatmul.mubr.bf16.vlgmr.msra.gmra.mxu1 %v2037_v30  ;;  %v2041_v40 = vsel %vm1192_vm8, %v1935_v37, %v1957_v11  ;;  %v6189_v37 = vld [vmem:[#allocation2 + $0x360] sm:$0xff]  }
 0x413   :  { %v1987_v28 = vpop.permute.xlu0 %1986 }
 0x414   :  { %v2053_v44 = vsel %vm1192_vm8, %v1965_v27, %v1987_v28  ;;  %v3075_v28 = vpack.c.bf16 %v3067_v42, %v3066_v4  ;;  %v3076_v27 = vpack.c.bf16 %v3069_v9, %v3068_v47  ;;  %v6213_v4 = vld [vmem:[#allocation2 + $0x3b8] sm:$0xff]   ;;  %v6216_v42 = vld [vmem:[#allocation2 + $0x3f0] sm:$0xff]  }
 0x415   :  { %2899 = vmatprep.mubr.bf16.mxu1 %v2053_v44  ;;  %v1959_v31 = vpop.permute.xlu1 %1958  ;;  %v2188_v44 = vrot.slane %v7177_v34, 4  ;;  %v6186_v34 = vld [vmem:[#allocation2 + $0x3a8] sm:$0xff]  }
 0x416   :  { %2835 = vmatmul.mubr.bf16.gmra.mxu0 %v2262_v21  ;;  %v2045_v58 = vsel %vm1192_vm8, %v1937_v49, %v1959_v31  ;;  %v3071_v21 = vld [vmem:[%s7949_s1 + $0x58] sm:$0xff]  ;;  %5820 = vmatprep.subr.bf16.mxu1 %v6186_v34  ;;  %v6193_v31 = vld [vmem:[#allocation2 + $0x3e8] sm:$0xff]   ;;  %v6196_v49 = vld [vmem:[#allocation2 + $0x420] sm:$0xff]  }
 0x417   :  { %v1989_v19 = vpop.permute.xlu0 %1988  ;;  %2842 = vmatprep.mubr.bf16.mxu0 %v2278_v7  ;;  %v2189_v13 = vsel %vm108_vm0, %v2186_v15, %v2188_v44  ;;  %v3077_v11 = vpack.c.bf16 %v3071_v21, %v3070_v22  ;;  %v6187_v7 = vld [vmem:[#allocation2 + $0x368] sm:$0xff]   ;;  %v6214_v15 = vld [vmem:[#allocation2 + $0x370] sm:$0xff]  }
 0x418   :  { %v2057_v20 = vsel %vm1192_vm8, %v1967_v36, %v1989_v19  ;;  %5821 = vmatpush3.bf16.msra.mxu1 %v6187_v7  ;;  %v6188_v19 = vld [vmem:[#allocation2 + $0x3a0] sm:$0xff]  }
 0x419   :  { %v2206_v60 = vpop.permute.xlu1 %2205  ;;  %5822 = vmatprep.subr.bf16.mxu1 %v6188_v19 }
 0x41a   :  { %2900 = vmatmul.mubr.bf16.gmra.mxu1 %v2041_v40  ;;  %v2286_v41 = vsel %vm1192_vm8, %v2185_v35, %v2206_v60  ;;  %v6200_v60 = vld [vmem:[#allocation2 + $0x348] sm:$0xff]   ;;  %v6203_v35 = vld [vmem:[#allocation2 + $0x3d0] sm:$0xff]  }
 0x41b   :  { %2907 = vmatprep.mubr.bf16.mxu1 %v2057_v20  ;;  %v2234_v17 = vpop.permute.xlu0 %2233 }
 0x41c   :  { %v2298_v16 = vsel %vm1192_vm8, %v2213_v24, %v2234_v17  ;;  %5823 = vmatpush3.bf16.msra.mxu1 %v6189_v37  ;;  %v6195_v17 = vld [vmem:[#allocation2 + $0x350] sm:$0xff]   ;;  %v6199_v24 = vld [vmem:[#allocation2 + $0x418] sm:$0xff]  }
 0x41d   :  { %v2208_v3 = vpop.permute.xlu1 %2207  ;;  %5824 = vmatprep.subr.bf16.mxu1 %v6190_v8 }
 0x41e   :  { %2843 = vmatmul.mubr.bf16.gmra.mxu0 %v2266_v25  ;;  %v2290_v30 = vsel %vm1192_vm8, %v2187_v59, %v2208_v3  ;;  %v6215_v3 = vld [vmem:[#allocation2 + $0x330] sm:$0xff]  }
 0x41f   :  { %2850 = vmatprep.mubr.bf16.mxu0 %v2282_v63  ;;  %v2236_v10 = vpop.permute.xlu0 %2235  ;;  %v6194_v63 = vld [vmem:[#allocation2 + $0x390] sm:$0xff]  }
 0x420   :  { %v2302_v1 = vsel %vm1192_vm8, %v2215_v2, %v2236_v10  ;;  %5825 = vmatpush3.bf16.msra.mxu1 %v6191_v14  ;;  %v6202_v10 = vld [vmem:[#allocation2 + $0x410] sm:$0xff]   ;;  %v6208_v2 = vld [vmem:[#allocation2 + $0x378] sm:$0xff]  }
 0x421   :  { %v2210_v54 = vpop.permute.xlu1 %2209  ;;  %5826 = vmatprep.subr.bf16.mxu1 %v6194_v63  ;;  %v6217_v59 = vld [vmem:[#allocation2 + $0x3b0] sm:$0xff]  }
 0x422   :  { %2908 = vmatmul.mubr.bf16.gmra.mxu1 %v2045_v58  ;;  %v2294_v50 = vsel %vm1192_vm8, %v2189_v13, %v2210_v54 }
 0x423   :  { %2915 = vmatprep.mubr.bf16.mxu1 %v2298_v16  ;;  %v2238_v33 = vpop.permute.xlu0 %2237 }
 0x424   :  { %v2306_v0 = vsel %vm1192_vm8, %v2217_v23, %v2238_v33  ;;  %5827 = vmatpush3.bf16.msra.mxu1 %v6195_v17  ;;  %v6212_v33 = vld [vmem:[#allocation2 + $0x3f8] sm:$0xff]  }
 0x425   :  { %5828 = vmatprep.subr.bf16.mxu1 %v6198_v5 }
 0x426   :  { %2851 = vmatmul.mubr.bf16.gmra.mxu0 %v2270_v32 }
 0x427   :  { %6043 = vmatprep.mubr.msk.bf16.mxu0 %vm1192_vm8, %v3072_v61 }
 0x428   :  { %5829 = vmatpush3.bf16.msra.mxu1 %v6200_v60 }
 0x429   :  { %5830 = vmatprep.subr.bf16.mxu1 %v6204_v43 }
 0x42a   :  { %2916 = vmatmul.mubr.bf16.gmra.mxu1 %v2286_v41  ;;  %v6206_v41 = vld [vmem:[#allocation2 + $0x408] sm:$0xff]  }
 0x42b   :  { %2923 = vmatprep.mubr.bf16.mxu1 %v2302_v1  ;;  %v6207_v1 = vld [vmem:[#allocation2 + $0x3c8] sm:$0xff]  }
 0x42c   :  { %5831 = vmatpush3.bf16.msra.mxu1 %v6205_v55 }
 0x42d   :  { %5832 = vmatprep.subr.bf16.mxu1 %v6208_v2 }
 0x42e   :  { %6044 = vmatmul.mubr.msk.bf16.vlgmr.msra.gmra.mxu0 %vm1192_vm8, %v3073_v48  ;;  %v6210_v48 = vld [vmem:[#allocation2 + $0x338] sm:$0xff]  }
 0x42f   :  { %6047 = vmatprep.mubr.msk.bf16.mxu0 %vm1192_vm8, %v3074_v53  ;;  %5867 = vmatpush3.bf16.msra.mxu0 %v6193_v31  ;;  %v6209_v53 = vld [vmem:[#allocation2 + $0x400] sm:$0xff]  }
 0x430   :  { %5868 = vmatprep.subr.bf16.mxu0 %v6196_v49  ;;  %5833 = vmatpush3.bf16.msra.mxu1 %v6210_v48 }
 0x431   :  { %5834 = vmatprep.subr.bf16.mxu1 %v6214_v15 }
 0x432   :  { %2924 = vmatmul.mubr.bf16.gmra.mxu1 %v2290_v30 }
 0x433   :  { %2931 = vmatprep.mubr.bf16.mxu1 %v2306_v0  ;;  %5869 = vmatpush3.bf16.msra.mxu0 %v6197_v52 }
 0x434   :  { %5870 = vmatprep.subr.bf16.mxu0 %v6199_v24  ;;  %5835 = vmatpush3.bf16.msra.mxu1 %v6215_v3 }
 0x436   :  { %6048 = vmatmul.mubr.msk.bf16.gmra.mxu0 %vm1192_vm8, %v3075_v28 }
 0x437   :  { %6051 = vmatprep.mubr.msk.bf16.mxu0 %vm1192_vm8, %v3076_v27  ;;  %5871 = vmatpush3.bf16.msra.mxu0 %v6201_v62 }
 0x438   :  { %5872 = vmatprep.subr.bf16.mxu0 %v6202_v10 }
 0x43a   :  { %2932 = vmatmul.mubr.bf16.gmra.mxu1 %v2294_v50 }
 0x43b   :  { %5873 = vmatpush3.bf16.msra.mxu0 %v6203_v35 }
 0x43c   :  { %5874 = vmatprep.subr.bf16.mxu0 %v6206_v41 }
 0x43e   :  { %6052 = vmatmul.mubr.msk.bf16.gmra.mxu0 %vm1192_vm8, %v3077_v11 }
 0x43f   :  { %5875 = vmatpush3.bf16.msra.mxu0 %v6207_v1 }
 0x440   :  { %5876 = vmatprep.subr.bf16.mxu0 %v6209_v53 }
 0x443   :  { %5877 = vmatpush3.bf16.msra.mxu0 %v6211_v6 }
 0x444   :  { %5878 = vmatprep.subr.bf16.mxu0 %v6212_v33 }
 0x447   :  { %5879 = vmatpush3.bf16.msra.mxu0 %v6213_v4 }
 0x448   :  { %5880 = vmatprep.subr.bf16.mxu0 %v6216_v42 }
 0x44b   :  { %5881 = vmatpush3.bf16.msra.mxu0 %v6217_v59 }
 0x45f   :  { %v5670_v46 = vpop.f32.mrf.mxu0 }
 0x461   :  { %v5671_v40 = vpop.f32.mrf.mxu0 }
 0x462   :  { %v7432_v36 = vadd.f32 %v5671_v40, %v5670_v46  ;;  %v7455_v46 = vld [vmem:[%s7951_s3 + $0x2] ss:$0 sm:$0xff] }
 0x463   :  { %v5673_v20 = vpop.f32.mrf.mxu0 }
 0x465   :  { %v5674_v25 = vpop.f32.mrf.mxu0 }
 0x466   :  { %v7434_v38 = vadd.f32 %v5674_v25, %v5673_v20  ;;  %v2732_v20 = vadd.f32 %v7432_v36, %v7455_v46 }
 0x468   :  { %v2735_v31 = vadd.f32 %v7434_v38, %v7455_v46 }
 0x46b   :  { %v5676_v45 = vpop.f32.mrf.mxu0 }
 0x46d   :  { %v5677_v26 = vpop.f32.mrf.mxu0 }
 0x46e   :  { %v7436_v29 = vadd.f32 %v5677_v26, %v5676_v45 }
 0x46f   :  { %v5679_v58 = vpop.f32.mrf.mxu0 }
 0x470   :  { %v2740_v5 = vadd.f32 %v7436_v29, %v7455_v46 }
 0x471   :  { %v5680_v16 = vpop.f32.mrf.mxu0 }
 0x472   :  { %v7438_v61 = vadd.f32 %v5680_v16, %v5679_v58 }
 0x474   :  { %v2743_v36 = vadd.f32 %v7438_v61, %v7455_v46 }
 0x477   :  { %v5682_v56 = vpop.f32.mrf.mxu0 }
 0x479   :  { %v5683_v57 = vpop.f32.mrf.mxu0 }
 0x47a   :  { %v7440_v32 = vadd.f32 %v5683_v57, %v5682_v56 }
 0x47b   :  { %v5685_v39 = vpop.f32.mrf.mxu0 }
 0x47c   :  { %v2748_v38 = vadd.f32 %v7440_v32, %v7455_v46  ;;  %v7474_v32 = vld [vmem:[%s7951_s3 + $0xc] ss:$0 sm:$0xff] }
 0x47d   :  { %v5686_v51 = vpop.f32.mrf.mxu0 }
 0x47e   :  { %v7442_v18 = vadd.f32 %v5686_v51, %v5685_v39 }
 0x480   :  { %v2751_v55 = vadd.f32 %v7442_v18, %v7455_v46 }
 0x49e   :  { %v5688_v47 = vpop.f32.mrf.mxu0 }
 0x4a0   :  { %v5689_v9 = vpop.f32.mrf.mxu0 }
 0x4a1   :  { %v5690_v30 = vadd.f32 %v5689_v9, %v5688_v47 }
 0x4a2   :  { %v5691_v23 = vpop.f32.mrf.mxu0 }
 0x4a3   :  { %v2756_v3 = vadd.f32 %v5690_v30, %v7455_v46 }
 0x4a4   :  { %v5692_v0 = vpop.f32.mrf.mxu0 }
 0x4a5   :  { %v5693_v28 = vadd.f32 %v5692_v0, %v5691_v23 }
 0x4a7   :  { %v2759_v23 = vadd.f32 %v5693_v28, %v7455_v46 }
 0x4ae   :  { %v5694_v27 = vpop.f32.mrf.mxu0 }
 0x4b0   :  { %v5695_v44 = vpop.f32.mrf.mxu0 }
 0x4b1   :  { %v7444_v54 = vadd.f32 %v5695_v44, %v5694_v27 }
 0x4b2   :  { %v5697_v22 = vpop.f32.mrf.mxu0 }
 0x4b3   :  { %v2764_v28 = vadd.f32 %v7444_v54, %v7455_v46 }
 0x4b4   :  { %v5698_v21 = vpop.f32.mrf.mxu0 }
 0x4b5   :  { %v7446_v13 = vadd.f32 %v5698_v21, %v5697_v22 }
 0x4b6   :  { %v5700_v50 = vpop.f32.mrf.mxu0 }
 0x4b8   :  { %v5701_v11 = vpop.f32.mrf.mxu0 }
 0x4b9   :  { %v7448_v34 = vadd.f32 %v5701_v11, %v5700_v50 }
 0x4ba   :  { %v5703_v7 = vpop.f32.mrf.mxu0 }
 0x4bc   :  { %v5704_v19 = vpop.f32.mrf.mxu0 }
 0x4bd   :  { %v7450_v37 = vadd.f32 %v5704_v19, %v5703_v7 }
 0x4be   :  { %v5722_v40 = vpop.f32.mrf.mxu0 }
 0x4c0   :  { %v5723_v8 = vpop.f32.mrf.mxu0 }
 0x4c1   :  { %v5724_v14 = vadd.f32 %v5723_v8, %v5722_v40 }
 0x4c2   :  { %v5725_v12 = vpop.f32.mrf.mxu0 }
 0x4c3   :  { %v2813_v25 = vadd.f32 %v5724_v14, %v2732_v20 }
 0x4c4   :  { %v5726_v45 = vpop.f32.mrf.mxu0 }
 0x4c5   :  { %v5727_v63 = vadd.f32 %v5726_v45, %v5725_v12 }
 0x4c6   :  { %v5728_v17 = vpop.f32.mrf.mxu0 }
 0x4c7   :  { %v2816_v26 = vadd.f32 %v5727_v63, %v2735_v31 }
 0x4c8   :  { %v5729_v49 = vpop.f32.mrf.mxu0 }
 0x4c9   :  { %v5730_v52 = vadd.f32 %v5729_v49, %v5728_v17  ;;  %v2767_v49 = vadd.f32 %v7446_v13, %v7455_v46 }
 0x4ca   :  { %v5731_v58 = vpop.f32.mrf.mxu0 }
 0x4cb   :  { %v2821_v24 = vadd.f32 %v5730_v52, %v2740_v5 }
 0x4cc   :  { %v5732_v16 = vpop.f32.mrf.mxu0 }
 0x4cd   :  { %v5733_v56 = vadd.f32 %v5732_v16, %v5731_v58  ;;  %v2987_v58 = vlaneseq }
 0x4ce   :  { %v5734_v57 = vpop.f32.mrf.mxu0 }
 0x4cf   :  { %v2824_v39 = vadd.f32 %v5733_v56, %v2743_v36  ;;  %v7496_v13 = vshrl.u32 %v2987_v58, 7 }
 0x4d0   :  { %v5735_v60 = vpop.f32.mrf.mxu0 }
 0x4d1   :  { %v5736_v62 = vadd.f32 %v5735_v60, %v5734_v57 }
 0x4d2   :  { %v5737_v10 = vpop.f32.mrf.mxu0  ;;  %v5774_v43 = vpop.f32.mrf.mxu1 }
 0x4d3   :  { %v2829_v51 = vadd.f32 %v5736_v62, %v2748_v38 }
 0x4d4   :  { %v5738_v35 = vpop.f32.mrf.mxu0  ;;  %v5775_v29 = vpop.f32.mrf.mxu1 }
 0x4d5   :  { %v5739_v41 = vadd.f32 %v5738_v35, %v5737_v10  ;;  %v5776_v2 = vadd.f32 %v5775_v29, %v5774_v43  ;;  %v2772_v35 = vadd.f32 %v7448_v34, %v7455_v46 }
 0x4d6   :  { %v5740_v1 = vpop.f32.mrf.mxu0  ;;  %v5777_v61 = vpop.f32.mrf.mxu1 }
 0x4d7   :  { %v7469_v48 = vadd.f32 %v5739_v41, %v2751_v55  ;;  %v2894_v53 = vadd.f32 %v5776_v2, %v2813_v25 }
 0x4d8   :  { %v5741_v15 = vpop.f32.mrf.mxu0  ;;  %v5778_v6 = vpop.f32.mrf.mxu1 }
 0x4d9   :  { %v5742_v33 = vadd.f32 %v5741_v15, %v5740_v1  ;;  %v5779_v4 = vadd.f32 %v5778_v6, %v5777_v61  ;;  %v2957_v59 = vmul.f32 %v7474_v32, %v2894_v53  ;;  %vm2941_vm14 = vcmp.gt.f32.partialorder %v2894_v53, 0.0 }
 0x4da   :  { %v5743_v42 = vpop.f32.mrf.mxu0  ;;  %v5780_v18 = vpop.f32.mrf.mxu1  ;;  %v7507_v15 = vadd.s32 40, %v7496_v13 }
 0x4db   :  { %v7478_v47 = vadd.f32 %v5742_v33, %v2756_v3  ;;  %v2897_v9 = vadd.f32 %v5779_v4, %v2816_v26  ;;  %v2969_v11 = vsel %vm2941_vm14, %v2894_v53, %v2957_v59 }
 0x4dc   :  { %v5744_v0 = vpop.f32.mrf.mxu0  ;;  %v5781_v27 = vpop.f32.mrf.mxu1 }
 0x4dd   :  { %vm2942_vm11 = vcmp.gt.f32.partialorder %v2897_v9, 0.0  ;;  %v2958_v44 = vmul.f32 %v7474_v32, %v2897_v9  ;;  %v5745_v22 = vadd.f32 %v5744_v0, %v5743_v42  ;;  %v5782_v21 = vadd.f32 %v5781_v27, %v5780_v18 }
 0x4de   :  { %v5746_v30 = vpop.f32.mrf.mxu0  ;;  %v5783_v50 = vpop.f32.mrf.mxu1 }
 0x4df   :  { %v2970_v7 = vsel %vm2942_vm11, %v2897_v9, %v2958_v44  ;;  %v7482_v19 = vadd.f32 %v5745_v22, %v2759_v23  ;;  %v2902_v40 = vadd.f32 %v5782_v21, %v2821_v24  ;;  %vm2999_vm11 = vcmp.lt.s32.totalorder %v7507_v15, 43 }
 0x4e0   :  { %v7484_v8 = vpack.c.bf16 %v2970_v7, %v2969_v11  ;;  %v5747_v20 = vpop.f32.mrf.mxu0  ;;  %v5784_v14 = vpop.f32.mrf.mxu1 }
 0x4e1   :  { %v5748_v12 = vadd.f32 %v5747_v20, %v5746_v30  ;;  %v5785_v25 = vadd.f32 %v5784_v14, %v5783_v50  ;;  %v2959_v63 = vmul.f32 %v7474_v32, %v2902_v40  ;;  %vm2943_vm12 = vcmp.gt.f32.partialorder %v2902_v40, 0.0 }
 0x4e2   :  { %v5749_v45 = vpop.f32.mrf.mxu0  ;;  %v5786_v31 = vpop.f32.mrf.mxu1  ;;  %v3000_v27 = vunpack.c.l.bf16 %v7484_v8  ;;  %v3001_v22 = vunpack.c.h.bf16 %v7484_v8 }
 0x4e3   :  { %v7489_v17 = vadd.f32 %v5748_v12, %v2764_v28  ;;  %v2905_v26 = vadd.f32 %v5785_v25, %v2824_v39  ;;  %v2971_v57 = vsel %vm2943_vm12, %v2902_v40, %v2959_v63 }
 0x4e4   :  { %v5750_v5 = vpop.f32.mrf.mxu0  ;;  %v5787_v52 = vpop.f32.mrf.mxu1 }
 0x4e5   :  { %vm2944_vm15 = vcmp.gt.f32.partialorder %v2905_v26, 0.0  ;;  %v2960_v24 = vmul.f32 %v7474_v32, %v2905_v26  ;;  %v5751_v54 = vadd.f32 %v5750_v5, %v5749_v45  ;;  %v5788_v16 = vadd.f32 %v5787_v52, %v5786_v31 }
 0x4e6   :  { %v5752_v36 = vpop.f32.mrf.mxu0  ;;  %v5789_v56 = vpop.f32.mrf.mxu1 }
 0x4e7   :  { %v2972_v60 = vsel %vm2944_vm15, %v2905_v26, %v2960_v24  ;;  %v7494_v38 = vadd.f32 %v5751_v54, %v2767_v49  ;;  %v2910_v62 = vadd.f32 %v5788_v16, %v2829_v51  ;;  %v2775_v51 = vadd.f32 %v7450_v37, %v7455_v46 }
 0x4e8   :  { %v2982_v39 = vpack.c.bf16 %v2972_v60, %v2971_v57  ;;  %v5753_v10 = vpop.f32.mrf.mxu0  ;;  %v5790_v43 = vpop.f32.mrf.mxu1 }
 0x4e9   :  { %v5754_v29 = vadd.f32 %v5753_v10, %v5752_v36  ;;  %v5791_v55 = vadd.f32 %v5790_v43, %v5789_v56  ;;  %v2961_v1 = vmul.f32 %v7474_v32, %v2910_v62  ;;  %vm2945_vm2 = vcmp.gt.f32.partialorder %v2910_v62, 0.0 }
 0x4ea   :  { %v5755_v41 = vpop.f32.mrf.mxu0  ;;  %v5792_v2 = vpop.f32.mrf.mxu1  ;;  %v3002_v21 = vunpack.c.l.bf16 %v2982_v39  ;;  %v3003_v40 = vunpack.c.h.bf16 %v2982_v39 }
 0x4eb   :  { %v7501_v61 = vadd.f32 %v5754_v29, %v2772_v35  ;;  %v2913_v53 = vadd.f32 %v5791_v55, %v7469_v48  ;;  %v2973_v59 = vsel %vm2945_vm2, %v2910_v62, %v2961_v1 }
 0x4ec   :  { %v5756_v6 = vpop.f32.mrf.mxu0  ;;  %v5793_v3 = vpop.f32.mrf.mxu1 }
 0x4ed   :  { %vm2946_vm14 = vcmp.gt.f32.partialorder %v2913_v53, 0.0  ;;  %v2962_v34 = vmul.f32 %v7474_v32, %v2913_v53  ;;  %v5757_v33 = vadd.f32 %v5756_v6, %v5755_v41  ;;  %v5794_v4 = vadd.f32 %v5793_v3, %v5792_v2 }
 0x4ee   :  { %v5795_v42 = vpop.f32.mrf.mxu1  ;;  %v6045_v18 = vpop.f32.mrf.mxu0 }
 0x4ef   :  { %v2974_v9 = vsel %vm2946_vm14, %v2913_v53, %v2962_v34  ;;  %v7510_v23 = vadd.f32 %v5757_v33, %v2775_v51  ;;  %v2918_v48 = vadd.f32 %v5794_v4, %v7478_v47 }
 0x4f0   :  { %v2983_v37 = vpack.c.bf16 %v2974_v9, %v2973_v59  ;;  %v5796_v46 = vpop.f32.mrf.mxu1  ;;  %v3162_v0 = vpop.f32.mrf.mxu0 }
 0x4f1   :  { %v5797_v44 = vadd.f32 %v5796_v46, %v5795_v42  ;;  %v2963_v20 = vmul.f32 %v7474_v32, %v2918_v48  ;;  %vm2947_vm12 = vcmp.gt.f32.partialorder %v2918_v48, 0.0 }
 0x4f2   :  { %v3004_v30 = vunpack.c.l.bf16 %v2983_v37  ;;  %v3005_v50 = vunpack.c.h.bf16 %v2983_v37  ;;  %v5798_v11 = vpop.f32.mrf.mxu1  ;;  %v6046_v7 = vpop.f32.mrf.mxu0 }
 0x4f3   :  { %v2921_v47 = vadd.f32 %v5797_v44, %v7482_v19  ;;  %v7518_v14 = vpack.c.bf16 %v6046_v7, %v6045_v18  ;;  %v3027_v19 = vmax.f32 %v3002_v21, %v3003_v40  ;;  %v2975_v24 = vsel %vm2947_vm12, %v2918_v48, %v2963_v20 }
 0x4f4   :  { %v3023_v28 = vsel %vm2999_vm11, %v3005_v50, -inf  ;;  %v3024_v12 = vmax.f32 %v3000_v27, %v3004_v30  ;;  %v5799_v25 = vpop.f32.mrf.mxu1  ;;  %v3165_v45 = vpop.f32.mrf.mxu0 }
 0x4f5   :  { %v3025_v8 = vmax.f32 %v3001_v22, %v3023_v28  ;;  %vm2948_vm15 = vcmp.gt.f32.partialorder %v2921_v47, 0.0  ;;  %v2964_v31 = vmul.f32 %v7474_v32, %v2921_v47  ;;  %v3227_v63 = vshrl.u32 %v7518_v14, 16 }
 0x4f6   :  { %v5800_v26 = vadd.f32 %v5799_v25, %v5798_v11  ;;  %v3209_v49 = vpack.c.bf16 %v3165_v45, %v3162_v0  ;;  %v5801_v5 = vpop.f32.mrf.mxu1  ;;  %v6049_v52 = vpop.f32.mrf.mxu0  ;;  %v3223_v62 = vshll.u32 %v7518_v14, 16  ;;  %v3244_v35 = vrot.slane %v7518_v14, 1 }
 0x4f7   :  { %v3026_v58 = vmax.f32 %v3024_v12, %v3025_v8  ;;  %v2976_v54 = vsel %vm2948_vm15, %v2921_v47, %v2964_v31  ;;  %v3253_v2 = vrot.slane %v3227_v63, 1 }
 0x4f8   :  { %v7524_v16 = vpack.c.bf16 %v2976_v54, %v2975_v24  ;;  %v2926_v36 = vadd.f32 %v5800_v26, %v7489_v17  ;;  %v3218_v56 = vshll.u32 %v3209_v49, 16  ;;  %v5802_v57 = vpop.f32.mrf.mxu1  ;;  %v3178_v60 = vpop.f32.mrf.mxu0  ;;  %v3216_v43 = vshrl.u32 %v3209_v49, 16 }
 0x4f9   :  { %v7528_v39 = vmax.f32 %v3026_v58, %v3027_v19  ;;  %v5803_v10 = vadd.f32 %v5802_v57, %v5801_v5  ;;  %v3243_v29 = vrot.slane %v3209_v49, 1  ;;  %v3225_v34 = vrot.slane %v3223_v62, 1 }
 0x4fa   :  { %v5804_v55 = vpop.f32.mrf.mxu1  ;;  %v6050_v41 = vpop.f32.mrf.mxu0  ;;  %v2965_v1 = vmul.f32 %v7474_v32, %v2926_v36  ;;  %v3220_v51 = vrot.slane %v3218_v56, 1  ;;  %vm2949_vm2 = vcmp.gt.f32.partialorder %v2926_v36, 0.0  ;;  %v3250_v33 = vrot.slane %v3216_v43, 1 }
 0x4fb   :  { %v2929_v17 = vadd.f32 %v5803_v10, %v7494_v38  ;;  %v7535_v53 = vpack.c.bf16 %v6050_v41, %v6049_v52  ;;  %v3251_v4 = vrot.slane %v3218_v56, 2  ;;  %v3254_v59 = vrot.slane %v3223_v62, 2 }
 0x4fc   :  { %v5805_v6 = vpop.f32.mrf.mxu1  ;;  %v3181_v3 = vpop.f32.mrf.mxu0  ;;  %v3221_v0 = vor.u32 %v3220_v51, %v3216_v43  ;;  %v3035_v27 = vunpack.c.l.bf16 %v7524_v16  ;;  %v2977_v44 = vsel %vm2949_vm2, %v2926_v36, %v2965_v1  ;;  %v3036_v30 = vunpack.c.h.bf16 %v7524_v16 }
 0x4fd   :  { %vm2950_vm14 = vcmp.gt.f32.partialorder %v2929_v17, 0.0  ;;  %v2966_v42 = vmul.f32 %v7474_v32, %v2929_v17  ;;  %v3266_v18 = vshll.u32 %v7535_v53, 16  ;;  %v3264_v9 = vshrl.u32 %v7535_v53, 16 }
 0x4fe   :  { %v5806_v48 = vadd.f32 %v5805_v6, %v5804_v55  ;;  %v7540_v37 = vpack.c.bf16 %v3181_v3, %v3178_v60  ;;  %v5807_v38 = vpop.f32.mrf.mxu1  ;;  %v6053_v46 = vpop.f32.mrf.mxu0  ;;  %v3226_v7 = vsel %vm238_vm4, %v3221_v0, %v3225_v34  ;;  %v3289_v47 = vrot.slane %v7535_v53, 1 }
 0x4ff   :  { %v2978_v22 = vsel %vm2950_vm14, %v2929_v17, %v2966_v42  ;;  %v3268_v21 = vrot.slane %v3266_v18, 1  ;;  %3641 = vmatprep.mubr.bf16.mxu1 %v3226_v7  ;;  %v3252_v12 = vor.u32 %v3251_v4, %v3250_v33  ;;  %v3255_v25 = vor.u32 %v3254_v59, %v3253_v2 }
 0x500   :  { %v7545_v50 = vpack.c.bf16 %v2978_v22, %v2977_v44  ;;  %v2934_v11 = vadd.f32 %v5806_v48, %v7501_v61  ;;  %v5808_v40 = vpop.f32.mrf.mxu1  ;;  %v3194_v20 = vpop.f32.mrf.mxu0  ;;  %v3235_v28 = vshrl.u32 %v7540_v37, 16  ;;  %v7551_v8 = vrot.slane %v3264_v9, 1  ;;  %3642 = vmatmul.mubr.bf16.vlgmr.msra.gmra.mxu1 %v3209_v49 }
 0x501   :  { %v3269_v45 = vor.u32 %v3268_v21, %v3264_v9  ;;  %v7553_v31 = vrot.slane %v3266_v18, 2  ;;  %v3245_v61 = vsel %vm287_vm3, %v3243_v29, %v3244_v35  ;;  %v3256_v52 = vsel %vm301_vm5, %v3252_v12, %v3255_v25 }
 0x502   :  { %v6054_v26 = vpop.f32.mrf.mxu0  ;;  %v2967_v5 = vmul.f32 %v7474_v32, %v2934_v11  ;;  %v5809_v19 = vadd.f32 %v5808_v40, %v5807_v38  ;;  %v3037_v24 = vunpack.c.l.bf16 %v7545_v50  ;;  %v3038_v54 = vunpack.c.h.bf16 %v7545_v50  ;;  %3714 = vmatprep.mubr.bf16.mxu0 %v3256_v52 }
 0x503   :  { %v7560_v58 = vpack.c.bf16 %v6054_v26, %v6053_v46  ;;  %vm2951_vm12 = vcmp.gt.f32.partialorder %v2934_v11, 0.0  ;;  %v3231_v49 = vshll.u32 %v7540_v37, 16  ;;  %3715 = vmatmul.mubr.bf16.vlgmr.msra.gmra.mxu0 %v3245_v61  ;;  %v3257_v62 = vrot.slane %v3235_v28, 1 }
 0x504   :  { %v3197_v36 = vpop.f32.mrf.mxu0  ;;  %v2937_v56 = vadd.f32 %v5809_v19, %v7510_v23  ;;  %v3229_v43 = vor.u32 %v3227_v63, %v3225_v34  ;;  %v2979_v41 = vsel %vm2951_vm12, %v2934_v11, %v2967_v5  ;;  %v3246_v1 = vrot.slane %v7540_v37, 1 }
 0x505   :  { %v3279_v57 = vshll.u32 %v7560_v58, 16  ;;  %v3283_v60 = vshrl.u32 %v7560_v58, 16  ;;  %v7568_v10 = vpack.c.bf16 %v3197_v36, %v3194_v20  ;;  %v3233_v29 = vrot.slane %v3231_v49, 1 }
 0x506   :  { %v3258_v55 = vrot.slane %v3231_v49, 2  ;;  %vm2952_vm15 = vcmp.gt.f32.partialorder %v2937_v56, 0.0  ;;  %v2968_v2 = vmul.f32 %v7474_v32, %v2937_v56  ;;  %v3247_v48 = vsel %vm287_vm3, %v3244_v35, %v3246_v1 }
 0x507   :  { %v3281_v17 = vrot.slane %v3279_v57, 1  ;;  %v3301_v23 = vrot.slane %v3283_v60, 1  ;;  %v3271_v51 = vshll.u32 %v7568_v10, 16  ;;  %v3275_v6 = vshrl.u32 %v7568_v10, 16 }
 0x508   :  { %v2980_v3 = vsel %vm2952_vm15, %v2937_v56, %v2968_v2  ;;  %v3290_v33 = vrot.slane %v7568_v10, 1  ;;  %v3234_v63 = vsel %vm238_vm4, %v3229_v43, %v3233_v29  ;;  %v3259_v34 = vor.u32 %v3258_v55, %v3257_v62 }
 0x509   :  { %v2986_v4 = vpack.c.bf16 %v2980_v3, %v2979_v41  ;;  %v3273_v42 = vrot.slane %v3271_v51, 1  ;;  %v3297_v18 = vrot.slane %v3275_v6, 1  ;;  %v3298_v32 = vrot.slane %v3271_v51, 2  ;;  %3649 = vmatprep.mubr.bf16.mxu1 %v3234_v63 }
 0x50a   :  { %v3302_v59 = vrot.slane %v3279_v57, 2  ;;  %v3260_v9 = vsel %vm301_vm5, %v3255_v25, %v3259_v34  ;;  %3650 = vmatmul.mubr.bf16.gmra.mxu1 %v7518_v14  ;;  %v3237_v38 = vor.u32 %v3235_v28, %v3233_v29  ;;  %v3296_v50 = vor.u32 %v7553_v31, %v7551_v8 }
 0x50b   :  { %v3039_v46 = vunpack.c.l.bf16 %v2986_v4  ;;  %v3040_v0 = vunpack.c.h.bf16 %v2986_v4  ;;  %v3277_v44 = vor.u32 %v3275_v6, %v3273_v42  ;;  %3722 = vmatprep.mubr.bf16.mxu0 %v3260_v9  ;;  %v3274_v22 = vsel %vm238_vm4, %v3269_v45, %v3273_v42  ;;  %v6219_v9 = vld [vmem:[#allocation2 + $0x460] sm:$0xff]  }
 0x50c   :  { %3723 = vmatmul.mubr.bf16.gmra.mxu0 %v3247_v48  ;;  %v3306_v21 = vrot.slane %v3274_v22, 4  ;;  %v3299_v11 = vor.u32 %v3298_v32, %v3297_v18  ;;  %v3291_v7 = vsel %vm287_vm3, %v3289_v47, %v3290_v33  ;;  %v3305_v40 = vrot.slane %v7535_v53, 4  ;;  %v6218_v32 = vld [vmem:[#allocation2 + $0x468] sm:$0xff]   ;;  %v6221_v48 = vld [vmem:[#allocation2 + $0x450] sm:$0xff]  }
 0x50d   :  { %v3046_v14 = vsel %vm2999_vm11, %v3040_v0, -inf  ;;  %v3047_v35 = vmax.f32 %v3035_v27, %v3039_v46  ;;  %v3282_v20 = vsel %vm238_vm4, %v3277_v44, %v3281_v17  ;;  %v3029_v47 = vrot.slane %v7528_v39, 4  ;;  %v6223_v46 = vld [vmem:[#allocation2 + $0x440] sm:$0xff]   ;;  %v6224_v0 = vld [vmem:[#allocation2 + $0x438] sm:$0xff]   ;;  %v6225_v44 = vld [vmem:[#allocation2 + $0x430] sm:$0xff]  }
 0x50e   :  { %v3048_v28 = vmax.f32 %v3036_v30, %v3046_v14  ;;  %v3338_v12 = vsel %vm108_vm0, %v3237_v38, %v3306_v21  ;;  %v3311_v25 = vrot.slane %v3282_v20, 4  ;;  %v3300_v45 = vsel %vm301_vm5, %v3296_v50, %v3299_v11  ;;  %v6222_v38 = vld [vmem:[#allocation2 + $0x448] sm:$0xff]  }
 0x50f   :  { %3657 = vmatprep.mubr.bf16.mxu1 %v3338_v12  ;;  %v3308_v15 = vrot.slane %v3300_v45, 4  ;;  %v3307_v8 = vrot.slane %v3291_v7, 4  ;;  %v3303_v31 = vor.u32 %v3302_v59, %v3301_v23  ;;  %v3050_v61 = vmax.f32 %v3037_v24, %v3038_v54  ;;  %v6226_v22 = vld [vmem:[#allocation2 + $0x488] sm:$0xff]  }
 0x510   :  { %v3049_v27 = vmax.f32 %v3047_v35, %v3048_v28  ;;  %v3312_v53 = vsel %vm108_vm0, %v3306_v21, %v3311_v25  ;;  %v3334_v26 = vsel %vm108_vm0, %v7540_v37, %v3305_v40  ;;  %v3292_v52 = vrot.slane %v7560_v58, 1  ;;  %v6227_v21 = vld [vmem:[#allocation2 + $0x480] sm:$0xff]  }
 0x511   :  { %v3346_v16 = vsel %vm108_vm0, %v3259_v34, %v3308_v15  ;;  %v3304_v30 = vsel %vm301_vm5, %v3299_v11, %v3303_v31  ;;  %v3342_v36 = vsel %vm108_vm0, %v3246_v1, %v3307_v8  ;;  %v3030_v24 = vmax.f32 %v7528_v39, %v3029_v47  ;;  %v7637_v11 = vld [vmem:[%s7951_s3 + $0x3] ss:$0 sm:$0xff] }
 0x512   :  { %v3051_v5 = vmax.f32 %v3049_v27, %v3050_v61  ;;  %3658 = vmatmul.mubr.bf16.gmra.mxu1 %v3334_v26  ;;  %3730 = vmatprep.mubr.bf16.mxu0 %v3346_v16  ;;  %v3315_v19 = vrot.slane %v3304_v30, 4  ;;  %v3285_v37 = vor.u32 %v3283_v60, %v3281_v17  ;;  %v3293_v56 = vsel %vm287_vm3, %v3290_v33, %v3292_v52 }
 0x513   :  { %3665 = vmatprep.mubr.bf16.mxu1 %v3312_v53  ;;  %v3309_v57 = vrot.slane %v7568_v10, 4  ;;  %v3031_v62 = vrot.slane %v3030_v24, 2  ;;  %v3313_v29 = vrot.slane %v3293_v56, 4  ;;  %v3323_v23 = vrot.slane %v3303_v31, 4 }
 0x514   :  { %v3052_v54 = vrot.slane %v3051_v5, 4  ;;  %3731 = vmatmul.mubr.bf16.gmra.mxu0 %v3342_v36  ;;  %v3316_v49 = vsel %vm108_vm0, %v3308_v15, %v3315_v19  ;;  %v3319_v41 = vrot.slane %v3285_v37, 4  ;;  %vm3058_vm11 = vcmask 1040384  }
 0x515   :  { %3738 = vmatprep.mubr.bf16.mxu0 %v3316_v49  ;;  %v3032_v55 = vmax.f32 %v3030_v24, %v3031_v62  ;;  %v3310_v39 = vsel %vm108_vm0, %v3305_v40, %v3309_v57  ;;  %v3314_v60 = vsel %vm108_vm0, %v3307_v8, %v3313_v29  ;;  %v3324_v10 = vsel %vm108_vm0, %v3315_v19, %v3323_v23  ;;  %v7643_v8 = vld [vmem:[%s7951_s3 + $0xd] ss:$0 sm:$0xff] }
 0x516   :  { %v3053_v43 = vmax.f32 %v3051_v5, %v3052_v54  ;;  %v3320_v1 = vsel %vm108_vm0, %v3311_v25, %v3319_v41  ;;  %v3317_v63 = vrot.slane %v7560_v58, 4  ;;  %v3321_v42 = vrot.slane %v3292_v52, 4  ;;  %v6220_v58 = vld [vmem:[#allocation2 + $0x458] sm:$0xff]  }
 0x517   :  { %v3033_v51 = vrot.slane %v3032_v55, 1  ;;  %v6314_v59 = vmov 0  }
 0x518   :  { %v3054_v2 = vrot.slane %v3053_v43, 2  ;;  %v3318_v4 = vsel %vm108_vm0, %v3309_v57, %v3317_v63  ;;  %v3322_v18 = vsel %vm108_vm0, %v3313_v29, %v3321_v42  ;;  %4111 = vmatprep.subr.bf16.mxu1 %v6314_v59 }
 0x519   :  { %v3034_v3 = vmax.f32 %v3032_v55, %v3033_v51  ;;  %4112 = vmatpush1.bf16.msra.mxu1 %v6218_v32  ;;  %v6228_v55 = vld [vmem:[#allocation2 + $0x478] sm:$0xff]  }
 0x51a   :  { %3666 = vmatmul.mubr.bf16.gmra.mxu1 %v3310_v39  ;;  %v3055_v6 = vmax.f32 %v3053_v43, %v3054_v2  ;;  %4113 = vmatprep.subr.bf16.mxu1 %v6314_v59 }
 0x51b   :  { %3673 = vmatprep.mubr.bf16.mxu1 %v3320_v1 }
 0x51c   :  { %3739 = vmatmul.mubr.bf16.gmra.mxu0 %v3314_v60  ;;  %v3056_v17 = vrot.slane %v3055_v6, 1 }
 0x51d   :  { %3746 = vmatprep.mubr.bf16.mxu0 %v3324_v10  ;;  %4114 = vmatpush1.bf16.msra.mxu1 %v6219_v9  ;;  %v6229_v9 = vld [vmem:[#allocation2 + $0x470] sm:$0xff]  }
 0x51e   :  { %v3057_v33 = vmax.f32 %v3055_v6, %v3056_v17  ;;  %4115 = vmatprep.subr.bf16.mxu1 %v6314_v59 }
 0x520   :  { %v7619_v34 = vsel %vm3058_vm11, %v3034_v3, %v3057_v33 }
 0x521   :  { %4116 = vmatpush1.bf16.msra.mxu1 %v6220_v58 }
 0x522   :  { %3674 = vmatmul.mubr.bf16.gmra.mxu1 %v3318_v4  ;;  %4117 = vmatprep.subr.bf16.mxu1 %v6314_v59 }
 0x524   :  { %3747 = vmatmul.mubr.bf16.gmra.mxu0 %v3322_v18 }
 0x525   :  { %4118 = vmatpush1.bf16.msra.mxu1 %v6221_v48 }
 0x526   :  { %4119 = vmatprep.subr.bf16.mxu1 %v6314_v59 }
 0x529   :  { %4120 = vmatpush1.bf16.msra.mxu1 %v6222_v38 }
 0x52a   :  { %4121 = vmatprep.subr.bf16.mxu1 %v6314_v59 }
 0x52d   :  { %4122 = vmatpush1.bf16.msra.mxu1 %v6223_v46 }
 0x52e   :  { %4123 = vmatprep.subr.bf16.mxu1 %v6314_v59 }
 0x531   :  { %4124 = vmatpush1.bf16.msra.mxu1 %v6224_v0 }
 0x532   :  { %4125 = vmatprep.subr.bf16.mxu1 %v6314_v59 }
 0x535   :  { %4126 = vmatpush1.bf16.msra.mxu1 %v6225_v44 }
 0x536   :  { %4135 = vmatprep.subr.bf16.mxu1 %v6314_v59 }
 0x539   :  { %4136 = vmatpush2.bf16.msra.mxu1 %v6226_v22 }
 0x53a   :  { %4137 = vmatprep.subr.bf16.mxu1 %v6314_v59 }
 0x53d   :  { %4138 = vmatpush2.bf16.msra.mxu1 %v6227_v21 }
 0x53e   :  { %4139 = vmatprep.subr.bf16.mxu1 %v6314_v59 }
 0x541   :  { %4140 = vmatpush2.bf16.msra.mxu1 %v6228_v55 }
 0x542   :  { %4141 = vmatprep.subr.bf16.mxu1 %v6314_v59 }
 0x545   :  { %4142 = vmatpush2.bf16.msra.mxu1 %v6229_v9 }
 0x5c0   :  { %v5836_v50 = vpop.f32.mrf.mxu1 }
 0x5c2   :  { %v5837_v7 = vpop.f32.mrf.mxu1 }
 0x5c3   :  { %v5882_v14 = vpop.f32.mrf.mxu0  ;;  %v5838_v35 = vadd.f32 %v5837_v7, %v5836_v50 }
 0x5c4   :  { %v5839_v40 = vpop.f32.mrf.mxu1 }
 0x5c5   :  { %v3644_v20 = vadd.f32 %v5838_v35, %v7637_v11  ;;  %v5883_v28 = vpop.f32.mrf.mxu0 }
 0x5c6   :  { %v5884_v12 = vadd.f32 %v5883_v28, %v5882_v14  ;;  %v5840_v25 = vpop.f32.mrf.mxu1 }
 0x5c7   :  { %v5885_v45 = vpop.f32.mrf.mxu0  ;;  %v5841_v47 = vadd.f32 %v5840_v25, %v5839_v40 }
 0x5c8   :  { %v3717_v15 = vadd.f32 %v5884_v12, %v3644_v20 }
 0x5c9   :  { %v3647_v31 = vadd.f32 %v5841_v47, %v7637_v11  ;;  %v5886_v61 = vpop.f32.mrf.mxu0 }
 0x5ca   :  { %v5842_v27 = vpop.f32.mrf.mxu1  ;;  %v5887_v53 = vadd.f32 %v5886_v61, %v5885_v45  ;;  %v3770_v30 = vmul.f32 %v7643_v8, %v3717_v15  ;;  %vm3756_vm2 = vcmp.gt.f32.partialorder %v3717_v15, 0.0 }
 0x5cc   :  { %v5888_v26 = vpop.f32.mrf.mxu0  ;;  %v5843_v16 = vpop.f32.mrf.mxu1  ;;  %v3720_v5 = vadd.f32 %v5887_v53, %v3647_v31  ;;  %v3780_v57 = vsel %vm3756_vm2, %v3717_v15, %v3770_v30 }
 0x5cd   :  { %v5844_v52 = vadd.f32 %v5843_v16, %v5842_v27 }
 0x5ce   :  { %v5889_v19 = vpop.f32.mrf.mxu0  ;;  %v5845_v36 = vpop.f32.mrf.mxu1  ;;  %vm3757_vm14 = vcmp.gt.f32.partialorder %v3720_v5, 0.0  ;;  %v3771_v24 = vmul.f32 %v7643_v8, %v3720_v5 }
 0x5cf   :  { %v3652_v54 = vadd.f32 %v5844_v52, %v7637_v11  ;;  %v5890_v49 = vadd.f32 %v5889_v19, %v5888_v26 }
 0x5d0   :  { %v5891_v37 = vpop.f32.mrf.mxu0  ;;  %v5846_v56 = vpop.f32.mrf.mxu1  ;;  %v3781_v62 = vsel %vm3757_vm14, %v3720_v5, %v3771_v24 }
 0x5d1   :  { %v3725_v43 = vadd.f32 %v5890_v49, %v3652_v54  ;;  %v5847_v29 = vadd.f32 %v5846_v56, %v5845_v36  ;;  %v7649_v41 = vpack.c.bf16 %v3781_v62, %v3780_v57 }
 0x5d2   :  { %v5892_v2 = vpop.f32.mrf.mxu0  ;;  %v5848_v39 = vpop.f32.mrf.mxu1 }
 0x5d3   :  { %v3655_v1 = vadd.f32 %v5847_v29, %v7637_v11  ;;  %v5893_v23 = vadd.f32 %v5892_v2, %v5891_v37  ;;  %v7653_v60 = vshrl.u32 %v7649_v41, 16  ;;  %v7656_v10 = vshll.u32 %v7649_v41, 16 }
 0x5d4   :  { %v5849_v51 = vpop.f32.mrf.mxu1  ;;  %v5894_v6 = vpop.f32.mrf.mxu0  ;;  %v3772_v17 = vmul.f32 %v7643_v8, %v3725_v43  ;;  %vm3758_vm12 = vcmp.gt.f32.partialorder %v3725_v43, 0.0  ;;  %v3822_v35 = vrot.slane %v7649_v41, 1 }
 0x5d5   :  { %v3728_v3 = vadd.f32 %v5893_v23, %v3655_v1  ;;  %v5850_v33 = vadd.f32 %v5849_v51, %v5848_v39  ;;  %v3800_v42 = vrot.slane %v7656_v10, 1  ;;  %v3831_v18 = vrot.slane %v7653_v60, 1 }
 0x5d6   :  { %v5851_v63 = vpop.f32.mrf.mxu1  ;;  %v5895_v4 = vpop.f32.mrf.mxu0  ;;  %v3832_v32 = vrot.slane %v7656_v10, 2  ;;  %v3782_v0 = vsel %vm3758_vm12, %v3725_v43, %v3772_v17  ;;  %v3853_v40 = vrot.slane %v7653_v60, 2  ;;  %v3854_v27 = vrot.slane %v7656_v10, 3 }
 0x5d7   :  { %vm3759_vm15 = vcmp.gt.f32.partialorder %v3728_v3, 0.0  ;;  %v3773_v58 = vmul.f32 %v7643_v8, %v3728_v3  ;;  %v3660_v48 = vadd.f32 %v5850_v33, %v7637_v11  ;;  %v5896_v59 = vadd.f32 %v5895_v4, %v5894_v6 }
 0x5d8   :  { %v5852_v38 = vpop.f32.mrf.mxu1  ;;  %v5897_v46 = vpop.f32.mrf.mxu0  ;;  %v3801_v12 = vor.u32 %v3800_v42, %v7653_v60  ;;  %v3833_v25 = vor.u32 %v3832_v32, %v3831_v18  ;;  %v3855_v17 = vor.u32 %v3854_v27, %v3853_v40 }
 0x5d9   :  { %v3783_v44 = vsel %vm3759_vm15, %v3728_v3, %v3773_v58  ;;  %v3733_v22 = vadd.f32 %v5896_v59, %v3660_v48  ;;  %v5853_v21 = vadd.f32 %v5852_v38, %v5851_v63 }
 0x5da   :  { %v7665_v50 = vpack.c.bf16 %v3783_v44, %v3782_v0  ;;  %v5854_v7 = vpop.f32.mrf.mxu1  ;;  %v5898_v14 = vpop.f32.mrf.mxu0 }
 0x5db   :  { %v3663_v20 = vadd.f32 %v5853_v21, %v7637_v11  ;;  %v5899_v28 = vadd.f32 %v5898_v14, %v5897_v46  ;;  %vm3760_vm2 = vcmp.gt.f32.partialorder %v3733_v22, 0.0  ;;  %v3774_v53 = vmul.f32 %v7643_v8, %v3733_v22 }
 0x5dc   :  { %v5855_v45 = vpop.f32.mrf.mxu1  ;;  %v5900_v47 = vpop.f32.mrf.mxu0  ;;  %v3823_v15 = vrot.slane %v7665_v50, 1  ;;  %v3803_v31 = vshll.u32 %v7665_v50, 16  ;;  %v3807_v61 = vshrl.u32 %v7665_v50, 16 }
 0x5dd   :  { %v3736_v26 = vadd.f32 %v5899_v28, %v3663_v20  ;;  %v5856_v16 = vadd.f32 %v5855_v45, %v5854_v7  ;;  %v3784_v2 = vsel %vm3760_vm2, %v3733_v22, %v3774_v53 }
 0x5de   :  { %v5857_v30 = vpop.f32.mrf.mxu1  ;;  %v5901_v5 = vpop.f32.mrf.mxu0  ;;  %v3824_v52 = vsel %vm287_vm3, %v3822_v35, %v3823_v15  ;;  %v3805_v19 = vrot.slane %v3803_v31, 1  ;;  %v3834_v36 = vrot.slane %v3807_v61, 1  ;;  %v3835_v24 = vrot.slane %v3803_v31, 2 }
 0x5df   :  { %vm3761_vm14 = vcmp.gt.f32.partialorder %v3736_v26, 0.0  ;;  %v3775_v54 = vmul.f32 %v7643_v8, %v3736_v26  ;;  %v3668_v49 = vadd.f32 %v5856_v16, %v7637_v11  ;;  %v5902_v37 = vadd.f32 %v5901_v5, %v5900_v47  ;;  %3827 = vrot.lane.b32.xlu1 %v3824_v52, %s6309_s18 }
 0x5e0   :  { %v5858_v56 = vpop.f32.mrf.mxu1  ;;  %v5903_v57 = vpop.f32.mrf.mxu0  ;;  %v3806_v62 = vsel %vm238_vm4, %v3801_v12, %v3805_v19  ;;  %v3836_v43 = vor.u32 %v3835_v24, %v3834_v36  ;;  %v3856_v29 = vrot.slane %v3807_v61, 2  ;;  %v3857_v55 = vrot.slane %v3803_v31, 3 }
 0x5e1   :  { %v3785_v39 = vsel %vm3761_vm14, %v3736_v26, %v3775_v54  ;;  %v3741_v1 = vadd.f32 %v5902_v37, %v3668_v49  ;;  %v5859_v23 = vadd.f32 %v5858_v56, %v5857_v30  ;;  %3815 = vrot.lane.b32.xlu0 %v3806_v62, %s6312_s12  ;;  %v3809_v4 = vor.u32 %v3807_v61, %v3805_v19 }
 0x5e2   :  { %v7683_v51 = vpack.c.bf16 %v3785_v39, %v3784_v2  ;;  %v5860_v6 = vpop.f32.mrf.mxu1  ;;  %v5904_v60 = vpop.f32.mrf.mxu0  ;;  %v3837_v10 = vsel %vm301_vm5, %v3833_v25, %v3836_v43  ;;  %v3858_v3 = vor.u32 %v3857_v55, %v3856_v29 }
 0x5e3   :  { %v3671_v33 = vadd.f32 %v5859_v23, %v7637_v11  ;;  %v5905_v63 = vadd.f32 %v5904_v60, %v5903_v57  ;;  %3844 = vrot.lane.b32.xlu1 %v3837_v10, %s6313_s13  ;;  %vm3762_vm12 = vcmp.gt.f32.partialorder %v3741_v1, 0.0  ;;  %v3776_v59 = vmul.f32 %v7643_v8, %v3741_v1 }
 0x5e4   :  { %v5861_v42 = vpop.f32.mrf.mxu1  ;;  %v5906_v18 = vpop.f32.mrf.mxu0  ;;  %v3859_v32 = vsel %vm1109_vm10, %v3855_v17, %v3858_v3  ;;  %v3825_v9 = vrot.slane %v7683_v51, 1  ;;  %v3811_v58 = vshll.u32 %v7683_v51, 16  ;;  %v3838_v48 = vshrl.u32 %v7683_v51, 16 }
 0x5e5   :  { %v3744_v38 = vadd.f32 %v5905_v63, %v3671_v33  ;;  %v5862_v46 = vadd.f32 %v5861_v42, %v5860_v6  ;;  %3864 = vrot.lane.b32.xlu0 %v3859_v32, %s6312_s12 }
 0x5e6   :  { %v5863_v0 = vpop.f32.mrf.mxu1  ;;  %v5907_v44 = vpop.f32.mrf.mxu0  ;;  %v3826_v22 = vsel %vm287_vm3, %v3823_v15, %v3825_v9  ;;  %v3813_v21 = vrot.slane %v3811_v58, 1  ;;  %v3840_v7 = vrot.slane %v3838_v48, 1  ;;  %v3841_v14 = vrot.slane %v3811_v58, 2 }
 0x5e7   :  { %vm3763_vm15 = vcmp.gt.f32.partialorder %v3744_v38, 0.0  ;;  %v3777_v35 = vmul.f32 %v7643_v8, %v3744_v38  ;;  %v3676_v40 = vadd.f32 %v5862_v46, %v7637_v11  ;;  %v5908_v20 = vadd.f32 %v5907_v44, %v5906_v18  ;;  %3829 = vrot.lane.b32.xlu1 %v3826_v22, %s6309_s18 }
 0x5e8   :  { %v5864_v28 = vpop.f32.mrf.mxu1  ;;  %v5909_v12 = vpop.f32.mrf.mxu0  ;;  %v3814_v25 = vsel %vm238_vm4, %v3809_v4, %v3813_v21  ;;  %v3842_v45 = vor.u32 %v3841_v14, %v3840_v7  ;;  %v3860_v47 = vrot.slane %v3838_v48, 2  ;;  %v3861_v31 = vrot.slane %v3811_v58, 3 }
 0x5e9   :  { %v3786_v15 = vsel %vm3762_vm12, %v3741_v1, %v3776_v59  ;;  %v3787_v61 = vsel %vm3763_vm15, %v3744_v38, %v3777_v35  ;;  %v3749_v27 = vadd.f32 %v5908_v20, %v3676_v40  ;;  %v5865_v53 = vadd.f32 %v5864_v28, %v5863_v0  ;;  %3817 = vrot.lane.b32.xlu0 %v3814_v25, %s6312_s12 }
 0x5ea   :  { %v7701_v26 = vpack.c.bf16 %v3787_v61, %v3786_v15  ;;  %v5910_v16 = vpop.f32.mrf.mxu0  ;;  %v3843_v30 = vsel %vm301_vm5, %v3836_v43, %v3842_v45  ;;  %v3862_v5 = vor.u32 %v3861_v31, %v3860_v47  ;;  %v3888_v39 = vor.u32 %v3838_v48, %v3813_v21 }
 0x5eb   :  { %v3679_v52 = vadd.f32 %v5865_v53, %v7637_v11  ;;  %v5911_v19 = vadd.f32 %v5910_v16, %v5909_v12  ;;  %3846 = vrot.lane.b32.xlu1 %v3843_v30, %s6313_s13  ;;  %v3778_v37 = vmul.f32 %v7643_v8, %v3749_v27  ;;  %vm3764_vm2 = vcmp.gt.f32.partialorder %v3749_v27, 0.0 }
 0x5ec   :  { %v3863_v36 = vsel %vm1109_vm10, %v3858_v3, %v3862_v5  ;;  %v3913_v24 = vrot.slane %v7701_v26, 1  ;;  %v3890_v54 = vshll.u32 %v7701_v26, 16  ;;  %v3894_v49 = vshrl.u32 %v7701_v26, 16 }
 0x5ed   :  { %v3752_v56 = vadd.f32 %v5911_v19, %v3679_v52  ;;  %3866 = vrot.lane.b32.xlu0 %v3863_v36, %s6312_s12  ;;  %v3788_v55 = vsel %vm3764_vm2, %v3749_v27, %v3778_v37  ;;  %v3849_v35 = vrot.slane %v7665_v50, 2  ;;  %v3848_v28 = vrot.slane %v7649_v41, 2 }
 0x5ee   :  { %v3892_v57 = vrot.slane %v3890_v54, 1  ;;  %v3914_v62 = vsel %vm287_vm3, %v3825_v9, %v3913_v24  ;;  %v3941_v43 = vrot.slane %v3894_v49, 2  ;;  %v3942_v29 = vrot.slane %v3890_v54, 3 }
 0x5ef   :  { %vm3765_vm14 = vcmp.gt.f32.partialorder %v3752_v56, 0.0  ;;  %v3779_v11 = vmul.f32 %v7643_v8, %v3752_v56  ;;  %v3923_v6 = vrot.slane %v3894_v49, 1  ;;  %v3924_v60 = vrot.slane %v3890_v54, 2 }
 0x5f0   :  { %v3893_v23 = vsel %vm238_vm4, %v3888_v39, %v3892_v57  ;;  %v3943_v17 = vor.u32 %v3942_v29, %v3941_v43  ;;  %v3896_v32 = vor.u32 %v3894_v49, %v3892_v57  ;;  %v3850_v25 = vsel %vm1099_vm6, %v3848_v28, %v3849_v35  ;;  %v6239_v28 = vld [vmem:[#allocation2 + $0x540] sm:$0xff]  }
 0x5f1   :  { %v3789_v2 = vsel %vm3765_vm14, %v3752_v56, %v3779_v11  ;;  %3917 = vrot.lane.b32.xlu0 %v3914_v62, %s6309_s18  ;;  %v3925_v9 = vor.u32 %v3924_v60, %v3923_v6  ;;  %v3851_v27 = vrot.slane %v7683_v51, 2  ;;  %v3937_v49 = vrot.slane %v7701_v26, 2 }
 0x5f2   :  { %v7715_v1 = vpack.c.bf16 %v3789_v2, %v3788_v55  ;;  %v3944_v18 = vsel %vm1109_vm10, %v3862_v5, %v3943_v17 }
 0x5f3   :  { %v3926_v46 = vsel %vm301_vm5, %v3842_v45, %v3925_v9  ;;  %v3852_v30 = vsel %vm1099_vm6, %v3849_v35, %v3851_v27  ;;  %v3938_v11 = vsel %vm1099_vm6, %v3851_v27, %v3937_v49  ;;  %v6235_v35 = vld [vmem:[#allocation2 + $0x548] sm:$0xff]   ;;  %v6247_v27 = vld [vmem:[#allocation2 + $0x530] sm:$0xff]  }
 0x5f4   :  { %v3915_v10 = vrot.slane %v7715_v1, 1  ;;  %v3898_v8 = vshll.u32 %v7715_v1, 16  ;;  %v3902_v3 = vshrl.u32 %v7715_v1, 16  ;;  %v3939_v56 = vrot.slane %v7715_v1, 2 }
 0x5f5   :  { %3905 = vrot.lane.b32.xlu0 %v3893_v23, %s6312_s12 }
 0x5f6   :  { %v3916_v33 = vsel %vm287_vm3, %v3913_v24, %v3915_v10  ;;  %v3900_v63 = vrot.slane %v3898_v8, 1  ;;  %v3945_v4 = vrot.slane %v3902_v3, 2  ;;  %v3946_v42 = vrot.slane %v3898_v8, 3 }
 0x5f7   :  { %3919 = vrot.lane.b32.xlu1 %v3916_v33, %s6309_s18  ;;  %v3927_v59 = vrot.slane %v3902_v3, 1  ;;  %v3928_v38 = vrot.slane %v3898_v8, 2  ;;  %v3940_v29 = vsel %vm1099_vm6, %v3937_v49, %v3939_v56 }
 0x5f8   :  { %v3901_v58 = vsel %vm238_vm4, %v3896_v32, %v3900_v63  ;;  %v3947_v48 = vor.u32 %v3946_v42, %v3945_v4  ;;  %v3904_v22 = vor.u32 %v3902_v3, %v3900_v63 }
 0x5f9   :  { %3949 = vrot.lane.b32.xlu0 %v3944_v18, %s6312_s12  ;;  %v3929_v44 = vor.u32 %v3928_v38, %v3927_v59 }
 0x5fa   :  { %v3948_v0 = vsel %vm1109_vm10, %v3943_v17, %v3947_v48 }
 0x5fb   :  { %3907 = vrot.lane.b32.xlu1 %v3901_v58, %s6312_s12  ;;  %v3930_v21 = vsel %vm301_vm5, %v3925_v9, %v3929_v44 }
 0x5fd   :  { %3931 = vrot.lane.b32.xlu0 %v3926_v46, %s6313_s13 }
 0x5ff   :  { %3951 = vrot.lane.b32.xlu1 %v3948_v0, %s6312_s12 }
 0x601   :  { %3909 = vrot.lane.b32.xlu0 %v3904_v22, %s6312_s12  ;;  %v6230_v22 = vld [vmem:[#allocation2 + $0x508] sm:$0xff]  }
 0x602   :  { %5912 = vmatprep.subr.bf16.mxu0 %v6230_v22 }
 0x603   :  { %3933 = vrot.lane.b32.xlu1 %v3930_v21, %s6313_s13  ;;  %v6231_v21 = vld [vmem:[#allocation2 + $0x4c8] sm:$0xff]  }
 0x604   :  { %5913 = vmatpush3.bf16.msra.mxu0 %v6231_v21 }
 0x605   :  { %3953 = vrot.lane.b32.xlu0 %v3947_v48, %s6312_s12 }
 0x607   :  { %3921 = vrot.lane.b32.xlu1 %v3915_v10, %s6309_s18 }
 0x60b   :  { %3935 = vrot.lane.b32.xlu1 %v3929_v44, %s6313_s13 }
 0x651   :  { %v3828_v7 = vpop.permute.xlu1 %3827 }
 0x653   :  { %v3816_v14 = vpop.permute.xlu0 %3815 }
 0x654   :  { %v3869_v40 = vsel %vm1183_vm7, %v7649_v41, %v3816_v14  ;;  %v6233_v14 = vld [vmem:[#allocation2 + $0x588] sm:$0xff]  }
 0x655   :  { %v3845_v20 = vpop.permute.xlu1 %3844  ;;  %v3873_v12 = vsel %vm1192_vm8, %v3869_v40, %v3828_v7  ;;  %v6232_v7 = vld [vmem:[#allocation2 + $0x500] sm:$0xff]   ;;  %5946 = vmatprep.subr.bf16.mxu1 %v6233_v14 }
 0x656   :  { %v3877_v31 = vsel %vm1201_vm9, %v3873_v12, %v3845_v20  ;;  %v6237_v40 = vld [vmem:[#allocation2 + $0x580] sm:$0xff]   ;;  %5914 = vmatprep.subr.bf16.mxu0 %v6232_v7  ;;  %v6236_v20 = vld [vmem:[#allocation2 + $0x4f8] sm:$0xff]  }
 0x657   :  { %v3865_v45 = vpop.permute.xlu0 %3864  ;;  %v6241_v12 = vld [vmem:[#allocation2 + $0x578] sm:$0xff]  }
 0x658   :  { %v3884_v47 = vsel %vm1183_vm7, %v3850_v25, %v3865_v45  ;;  %v6238_v25 = vld [vmem:[#allocation2 + $0x4b8] sm:$0xff]   ;;  %v6240_v45 = vld [vmem:[#allocation2 + $0x4f0] sm:$0xff]  }
 0x659   :  { %5368 = vmatprep.mubr.msk.bf16.mxu1 %vm1192_vm8, %v3884_v47  ;;  %v3830_v15 = vpop.permute.xlu1 %3829  ;;  %v6243_v47 = vld [vmem:[#allocation2 + $0x538] sm:$0xff]  }
 0x65a   :  { %4144 = vmatmul.mubr.bf16.vlgmr.msra.gmra.mxu1 %v3877_v31  ;;  %v6245_v31 = vld [vmem:[#allocation2 + $0x570] sm:$0xff]  }
 0x65b   :  { %v3818_v61 = vpop.permute.xlu0 %3817  ;;  %5947 = vmatpush3.bf16.msra.mxu1 %v6235_v35 }
 0x65c   :  { %v3871_v53 = vsel %vm1183_vm7, %v7665_v50, %v3818_v61  ;;  %5948 = vmatprep.subr.bf16.mxu1 %v6237_v40  ;;  %v6244_v61 = vld [vmem:[#allocation2 + $0x4e8] sm:$0xff]   ;;  %v6260_v40 = vld [vmem:[#allocation2 + $0x550] sm:$0xff]  }
 0x65d   :  { %v3847_v41 = vpop.permute.xlu1 %3846  ;;  %v3875_v16 = vsel %vm1192_vm8, %v3871_v53, %v3830_v15  ;;  %v6242_v15 = vld [vmem:[#allocation2 + $0x4b0] sm:$0xff]   ;;  %v6249_v53 = vld [vmem:[#allocation2 + $0x568] sm:$0xff]  }
 0x65e   :  { %v3880_v19 = vsel %vm1201_vm9, %v3875_v16, %v3847_v41  ;;  %v6246_v41 = vld [vmem:[#allocation2 + $0x4a8] sm:$0xff]   ;;  %v6248_v16 = vld [vmem:[#allocation2 + $0x4e0] sm:$0xff]  }
 0x65f   :  { %v3867_v5 = vpop.permute.xlu0 %3866  ;;  %5949 = vmatpush3.bf16.msra.mxu1 %v6239_v28 }
 0x660   :  { %v3887_v52 = vsel %vm1183_vm7, %v3852_v30, %v3867_v5  ;;  %5950 = vmatprep.subr.bf16.mxu1 %v6241_v12  ;;  %v7783_v30 = vld [vmem:[%s7951_s3 + $0x4] ss:$0 sm:$0xff] }
 0x661   :  { %5369 = vmatprep.mubr.msk.bf16.mxu1 %vm1192_vm8, %v3887_v52 }
 0x662   :  { %4152 = vmatmul.mubr.bf16.gmra.mxu1 %v3880_v19  ;;  %v7789_v19 = vld [vmem:[%s7951_s3 + $0xe] ss:$0 sm:$0xff] }
 0x663   :  { %v3918_v36 = vpop.permute.xlu0 %3917  ;;  %5951 = vmatpush3.bf16.msra.mxu1 %v6243_v47 }
 0x664   :  { %5952 = vmatprep.subr.bf16.mxu1 %v6245_v31 }
 0x667   :  { %v3906_v24 = vpop.permute.xlu0 %3905  ;;  %5953 = vmatpush3.bf16.msra.mxu1 %v6247_v27 }
 0x668   :  { %v3956_v62 = vsel %vm1183_vm7, %v7683_v51, %v3906_v24  ;;  %5954 = vmatprep.subr.bf16.mxu1 %v6249_v53 }
 0x669   :  { %v3920_v54 = vpop.permute.xlu1 %3919  ;;  %v3962_v6 = vsel %vm1192_vm8, %v3956_v62, %v3918_v36 }
 0x66b   :  { %v3950_v37 = vpop.permute.xlu0 %3949 }
 0x66c   :  { %v3975_v43 = vsel %vm1183_vm7, %v3938_v11, %v3950_v37 }
 0x66d   :  { %v3908_v50 = vpop.permute.xlu1 %3907  ;;  %v3991_v23 = vrot.slane %v3975_v43, 4 }
 0x66e   :  { %v3958_v2 = vsel %vm1183_vm7, %v7701_v26, %v3908_v50 }
 0x66f   :  { %v3932_v57 = vpop.permute.xlu0 %3931  ;;  %v3964_v8 = vsel %vm1192_vm8, %v3958_v2, %v3920_v54  ;;  %v6250_v2 = vld [vmem:[#allocation2 + $0x4a0] sm:$0xff]  }
 0x670   :  { %v3968_v17 = vsel %vm1201_vm9, %v3962_v6, %v3932_v57 }
 0x671   :  { %v3952_v55 = vpop.permute.xlu1 %3951  ;;  %v3988_v63 = vrot.slane %v3968_v17, 4  ;;  %v6253_v17 = vld [vmem:[#allocation2 + $0x560] sm:$0xff]  }
 0x672   :  { %v3978_v39 = vsel %vm1183_vm7, %v3940_v29, %v3952_v55 }
 0x673   :  { %v3992_v60 = vrot.slane %v3978_v39, 4  ;;  %v3910_v10 = vpop.permute.xlu0 %3909  ;;  %v6251_v39 = vld [vmem:[#allocation2 + $0x528] sm:$0xff]  }
 0x674   :  { %v3960_v48 = vsel %vm1183_vm7, %v7715_v1, %v3910_v10  ;;  %v6234_v1 = vld [vmem:[#allocation2 + $0x4c0] sm:$0xff]   ;;  %v6252_v10 = vld [vmem:[#allocation2 + $0x4d8] sm:$0xff]   ;;  %5955 = vmatpush3.bf16.msra.mxu1 %v6251_v39 }
 0x675   :  { %v3934_v51 = vpop.permute.xlu1 %3933  ;;  %v3993_v3 = vsel %vm108_vm0, %v3991_v23, %v3992_v60  ;;  %5915 = vmatpush3.bf16.msra.mxu0 %v6234_v1  ;;  %5956 = vmatprep.subr.bf16.mxu1 %v6253_v17  ;;  %v6261_v1 = vld [vmem:[#allocation2 + $0x510] sm:$0xff]  }
 0x676   :  { %v3970_v33 = vsel %vm1201_vm9, %v3964_v8, %v3934_v51  ;;  %5370 = vmatprep.mubr.msk.bf16.mxu1 %vm1192_vm8, %v3993_v3  ;;  %5916 = vmatprep.subr.bf16.mxu0 %v6236_v20  ;;  %v6254_v3 = vld [vmem:[#allocation2 + $0x498] sm:$0xff]  }
 0x677   :  { %v3989_v26 = vrot.slane %v3970_v33, 4  ;;  %v3954_v4 = vpop.permute.xlu0 %3953  ;;  %v6255_v33 = vld [vmem:[#allocation2 + $0x520] sm:$0xff]  }
 0x678   :  { %v3981_v42 = vsel %vm1183_vm7, %v3939_v56, %v3954_v4  ;;  %5957 = vmatpush3.bf16.msra.mxu1 %v6255_v33 }
 0x679   :  { %v3996_v18 = vrot.slane %v3981_v42, 4  ;;  %v3922_v32 = vpop.permute.xlu1 %3921  ;;  %v3990_v9 = vsel %vm108_vm0, %v3988_v63, %v3989_v26  ;;  %5917 = vmatpush3.bf16.msra.mxu0 %v6238_v25 }
 0x67a   :  { %4160 = vmatmul.mubr.bf16.gmra.mxu1 %v3990_v9  ;;  %v3966_v59 = vsel %vm1192_vm8, %v3960_v48, %v3922_v32  ;;  %5918 = vmatprep.subr.bf16.mxu0 %v6240_v45  ;;  %v6257_v32 = vld [vmem:[#allocation2 + $0x558] sm:$0xff]  }
 0x67b   :  { %v3997_v58 = vsel %vm108_vm0, %v3992_v60, %v3996_v18  ;;  %v6256_v18 = vld [vmem:[#allocation2 + $0x4d0] sm:$0xff]   ;;  %v6259_v48 = vld [vmem:[#allocation2 + $0x518] sm:$0xff]   ;;  %5958 = vmatprep.subr.bf16.mxu1 %v6257_v32 }
 0x67c   :  { %5371 = vmatprep.mubr.msk.bf16.mxu1 %vm1192_vm8, %v3997_v58  ;;  %v6258_v58 = vld [vmem:[#allocation2 + $0x490] sm:$0xff]   ;;  %5959 = vmatpush3.bf16.msra.mxu1 %v6259_v48 }
 0x67d   :  { %v3936_v38 = vpop.permute.xlu1 %3935  ;;  %5919 = vmatpush3.bf16.msra.mxu0 %v6242_v15  ;;  %5960 = vmatprep.subr.bf16.mxu1 %v6260_v40 }
 0x67e   :  { %v3972_v46 = vsel %vm1201_vm9, %v3966_v59, %v3936_v38  ;;  %5920 = vmatprep.subr.bf16.mxu0 %v6244_v61 }
 0x67f   :  { %v3994_v0 = vrot.slane %v3972_v46, 4 }
 0x680   :  { %5961 = vmatpush3.bf16.msra.mxu1 %v6261_v1 }
 0x681   :  { %v3995_v44 = vsel %vm108_vm0, %v3989_v26, %v3994_v0  ;;  %5921 = vmatpush3.bf16.msra.mxu0 %v6246_v41 }
 0x682   :  { %4168 = vmatmul.mubr.bf16.gmra.mxu1 %v3995_v44  ;;  %5922 = vmatprep.subr.bf16.mxu0 %v6248_v16 }
 0x685   :  { %5923 = vmatpush3.bf16.msra.mxu0 %v6250_v2 }
 0x686   :  { %5924 = vmatprep.subr.bf16.mxu0 %v6252_v10 }
 0x689   :  { %5925 = vmatpush3.bf16.msra.mxu0 %v6254_v3 }
 0x68a   :  { %5926 = vmatprep.subr.bf16.mxu0 %v6256_v18 }
 0x68d   :  { %5927 = vmatpush3.bf16.msra.mxu0 %v6258_v58 }
 0x71a   :  { %v4145_v5 = vpop.f32.mrf.mxu1 }
 0x71b   :  { %v4146_v52 = vadd.f32 %v7783_v30, %v4145_v5 }
 0x71c   :  { %v4147_v36 = vpop.f32.mrf.mxu1 }
 0x71d   :  { %v4189_v54 = vmul.f32 %v7789_v19, %v4146_v52  ;;  %vm4177_vm7 = vcmp.gt.f32.partialorder %v4146_v52, 0.0 }
 0x71e   :  { %v4148_v24 = vpop.f32.mrf.mxu1 }
 0x71f   :  { %v4149_v49 = vadd.f32 %v7783_v30, %v4148_v24  ;;  %v4197_v11 = vsel %vm4177_vm7, %v4146_v52, %v4189_v54 }
 0x720   :  { %v4150_v37 = vpop.f32.mrf.mxu1 }
 0x721   :  { %vm4178_vm9 = vcmp.gt.f32.partialorder %v4149_v49, 0.0  ;;  %v4190_v50 = vmul.f32 %v7789_v19, %v4149_v49 }
 0x722   :  { %v4153_v56 = vpop.f32.mrf.mxu1 }
 0x723   :  { %v4198_v57 = vsel %vm4178_vm9, %v4149_v49, %v4190_v50  ;;  %v4154_v62 = vadd.f32 %v7783_v30, %v4153_v56 }
 0x724   :  { %v7795_v43 = vpack.c.bf16 %v4198_v57, %v4197_v11  ;;  %v4155_v29 = vpop.f32.mrf.mxu1 }
 0x725   :  { %v4191_v23 = vmul.f32 %v7789_v19, %v4154_v62  ;;  %vm4179_vm12 = vcmp.gt.f32.partialorder %v4154_v62, 0.0 }
 0x726   :  { %v4156_v55 = vpop.f32.mrf.mxu1  ;;  %v7800_v60 = vshll.u32 %v7795_v43, 16  ;;  %v4210_v4 = vshrl.u32 %v7795_v43, 16 }
 0x727   :  { %v4157_v6 = vadd.f32 %v7783_v30, %v4156_v55  ;;  %v4199_v63 = vsel %vm4179_vm12, %v4154_v62, %v4191_v23  ;;  %vm5172_vm12 = vcmask 1041408  }
 0x728   :  { %v4158_v8 = vpop.f32.mrf.mxu1  ;;  %v4214_v42 = vrot.slane %v7800_v60, 1  ;;  %v4247_v0 = vrot.slane %v4210_v4, 2  ;;  %v4248_v44 = vrot.slane %v7800_v60, 3  ;;  %v4233_v45 = vrot.slane %v4210_v4, 1 }
 0x729   :  { %vm4180_vm15 = vcmp.gt.f32.partialorder %v4157_v6, 0.0  ;;  %v4192_v51 = vmul.f32 %v7789_v19, %v4157_v6  ;;  %v4234_v47 = vrot.slane %v7800_v60, 2  ;;  %v4261_v41 = vrot.slane %v4210_v4, 3 }
 0x72a   :  { %v4215_v46 = vor.u32 %v4214_v42, %v4210_v4  ;;  %v4249_v25 = vor.u32 %v4248_v44, %v4247_v0  ;;  %v4262_v16 = vrot.slane %v7800_v60, 4 }
 0x72b   :  { %v4200_v26 = vsel %vm4180_vm15, %v4157_v6, %v4192_v51  ;;  %v4235_v53 = vor.u32 %v4234_v47, %v4233_v45  ;;  %vm5190_vm15 = vcmask 1024  }
 0x72c   :  { %v7805_v9 = vpack.c.bf16 %v4200_v26, %v4199_v63  ;;  %v4263_v49 = vor.u32 %v4262_v16, %v4261_v41 }
 0x72e   :  { %v4217_v59 = vshll.u32 %v7805_v9, 16  ;;  %v4221_v38 = vshrl.u32 %v7805_v9, 16 }
 0x730   :  { %v4219_v22 = vrot.slane %v4217_v59, 1  ;;  %v4236_v21 = vrot.slane %v4221_v38, 1  ;;  %v4237_v7 = vrot.slane %v4217_v59, 2  ;;  %v4250_v14 = vrot.slane %v4221_v38, 2 }
 0x731   :  { %v4251_v35 = vrot.slane %v4217_v59, 3  ;;  %v4264_v61 = vrot.slane %v4221_v38, 3  ;;  %v4265_v27 = vrot.slane %v4217_v59, 4 }
 0x732   :  { %v4220_v20 = vsel %vm238_vm4, %v4215_v46, %v4219_v22  ;;  %v4238_v28 = vor.u32 %v4237_v7, %v4236_v21  ;;  %v4223_v15 = vor.u32 %v4221_v38, %v4219_v22 }
 0x733   :  { %4224 = vrot.lane.b32.xlu1 %v4220_v20, %s6309_s18  ;;  %v7812_v12 = vor.u32 %v4251_v35, %v4250_v14  ;;  %v4266_v24 = vor.u32 %v4265_v27, %v4264_v61 }
 0x734   :  { %4242 = vrot.lane.b32.xlu0 %v4238_v28, %s6309_s18  ;;  %v4239_v36 = vsel %vm301_vm5, %v4235_v53, %v4238_v28  ;;  %v4231_v53 = vrot.slane %v7805_v9, 1 }
 0x735   :  { %v4253_v31 = vsel %vm1109_vm10, %v4249_v25, %v7812_v12  ;;  %v4267_v11 = vsel %vm1155_vm13, %v4263_v49, %v4266_v24 }
 0x737   :  { %4254 = vrot.lane.b32.xlu1 %v4253_v31, %s6309_s18 }
 0x738   :  { %4226 = vrot.lane.b32.xlu0 %v4223_v15, %s6309_s18 }
 0x73a   :  { %v4161_v5 = vpop.f32.mrf.mxu1 }
 0x73b   :  { %v4162_v52 = vadd.f32 %v7783_v30, %v4161_v5  ;;  %v4230_v5 = vrot.slane %v7795_v43, 1 }
 0x73c   :  { %4240 = vrot.lane.b32.xlu0 %v4239_v36, %s6309_s18  ;;  %v4163_v54 = vpop.f32.mrf.mxu1 }
 0x73d   :  { %v4193_v50 = vmul.f32 %v7789_v19, %v4162_v52  ;;  %vm4181_vm2 = vcmp.gt.f32.partialorder %v4162_v52, 0.0  ;;  %v4232_v36 = vsel %vm287_vm3, %v4230_v5, %v4231_v53  ;;  %v4245_v54 = vrot.slane %v7805_v9, 2 }
 0x73e   :  { %v4164_v37 = vpop.f32.mrf.mxu1 }
 0x73f   :  { %v4165_v56 = vadd.f32 %v7783_v30, %v4164_v37  ;;  %v4201_v55 = vsel %vm4181_vm2, %v4162_v52, %v4193_v50  ;;  %v4258_v50 = vrot.slane %v7795_v43, 3 }
 0x740   :  { %4268 = vrot.lane.b32.xlu0 %v4267_v11, %s6309_s18  ;;  %v4166_v57 = vpop.f32.mrf.mxu1 }
 0x741   :  { %vm4182_vm14 = vcmp.gt.f32.partialorder %v4165_v56, 0.0  ;;  %v4194_v62 = vmul.f32 %v7789_v19, %v4165_v56 }
 0x742   :  { %v4169_v29 = vpop.f32.mrf.mxu1 }
 0x743   :  { %v4202_v2 = vsel %vm4182_vm14, %v4165_v56, %v4194_v62  ;;  %v4170_v39 = vadd.f32 %v7783_v30, %v4169_v29  ;;  %v4244_v56 = vrot.slane %v7795_v43, 2 }
 0x744   :  { %v7830_v23 = vpack.c.bf16 %v4202_v2, %v4201_v55  ;;  %v4171_v6 = vpop.f32.mrf.mxu1 }
 0x745   :  { %v4195_v10 = vmul.f32 %v7789_v19, %v4170_v39  ;;  %vm4183_vm7 = vcmp.gt.f32.partialorder %v4170_v39, 0.0  ;;  %v4246_v29 = vsel %vm1099_vm6, %v4244_v56, %v4245_v54  ;;  %v6270_v56 = vld [vmem:[#allocation2 + $0x5e8] sm:$0xff]  }
 0x746   :  { %v4172_v60 = vpop.f32.mrf.mxu1  ;;  %v4301_v51 = vshll.u32 %v7830_v23, 16  ;;  %v4299_v33 = vshrl.u32 %v7830_v23, 16 }
 0x747   :  { %v4173_v17 = vadd.f32 %v7783_v30, %v4172_v60  ;;  %v4203_v63 = vsel %vm4183_vm7, %v4170_v39, %v4195_v10  ;;  %v4319_v60 = vrot.slane %v7830_v23, 1 }
 0x748   :  { %v4174_v8 = vpop.f32.mrf.mxu1  ;;  %v4303_v42 = vrot.slane %v4301_v51, 1  ;;  %v4322_v18 = vrot.slane %v4299_v33, 1  ;;  %v4323_v32 = vrot.slane %v4301_v51, 2  ;;  %v4350_v14 = vrot.slane %v4299_v33, 3 }
 0x749   :  { %vm4184_vm9 = vcmp.gt.f32.partialorder %v4173_v17, 0.0  ;;  %v4196_v3 = vmul.f32 %v7789_v19, %v4173_v17  ;;  %v4351_v35 = vrot.slane %v4301_v51, 4  ;;  %v4336_v25 = vrot.slane %v4299_v33, 2 }
 0x74a   :  { %v4304_v48 = vor.u32 %v4303_v42, %v4299_v33  ;;  %v4324_v0 = vor.u32 %v4323_v32, %v4322_v18  ;;  %v4337_v45 = vrot.slane %v4301_v51, 3 }
 0x74b   :  { %v4204_v26 = vsel %vm4184_vm9, %v4173_v17, %v4196_v3  ;;  %v4352_v28 = vor.u32 %v4351_v35, %v4350_v14 }
 0x74c   :  { %v7837_v4 = vpack.c.bf16 %v4204_v26, %v4203_v63  ;;  %v4338_v15 = vor.u32 %v4337_v45, %v4336_v25 }
 0x74e   :  { %v4306_v58 = vshll.u32 %v7837_v4, 16  ;;  %v4310_v30 = vshrl.u32 %v7837_v4, 16  ;;  %v4320_v39 = vrot.slane %v7837_v4, 1  ;;  %v4348_v63 = vrot.slane %v7837_v4, 3 }
 0x750   :  { %v4308_v59 = vrot.slane %v4306_v58, 1  ;;  %v4325_v38 = vrot.slane %v4310_v30, 1  ;;  %v4326_v46 = vrot.slane %v4306_v58, 2  ;;  %v4353_v22 = vrot.slane %v4310_v30, 3 }
 0x751   :  { %v4354_v21 = vrot.slane %v4306_v58, 4  ;;  %v4339_v1 = vrot.slane %v4310_v30, 2  ;;  %v4340_v20 = vrot.slane %v4306_v58, 3  ;;  %v4321_v10 = vsel %vm287_vm3, %v4319_v60, %v4320_v39  ;;  %v6276_v60 = vld [vmem:[#allocation2 + $0x5d0] sm:$0xff]  }
 0x752   :  { %v4309_v19 = vsel %vm238_vm4, %v4304_v48, %v4308_v59  ;;  %v4327_v44 = vor.u32 %v4326_v46, %v4325_v38  ;;  %v4347_v58 = vrot.slane %v7830_v23, 3  ;;  %v4334_v38 = vrot.slane %v7837_v4, 2 }
 0x753   :  { %4313 = vrot.lane.b32.xlu1 %v4309_v19, %s6309_s18  ;;  %v4355_v40 = vor.u32 %v4354_v21, %v4353_v22  ;;  %v4341_v31 = vor.u32 %v4340_v20, %v4339_v1 }
 0x754   :  { %v4328_v7 = vsel %vm301_vm5, %v4324_v0, %v4327_v44  ;;  %v4349_v48 = vsel %vm109_vm1, %v4347_v58, %v4348_v63 }
 0x755   :  { %4329 = vrot.lane.b32.xlu0 %v4328_v7, %s6309_s18  ;;  %v4356_v47 = vsel %vm1155_vm13, %v4352_v28, %v4355_v40  ;;  %v4342_v61 = vsel %vm1109_vm10, %v4338_v15, %v4341_v31 }
 0x757   :  { %4256 = vrot.lane.b32.xlu1 %v7812_v12, %s6309_s18  ;;  %v4312_v12 = vor.u32 %v4310_v30, %v4308_v59 }
 0x759   :  { %4270 = vrot.lane.b32.xlu0 %v4266_v24, %s6309_s18  ;;  %v4259_v24 = vrot.slane %v7805_v9, 3 }
 0x75b   :  { %4357 = vrot.lane.b32.xlu1 %v4356_v47, %s6309_s18  ;;  %v4260_v62 = vsel %vm109_vm1, %v4258_v50, %v4259_v24  ;;  %v6269_v50 = vld [vmem:[#allocation2 + $0x5b0] sm:$0xff]  }
 0x75d   :  { %4331 = vrot.lane.b32.xlu0 %v4327_v44, %s6309_s18 }
 0x75f   :  { %4343 = vrot.lane.b32.xlu1 %v4342_v61, %s6309_s18 }
 0x761   :  { %4359 = vrot.lane.b32.xlu0 %v4355_v40, %s6309_s18 }
 0x763   :  { %4315 = vrot.lane.b32.xlu1 %v4312_v12, %s6309_s18 }
 0x767   :  { %4345 = vrot.lane.b32.xlu1 %v4341_v31, %s6309_s18 }
 0x7a5   :  { %v4225_v16 = vpop.permute.xlu1 %4224 }
 0x7a6   :  { %v4243_v27 = vpop.permute.xlu0 %4242  ;;  %v4273_v37 = vsel %vm1192_vm8, %v7795_v43, %v4225_v16 }
 0x7a7   :  { %v4283_v26 = vsel %vm1192_vm8, %v4231_v53, %v4243_v27 }
 0x7a9   :  { %v4255_v11 = vpop.permute.xlu1 %4254 }
 0x7aa   :  { %v4227_v41 = vpop.permute.xlu0 %4226  ;;  %v4286_v2 = vsel %vm1192_vm8, %v4246_v29, %v4255_v11  ;;  %v6271_v11 = vld [vmem:[#allocation2 + $0x5a8] sm:$0xff]   ;;  %v6273_v29 = vld [vmem:[#allocation2 + $0x5a0] sm:$0xff]  }
 0x7ab   :  { %v4276_v42 = vsel %vm1192_vm8, %v7805_v9, %v4227_v41  ;;  %v4333_v9 = vrot.slane %v7830_v23, 2 }
 0x7ad   :  { %v4335_v7 = vsel %vm1099_vm6, %v4333_v9, %v4334_v38 }
 0x7ae   :  { %v4241_v52 = vpop.permute.xlu0 %4240 }
 0x7af   :  { %v4279_v49 = vsel %vm1192_vm8, %v4232_v36, %v4241_v52  ;;  %v6262_v52 = vld [vmem:[#allocation2 + $0x608] sm:$0xff]  }
 0x7b0   :  { %4712 = vmatprep.mubr.bf16.mxu0 %v4279_v49  ;;  %v6263_v36 = vld [vmem:[#allocation2 + $0x5c8] sm:$0xff]   ;;  %5980 = vmatprep.subr.bf16.mxu0 %v6262_v52  ;;  %v6267_v49 = vld [vmem:[#allocation2 + $0x5b8] sm:$0xff]  }
 0x7b1   :  { %4713 = vmatmul.mubr.bf16.vlgmr.msra.gmra.mxu0 %v4273_v37  ;;  %v6268_v37 = vld [vmem:[#allocation2 + $0x5f0] sm:$0xff]  }
 0x7b2   :  { %v4269_v57 = vpop.permute.xlu0 %4268  ;;  %5981 = vmatpush3.bf16.msra.mxu0 %v6263_v36 }
 0x7b3   :  { %v4293_v55 = vsel %vm1192_vm8, %v4260_v62, %v4269_v57  ;;  %v6272_v57 = vld [vmem:[#allocation2 + $0x5e0] sm:$0xff]   ;;  %v6278_v62 = vld [vmem:[#allocation2 + $0x648] sm:$0xff]  }
 0x7b4   :  { %4769 = vmatprep.mubr.bf16.mxu1 %v4293_v55  ;;  %v6315_v55 = vmov 0.0  }
 0x7b5   :  { %4770 = vmatmul.mubr.bf16.vlgmr.msra.gmra.mxu1 %v4286_v2  ;;  %6055 = vmatprep.subr.bf16.mxu1 %v6315_v55  ;;  %v6274_v2 = vld [vmem:[#allocation2 + $0x5d8] sm:$0xff]  }
 0x7b6   :  { %6056 = vmatpush3.bf16.msra.mxu1 %v6278_v62 }
 0x7b7   :  { %6057 = vmatprep.subr.bf16.mxu1 %v6315_v55 }
 0x7c5   :  { %v4314_v6 = vpop.permute.xlu1 %4313 }
 0x7c6   :  { %v4362_v43 = vsel %vm1192_vm8, %v7830_v23, %v4314_v6  ;;  %v6275_v6 = vld [vmem:[#allocation2 + $0x598] sm:$0xff]  }
 0x7c7   :  { %v4330_v17 = vpop.permute.xlu0 %4329  ;;  %v4391_v8 = vrot.slane %v4362_v43, 4  ;;  %v6280_v43 = vld [vmem:[#allocation2 + $0x638] sm:$0xff]  }
 0x7c8   :  { %v4367_v51 = vsel %vm1192_vm8, %v4321_v10, %v4330_v17  ;;  %v6277_v10 = vld [vmem:[#allocation2 + $0x590] sm:$0xff]  }
 0x7c9   :  { %v4392_v3 = vrot.slane %v4367_v51, 4  ;;  %v4257_v33 = vpop.permute.xlu1 %4256  ;;  %v4408_v30 = vsel %vm108_vm0, %v4276_v42, %v4391_v8  ;;  %v6281_v17 = vld [vmem:[#allocation2 + $0x630] sm:$0xff]  }
 0x7ca   :  { %v4290_v25 = vsel %vm1192_vm8, %v4245_v54, %v4257_v33  ;;  %v6266_v54 = vld [vmem:[#allocation2 + $0x5f8] sm:$0xff]  }
 0x7cb   :  { %v4271_v18 = vpop.permute.xlu0 %4270  ;;  %v4411_v32 = vsel %vm108_vm0, %v4283_v26, %v4392_v3 }
 0x7cc   :  { %4720 = vmatprep.mubr.bf16.mxu0 %v4411_v32  ;;  %v4297_v44 = vsel %vm1192_vm8, %v4259_v24, %v4271_v18  ;;  %v6264_v24 = vld [vmem:[#allocation2 + $0x600] sm:$0xff]  }
 0x7cd   :  { %v4358_v59 = vpop.permute.xlu1 %4357  ;;  %4721 = vmatmul.mubr.bf16.gmra.mxu0 %v4408_v30  ;;  %5982 = vmatprep.subr.bf16.mxu0 %v6264_v24 }
 0x7ce   :  { %v4379_v46 = vsel %vm1192_vm8, %v4349_v48, %v4358_v59 }
 0x7cf   :  { %v4394_v0 = vrot.slane %v4379_v46, 4  ;;  %v4332_v19 = vpop.permute.xlu0 %4331  ;;  %v5373_v46 = vld [vmem:[%s7951_s3 + $0x5] ss:$0 sm:$0xff] }
 0x7d0   :  { %v4370_v22 = vsel %vm1192_vm8, %v4320_v39, %v4332_v19  ;;  %v6279_v39 = vld [vmem:[#allocation2 + $0x640] sm:$0xff]  }
 0x7d1   :  { %v4397_v21 = vrot.slane %v4370_v22, 4  ;;  %v4344_v14 = vpop.permute.xlu1 %4343  ;;  %v4417_v35 = vsel %vm108_vm0, %v4297_v44, %v4394_v0  ;;  %6058 = vmatpush3.bf16.msra.mxu1 %v6279_v39 }
 0x7d2   :  { %v4373_v40 = vsel %vm1192_vm8, %v4335_v7, %v4344_v14  ;;  %4777 = vmatprep.mubr.bf16.mxu1 %v4417_v35  ;;  %6059 = vmatprep.subr.bf16.mxu1 %v6315_v55  ;;  %v5406_v14 = vld [vmem:[%s7951_s3 + $0xf] ss:$0 sm:$0xff] }
 0x7d3   :  { %v4393_v1 = vrot.slane %v4373_v40, 4  ;;  %v4360_v20 = vpop.permute.xlu0 %4359  ;;  %v4398_v28 = vsel %vm108_vm0, %v4392_v3, %v4397_v21 }
 0x7d4   :  { %v4382_v23 = vsel %vm1192_vm8, %v4348_v63, %v4360_v20  ;;  %4728 = vmatprep.mubr.bf16.mxu0 %v4398_v28 }
 0x7d5   :  { %v4401_v45 = vrot.slane %v4382_v23, 4  ;;  %v4316_v47 = vpop.permute.xlu1 %4315  ;;  %v4414_v31 = vsel %vm108_vm0, %v4290_v25, %v4393_v1  ;;  %6060 = vmatpush3.bf16.msra.mxu1 %v6280_v43 }
 0x7d6   :  { %v4364_v15 = vsel %vm1192_vm8, %v7837_v4, %v4316_v47  ;;  %4778 = vmatmul.mubr.bf16.gmra.mxu1 %v4414_v31  ;;  %v6265_v4 = vld [vmem:[#allocation2 + $0x5c0] sm:$0xff]   ;;  %6061 = vmatprep.subr.bf16.mxu1 %v6315_v55 }
 0x7d7   :  { %v4395_v61 = vrot.slane %v4364_v15, 4  ;;  %v4402_v12 = vsel %vm108_vm0, %v4394_v0, %v4401_v45  ;;  %5983 = vmatpush3.bf16.msra.mxu0 %v6265_v4 }
 0x7d8   :  { %4785 = vmatprep.mubr.bf16.mxu1 %v4402_v12  ;;  %5984 = vmatprep.subr.bf16.mxu0 %v6266_v54 }
 0x7d9   :  { %v4346_v27 = vpop.permute.xlu1 %4345  ;;  %v4396_v53 = vsel %vm108_vm0, %v4391_v8, %v4395_v61  ;;  %6062 = vmatpush3.bf16.msra.mxu1 %v6281_v17  ;;  %v6282_v8 = vld [vmem:[#allocation2 + $0x628] sm:$0xff]  }
 0x7da   :  { %v4376_v41 = vsel %vm1192_vm8, %v4334_v38, %v4346_v27  ;;  %4729 = vmatmul.mubr.bf16.gmra.mxu0 %v4396_v53  ;;  %6063 = vmatprep.subr.bf16.mxu1 %v6315_v55 }
 0x7db   :  { %v4399_v16 = vrot.slane %v4376_v41, 4  ;;  %5985 = vmatpush3.bf16.msra.mxu0 %v6267_v49 }
 0x7dc   :  { %5986 = vmatprep.subr.bf16.mxu0 %v6268_v37  ;;  %v2990_v37 = vadd.s32 16, %v7496_v13 }
 0x7dd   :  { %v4400_v5 = vsel %vm108_vm0, %v4393_v1, %v4399_v16  ;;  %6064 = vmatpush3.bf16.msra.mxu1 %v6282_v8 }
 0x7de   :  { %4786 = vmatmul.mubr.bf16.gmra.mxu1 %v4400_v5  ;;  %6065 = vmatprep.subr.bf16.mxu1 %v6315_v55  ;;  %vm4822_vm10 = vcmp.lt.s32.totalorder %v2990_v37, 17 }
 0x7df   :  { %5987 = vmatpush3.bf16.msra.mxu0 %v6269_v50 }
 0x7e0   :  { %5988 = vmatprep.subr.bf16.mxu0 %v6270_v56 }
 0x7e3   :  { %5989 = vmatpush3.bf16.msra.mxu0 %v6271_v11 }
 0x7e4   :  { %5990 = vmatprep.subr.bf16.mxu0 %v6272_v57 }
 0x7e7   :  { %5991 = vmatpush3.bf16.msra.mxu0 %v6273_v29 }
 0x7e8   :  { %5992 = vmatprep.subr.bf16.mxu0 %v6274_v2 }
 0x7eb   :  { %5993 = vmatpush3.bf16.msra.mxu0 %v6275_v6 }
 0x7ec   :  { %5994 = vmatprep.subr.bf16.mxu0 %v6276_v60 }
 0x7ef   :  { %5995 = vmatpush3.bf16.msra.mxu0 %v6277_v10 }
 0x871   :  { %v5928_v51 = vpop.f32.mrf.mxu0 }
 0x873   :  { %v5929_v33 = vpop.f32.mrf.mxu0 }
 0x874   :  { %v5930_v48 = vadd.f32 %v5929_v33, %v5928_v51 }
 0x875   :  { %v5962_v3 = vpop.f32.mrf.mxu1  ;;  %v5931_v26 = vpop.f32.mrf.mxu0 }
 0x876   :  { %v4715_v44 = vadd.f32 %v5930_v48, %v5373_v46 }
 0x877   :  { %v5963_v63 = vpop.f32.mrf.mxu1  ;;  %v5932_v18 = vpop.f32.mrf.mxu0 }
 0x878   :  { %v5933_v58 = vadd.f32 %v5932_v18, %v5931_v26  ;;  %v5964_v19 = vadd.f32 %v5963_v63, %v5962_v3 }
 0x879   :  { %v5965_v42 = vpop.f32.mrf.mxu1 }
 0x87a   :  { %v4718_v0 = vadd.f32 %v5933_v58, %v5373_v46  ;;  %v4772_v21 = vadd.f32 %v5964_v19, %v4715_v44 }
 0x87b   :  { %v5966_v32 = vpop.f32.mrf.mxu1 }
 0x87c   :  { %v5967_v59 = vadd.f32 %v5966_v32, %v5965_v42  ;;  %v4805_v28 = vmul.f32 %v5406_v14, %v4772_v21  ;;  %vm4795_vm3 = vcmp.gt.f32.partialorder %v4772_v21, 0.0 }
 0x87e   :  { %v4775_v22 = vadd.f32 %v5967_v59, %v4718_v0  ;;  %v4811_v53 = vsel %vm4795_vm3, %v4772_v21, %v4805_v28 }
 0x880   :  { %v4806_v1 = vmul.f32 %v5406_v14, %v4775_v22  ;;  %vm4796_vm1 = vcmp.gt.f32.partialorder %v4775_v22, 0.0 }
 0x882   :  { %v4812_v15 = vsel %vm4796_vm1, %v4775_v22, %v4806_v1 }
 0x883   :  { %v4817_v52 = vpack.c.bf16 %v4812_v15, %v4811_v53  ;;  %v6285_v53 = vld [vmem:[#allocation2 + $0x610] sm:$0xff]  }
 0x885   :  { %v4823_v29 = vunpack.c.l.bf16 %v4817_v52  ;;  %v4824_v39 = vunpack.c.h.bf16 %v4817_v52  ;;  %v5424_v52 = vld [vmem:[%s7951_s3 + $0x10] ss:$0 sm:$0xff] }
 0x887   :  { %v4835_v33 = vmax.f32 %v4823_v29, %v4824_v39  ;;  %v5435_v29 = vld [vmem:[%s7951_s3 + $0x8] ss:$0 sm:$0xff] }
 0x88d   :  { %v5934_v30 = vpop.f32.mrf.mxu0 }
 0x88f   :  { %v5935_v38 = vpop.f32.mrf.mxu0 }
 0x890   :  { %v5936_v7 = vadd.f32 %v5935_v38, %v5934_v30 }
 0x891   :  { %v5937_v9 = vpop.f32.mrf.mxu0 }
 0x892   :  { %v4723_v25 = vadd.f32 %v5936_v7, %v5373_v46 }
 0x893   :  { %v5938_v35 = vpop.f32.mrf.mxu0 }
 0x894   :  { %v5939_v23 = vadd.f32 %v5938_v35, %v5937_v9 }
 0x896   :  { %v5968_v40 = vpop.f32.mrf.mxu1  ;;  %v4726_v41 = vadd.f32 %v5939_v23, %v5373_v46 }
 0x898   :  { %v5969_v20 = vpop.f32.mrf.mxu1 }
 0x899   :  { %v5970_v45 = vadd.f32 %v5969_v20, %v5968_v40 }
 0x89a   :  { %v5940_v47 = vpop.f32.mrf.mxu0  ;;  %v5971_v31 = vpop.f32.mrf.mxu1 }
 0x89b   :  { %v4780_v61 = vadd.f32 %v5970_v45, %v4723_v25 }
 0x89c   :  { %v5941_v12 = vpop.f32.mrf.mxu0  ;;  %v5972_v27 = vpop.f32.mrf.mxu1 }
 0x89d   :  { %v5942_v16 = vadd.f32 %v5941_v12, %v5940_v47  ;;  %v5973_v5 = vadd.f32 %v5972_v27, %v5971_v31  ;;  %v4807_v4 = vmul.f32 %v5406_v14, %v4780_v61  ;;  %vm4797_vm4 = vcmp.gt.f32.partialorder %v4780_v61, 0.0  ;;  %v6283_v12 = vld [vmem:[#allocation2 + $0x620] sm:$0xff]   ;;  %v6284_v27 = vld [vmem:[#allocation2 + $0x618] sm:$0xff]  }
 0x89e   :  { %v5943_v36 = vpop.f32.mrf.mxu0  ;;  %v5974_v24 = vpop.f32.mrf.mxu1  ;;  %6066 = vmatpush3.bf16.msra.mxu1 %v6283_v12 }
 0x89f   :  { %v4783_v54 = vadd.f32 %v5973_v5, %v4726_v41  ;;  %v4731_v49 = vadd.f32 %v5942_v16, %v5373_v46  ;;  %v4813_v6 = vsel %vm4797_vm4, %v4780_v61, %v4807_v4  ;;  %v4865_v61 = vpack.c.bf16 %v7619_v34, %v7619_v34  ;;  %6067 = vmatprep.subr.bf16.mxu1 %v6315_v55  ;;  %v5407_v34 = vld [vmem:[%s7951_s3 + $0x6] ss:$0 sm:$0xff] }
 0x8a0   :  { %v5944_v50 = vpop.f32.mrf.mxu0  ;;  %v5975_v56 = vpop.f32.mrf.mxu1 }
 0x8a1   :  { %vm4798_vm5 = vcmp.gt.f32.partialorder %v4783_v54, 0.0  ;;  %v4808_v11 = vmul.f32 %v5406_v14, %v4783_v54  ;;  %v5945_v57 = vadd.f32 %v5944_v50, %v5943_v36  ;;  %v5976_v62 = vadd.f32 %v5975_v56, %v5974_v24  ;;  %v5434_v56 = vld [vmem:[%s7951_s3 + $0x11] ss:$0 sm:$0xff] }
 0x8a2   :  { %v5977_v2 = vpop.f32.mrf.mxu1  ;;  %6068 = vmatpush3.bf16.msra.mxu1 %v6284_v27 }
 0x8a3   :  { %v4814_v60 = vsel %vm4798_vm5, %v4783_v54, %v4808_v11  ;;  %v4788_v43 = vadd.f32 %v5976_v62, %v4731_v49  ;;  %v4734_v8 = vadd.f32 %v5945_v57, %v5373_v46  ;;  %6069 = vmatprep.subr.bf16.mxu1 %v6315_v55 }
 0x8a4   :  { %v4818_v10 = vpack.c.bf16 %v4814_v60, %v4813_v6  ;;  %v5978_v17 = vpop.f32.mrf.mxu1 }
 0x8a5   :  { %v5979_v51 = vadd.f32 %v5978_v17, %v5977_v2  ;;  %v4809_v13 = vmul.f32 %v5406_v14, %v4788_v43  ;;  %vm4799_vm13 = vcmp.gt.f32.partialorder %v4788_v43, 0.0  ;;  %v5437_v17 = vld [vmem:[%s7951_s3 + $0x12] ss:$0 sm:$0xff] }
 0x8a6   :  { %v4825_v3 = vunpack.c.l.bf16 %v4818_v10  ;;  %v4845_v59 = vrot.slane %v4818_v10, 4  ;;  %6070 = vmatpush3.bf16.msra.mxu1 %v6285_v53  ;;  %v5436_v10 = vld [vmem:[%s7951_s3 + $0x9] ss:$0 sm:$0xff] }
 0x8a7   :  { %v4791_v63 = vadd.f32 %v5979_v51, %v4734_v8  ;;  %v4815_v32 = vsel %vm4799_vm13, %v4788_v43, %v4809_v13 }
 0x8a8   :  { %v4834_v26 = vsel %vm4822_vm10, %v4825_v3, -inf }
 0x8a9   :  { %v4836_v42 = vmax.f32 %v4835_v33, %v4834_v26  ;;  %vm4800_vm6 = vcmp.gt.f32.partialorder %v4791_v63, 0.0  ;;  %v4810_v18 = vmul.f32 %v5406_v14, %v4791_v63 }
 0x8ab   :  { %v4816_v58 = vsel %vm4800_vm6, %v4791_v63, %v4810_v18  ;;  %v4837_v48 = vrot.slane %v4836_v42, 4 }
 0x8ac   :  { %v4819_v30 = vpack.c.bf16 %v4816_v58, %v4815_v32 }
 0x8ad   :  { %v4838_v44 = vmax.f32 %v4836_v42, %v4837_v48 }
 0x8ae   :  { %v4846_v38 = vrot.slane %v4819_v30, 4 }
 0x8af   :  { %v4839_v35 = vrot.slane %v4838_v44, 2 }
 0x8b0   :  { %v4847_v0 = vsel %vm108_vm0, %v4845_v59, %v4846_v38  ;;  %v4852_v46 = vunpack.c.l.bf16 %v4846_v38  ;;  %vm6316_vm0 = vmmov 0  }
 0x8b1   :  { %v4850_v19 = vunpack.c.l.bf16 %v4847_v0  ;;  %v4851_v9 = vunpack.c.h.bf16 %v4847_v0  ;;  %v4840_v1 = vmax.f32 %v4838_v44, %v4839_v35  ;;  %6071 = vmatprep.mubr.msk.bf16.mxu1 %vm6316_vm0, %v6315_v55  ;;  %v5425_v55 = vld [vmem:[%s7951_s3 + $0x7] ss:$0 sm:$0xff] }
 0x8b2   :  { %v4855_v21 = vsel %vm4822_vm10, %v4852_v46, -inf }
 0x8b3   :  { %v4856_v22 = vmax.f32 %v4850_v19, %v4851_v9  ;;  %v4841_v28 = vrot.slane %v4840_v1, 1 }
 0x8b5   :  { %v4857_v7 = vmax.f32 %v4856_v22, %v4855_v21  ;;  %v4842_v45 = vmax.f32 %v4840_v1, %v4841_v28 }
 0x8b7   :  { %v4858_v40 = vrot.slane %v4857_v7, 4 }
 0x8b9   :  { %v4859_v14 = vmax.f32 %v4857_v7, %v4858_v40 }
 0x8bb   :  { %v4860_v20 = vrot.slane %v4859_v14, 2 }
 0x8bd   :  { %v4861_v25 = vmax.f32 %v4859_v14, %v4860_v20 }
 0x8bf   :  { %v4862_v23 = vrot.slane %v4861_v25, 1 }
 0x8c1   :  { %v4863_v47 = vmax.f32 %v4861_v25, %v4862_v23 }
 0x8c3   :  { %v4864_v31 = vsel %vm3058_vm11, %v4842_v45, %v4863_v47 }
 0x8c4   :  { %v4866_v15 = vpack.c.bf16 %v4864_v31, %v4864_v31 }
 0x8c6   :  { %5032 = vmatprep.mubr.bf16.mxu0 %v4866_v15 }
 0x8c7   :  { %5033 = vmatmul.mubr.bf16.vlgmr.msra.gmra.mxu0 %v4865_v61 }
 0x987   :  { %v5996_v41 = vpop.f32.mrf.mxu0 }
 0x989   :  { %v5997_v16 = vpop.f32.mrf.mxu0 }
 0x98a   :  { %v5998_v5 = vadd.f32 %v5997_v16, %v5996_v41 }
 0x98b   :  { %v5999_v36 = vpop.f32.mrf.mxu0 }
 0x98c   :  { %v5035_v24 = vadd.f32 %v5998_v5, %v5407_v34 }
 0x98d   :  { %v6000_v4 = vpop.f32.mrf.mxu0 }
 0x98e   :  { %vm5041_vm8 = vcmp.gt.f32.partialorder %v5035_v24, 0.0  ;;  %v5046_v54 = vmul.f32 %v5424_v52, %v5035_v24 }
 0x990   :  { %v5047_v49 = vsel %vm5041_vm8, %v5035_v24, %v5046_v54 }
 0x991   :  { %v5048_v37 = vpack.c.bf16 %v5047_v49, %v5047_v49 }
 0x993   :  { %6072 = vmatmul.mubr.bf16.vlgmr.msra.gmra.mxu1 %v5048_v37 }
 0xa53   :  { %v5152_v50 = vpop.f32.mrf.mxu1 }
 0xa54   :  { %v5153_v11 = vadd.f32 %v5425_v55, %v5152_v50 }
 0xa55   :  { %v6073_v57 = vpop.f32.mrf.mxu1 }
 0xa56   :  { %vm5159_vm11 = vcmp.gt.f32.partialorder %v5153_v11, 0.0  ;;  %v5164_v62 = vmul.f32 %v5434_v56, %v5153_v11 }
 0xa57   :  { %v5155_v2 = vpop.f32.mrf.mxu1 }
 0xa58   :  { %v5165_v39 = vsel %vm5159_vm11, %v5153_v11, %v5164_v62 }
 0xa59   :  { %v6074_v6 = vpop.f32.mrf.mxu1  ;;  %v5171_v60 = vmul.f32 %v5435_v29, %v5165_v39 }
 0xa5b   :  { %v5173_v43 = vsel %vm5172_vm12, %v5171_v60, 0.0 }
 0xa5c   :  { %5174 = vadd.xlane.f32.xlu0 %v5173_v43 }
 0xae5   :  { %v5175_v8 = vpop.xlane.xlu0 %5174 }
 0xae6   :  { %v5181_v51 = vadd.f32 %v5436_v10, %v5175_v8 }
 0xae8   :  { %vm5183_vm2 = vcmp.gt.f32.partialorder %v5181_v51, 0.0  ;;  %v5188_v3 = vmul.f32 %v5437_v17, %v5181_v51 }
 0xaea   :  { %v5189_v33 = vsel %vm5183_vm2, %v5181_v51, %v5188_v3 }
 0xaeb   :  { %5191 = vst.msk [vmem:[%s7952_s4] sm:$0x3] %vm5190_vm15, %v5189_v33 }
 0xaec   :  { %5196 = vsyncpa [#allocation3], 1 }

</bundles_post_ra>
